<compile_context>
chip_gen: v7x
topology: tpu7x:2x2x1
jax: 0.10.0
libtpu: 0.0.40
codegen_flags: <defaults>
</compile_context>

<pallas_src>
import jax
import jax.numpy as jnp
from jax import lax
from jax.experimental import pallas as pl
from jax.experimental.pallas import tpu as pltpu


def _round_up(x, m):
    return (x + m - 1) // m * m


def _pick_tile_h(H, W, Cin_p, Cmid_p, Cout_p, budget_bytes=12 << 20, max_th=128):
    """Largest divisor of H (<= max_th) whose per-tile VMEM footprint fits the budget."""
    Wp = W + 2
    best = 1
    for th in range(1, min(H, max_th) + 1):
        if H % th:
            continue
        vmem = (2 * (th + 5) * Wp * Cin_p * 4        # double-buffered input slab
                + (th + 3) * Wp * Cmid_p * 4         # padded mid scratch
                + 2 * th * Wp * Cout_p * 4           # pipelined output block (2 bufs)
                + (th + 2) * Wp * Cmid_p * 4         # conv1 f32 accumulator temporaries
                + th * Wp * Cout_p * 4)              # conv2 f32 accumulator temporaries
        if vmem <= budget_bytes:
            best = th
    return best


def _make_kernel(H, W, TH, nH, Cin_p, Cmid_p, Cout_p, compute_dtype):
    Wp = W + 2                 # padded / "widened" row width
    M1 = (TH + 2) * Wp         # widened conv1 rows (TH output rows + 1-row halo each side)
    M2 = TH * Wp               # widened conv2 rows
    x_rows = (TH + 5) * Wp     # DMA'd input rows per tile (TH+4 needed + 1 slack row)

    def kernel(x_hbm, w1_ref, s1_ref, t1_ref, a1_ref,
               w2_ref, s2_ref, t2_ref, a2_ref,
               o_ref, xbuf, mid_ref, sem):
        n = pl.program_id(0)
        h = pl.program_id(1)
        slot = h % 2
        nxt = 1 - slot

        def slab_copy(hh, s):
            return pltpu.make_async_copy(
                x_hbm.at[n, pl.ds(hh * TH * Wp, x_rows), :],
                xbuf.at[s], sem.at[s])

        # ---- double-buffered input DMA: prime at h==0, prefetch next tile's slab ----
        @pl.when(h == 0)
        def _():
            slab_copy(0, 0).start()

        @pl.when(h + 1 < nH)
        def _():
            slab_copy(h + 1, nxt).start()       # overlaps with this tile's compute

        slab_copy(h, slot).wait()               # current slab (prefetched last step)
        xv = xbuf.at[slot]

        # ---- conv1: 9 contiguous-slice matmuls over the full padded width ----
        acc1 = jnp.zeros((M1, Cmid_p), jnp.float32)
        for dy in range(3):
            for dx in range(3):
                patch = xv[pl.ds(dy * Wp + dx, M1), :].astype(compute_dtype)
                acc1 = acc1 + jnp.dot(patch, w1_ref[dy, dx],
                                      preferred_element_type=jnp.float32)
        z1 = acc1 * s1_ref[...] + t1_ref[...]              # conv bias + BN(eval) affine
        act1 = jnp.where(z1 > 0, z1, a1_ref[...] * z1)     # PReLU (per-channel slope)

        # zero the 2 wrap-around columns so the shifted contiguous store below also
        # writes the left/right zero padding that conv2 needs
        col = lax.broadcasted_iota(jnp.int32, (M1, 1), 0) % Wp
        act1 = jnp.where(col < W, act1, 0.0)

        # one contiguous, lane-dense store of the whole mid tile (column-shifted by 1)
        mid_ref[pl.ds(1, M1), :] = act1
        # border handling: only a few rows, not a full-buffer zero fill
        mid_ref[pl.ds(0, 1), :] = jnp.zeros((1, Cmid_p), jnp.float32)
        mid_ref[pl.ds((TH + 2) * Wp, Wp), :] = jnp.zeros((Wp, Cmid_p), jnp.float32)

        @pl.when(h == 0)
        def _():  # top image border -> conv2 zero-pad row
            mid_ref[pl.ds(0, Wp), :] = jnp.zeros((Wp, Cmid_p), jnp.float32)

        @pl.when(h == nH - 1)
        def _():  # bottom image border -> conv2 zero-pad row
            mid_ref[pl.ds((TH + 1) * Wp, Wp), :] = jnp.zeros((Wp, Cmid_p), jnp.float32)

        # ---- conv2: same widened-slice scheme on the mid buffer ----
        acc2 = jnp.zeros((M2, Cout_p), jnp.float32)
        for dy in range(3):
            for dx in range(3):
                patch = mid_ref[pl.ds(dy * Wp + dx, M2), :].astype(compute_dtype)
                acc2 = acc2 + jnp.dot(patch, w2_ref[dy, dx],
                                      preferred_element_type=jnp.float32)
        z2 = acc2 * s2_ref[...] + t2_ref[...]
        act2 = jnp.where(z2 > 0, z2, a2_ref[...] * z2)
        o_ref[0] = act2.astype(o_ref.dtype)                # full-lane contiguous store

    return kernel


def unet_block(x_nchw, w1, b1, g1, be1, m1, v1, a1,
               w2, b2, g2, be2, m2, v2, a2,
               eps=1e-5, tile_h=None, compute_dtype=jnp.bfloat16):
    """Pallas UNetBlock forward (eval-mode BN).  PyTorch NCHW / OIHW conventions."""
    N, Cin, H, W = x_nchw.shape
    Cmid, Cout = w1.shape[0], w2.shape[0]
    LANE = 128
    Cin_p, Cmid_p, Cout_p = (_round_up(c, LANE) for c in (Cin, Cmid, Cout))

    if tile_h is None:
        TH = _pick_tile_h(H, W, Cin_p, Cmid_p, Cout_p)
    else:
        TH = max(1, min(tile_h, H))
        while H % TH:          # keep it simple: TH must divide H
            TH -= 1
    nH = H // TH
    Wp = W + 2
    M2 = TH * Wp

    # ---- layout glue (plain JAX): NCHW->NHWC, halo pad, lane pad, flatten ----
    x = jnp.transpose(x_nchw, (0, 2, 3, 1)).astype(jnp.float32)          # NHWC
    x_p = jnp.pad(x, ((0, 0), (2, 3), (1, 1), (0, Cin_p - Cin)))         # 2 top, 2+1 slack bottom, 1 col each side
    x_flat = x_p.reshape(N, (H + 5) * Wp, Cin_p)

    w1_h = jnp.pad(jnp.transpose(w1, (2, 3, 1, 0)),
                   ((0, 0), (0, 0), (0, Cin_p - Cin), (0, Cmid_p - Cmid))
                   ).astype(compute_dtype)                               # (3,3,Cin_p,Cmid_p)
    w2_h = jnp.pad(jnp.transpose(w2, (2, 3, 1, 0)),
                   ((0, 0), (0, 0), (0, Cmid_p - Cmid), (0, Cout_p - Cout))
                   ).astype(compute_dtype)                               # (3,3,Cmid_p,Cout_p)

    # fold conv bias + eval-mode BatchNorm into a per-channel affine (scale, shift)
    s1 = (g1 / jnp.sqrt(v1 + eps)).astype(jnp.float32)
    t1 = ((b1 - m1) * s1 + be1).astype(jnp.float32)
    s2 = (g2 / jnp.sqrt(v2 + eps)).astype(jnp.float32)
    t2 = ((b2 - m2) * s2 + be2).astype(jnp.float32)
    a1v = jnp.broadcast_to(jnp.asarray(a1, jnp.float32).reshape(-1), (Cmid,))
    a2v = jnp.broadcast_to(jnp.asarray(a2, jnp.float32).reshape(-1), (Cout,))

    def _vec(v, cp):
        return jnp.pad(v, (0, cp - v.shape[0])).reshape(1, cp).astype(jnp.float32)

    s1p, t1p, a1p = _vec(s1, Cmid_p), _vec(t1, Cmid_p), _vec(a1v, Cmid_p)
    s2p, t2p, a2p = _vec(s2, Cout_p), _vec(t2, Cout_p), _vec(a2v, Cout_p)

    kernel = _make_kernel(H, W, TH, nH, Cin_p, Cmid_p, Cout_p, compute_dtype)

    out_flat = pl.pallas_call(
        kernel,
        out_shape=jax.ShapeDtypeStruct((N, H * Wp, Cout_p), jnp.float32),
        grid_spec=pltpu.PrefetchScalarGridSpec(
            num_scalar_prefetch=0,
            grid=(N, nH),
            in_specs=[
                pl.BlockSpec(memory_space=pl.ANY),                        # x stays in HBM
                pl.BlockSpec((3, 3, Cin_p, Cmid_p), lambda n, h: (0, 0, 0, 0)),
                pl.BlockSpec((1, Cmid_p), lambda n, h: (0, 0)),
                pl.BlockSpec((1, Cmid_p), lambda n, h: (0, 0)),
                pl.BlockSpec((1, Cmid_p), lambda n, h: (0, 0)),
                pl.BlockSpec((3, 3, Cmid_p, Cout_p), lambda n, h: (0, 0, 0, 0)),
                pl.BlockSpec((1, Cout_p), lambda n, h: (0, 0)),
                pl.BlockSpec((1, Cout_p), lambda n, h: (0, 0)),
                pl.BlockSpec((1, Cout_p), lambda n, h: (0, 0)),
            ],
            out_specs=pl.BlockSpec((1, M2, Cout_p), lambda n, h: (n, h, 0)),
            scratch_shapes=[
                pltpu.VMEM((2, (TH + 5) * Wp, Cin_p), jnp.float32),   # 2-slot input slab
                pltpu.VMEM(((TH + 3) * Wp, Cmid_p), jnp.float32),     # padded mid tile
                pltpu.SemaphoreType.DMA((2,)),
            ],
        ),
        compiler_params=pltpu.CompilerParams(
            # h must iterate sequentially per image for the ping-pong prefetch;
            # the batch axis is still free to be split across cores.
            dimension_semantics=("parallel", "arbitrary")),
    )(x_flat, w1_h, s1p, t1p, a1p, w2_h, s2p, t2p, a2p)

    out = out_flat.reshape(N, H, Wp, Cout_p)[:, :, :W, :Cout]
    return jnp.transpose(out, (0, 3, 1, 2))                              # back to NCHW


def _ref_forward(x_nchw, w1, b1, g1, be1, m1, v1, a1,
                 w2, b2, g2, be2, m2, v2, a2, eps=1e-5):
    """Pure-JAX f32 reference: same math as the PyTorch module in eval mode."""
    x = jnp.transpose(x_nchw, (0, 2, 3, 1))
    dn = ("NHWC", "HWIO", "NHWC")
    w1_h = jnp.transpose(w1, (2, 3, 1, 0))
    w2_h = jnp.transpose(w2, (2, 3, 1, 0))
    y = lax.conv_general_dilated(x, w1_h, (1, 1), "SAME", dimension_numbers=dn) + b1
    y = (y - m1) / jnp.sqrt(v1 + eps) * g1 + be1
    y = jnp.where(y > 0, y, a1 * y)
    y = lax.conv_general_dilated(y, w2_h, (1, 1), "SAME", dimension_numbers=dn) + b2
    y = (y - m2) / jnp.sqrt(v2 + eps) * g2 + be2
    y = jnp.where(y > 0, y, a2 * y)
    return jnp.transpose(y, (0, 3, 1, 2))


if __name__ == "__main__":
    N, Cin, Cmid, Cout, H, W = 2, 4, 8, 4, 16, 16
    key = jax.random.PRNGKey(0)
    ks = jax.random.split(key, 16)

    x = jax.random.normal(ks[0], (N, Cin, H, W), jnp.float32)

    # Conv1 + BN1 + PReLU1 params
    w1 = 0.1 * jax.random.normal(ks[1], (Cmid, Cin, 3, 3), jnp.float32)   # OIHW
    b1 = 0.1 * jax.random.normal(ks[2], (Cmid,), jnp.float32)
    g1 = 1.0 + 0.1 * jax.random.normal(ks[3], (Cmid,), jnp.float32)
    be1 = 0.1 * jax.random.normal(ks[4], (Cmid,), jnp.float32)
    m1 = 0.05 * jax.random.normal(ks[5], (Cmid,), jnp.float32)
    v1 = 1.0 + 0.1 * jax.random.uniform(ks[6], (Cmid,), jnp.float32)
    a1 = jnp.float32(0.25)                                                # PReLU default

    # Conv2 + BN2 + PReLU2 params
    w2 = 0.1 * jax.random.normal(ks[7], (Cout, Cmid, 3, 3), jnp.float32)  # OIHW
    b2 = 0.1 * jax.random.normal(ks[8], (Cout,), jnp.float32)
    g2 = 1.0 + 0.1 * jax.random.normal(ks[9], (Cout,), jnp.float32)
    be2 = 0.1 * jax.random.normal(ks[10], (Cout,), jnp.float32)
    m2 = 0.05 * jax.random.normal(ks[11], (Cout,), jnp.float32)
    v2 = 1.0 + 0.1 * jax.random.uniform(ks[12], (Cout,), jnp.float32)
    a2 = jnp.float32(0.25)

    out = unet_block(x, w1, b1, g1, be1, m1, v1, a1,
                     w2, b2, g2, be2, m2, v2, a2)
    out = jax.block_until_ready(out)

    ref = _ref_forward(x, w1, b1, g1, be1, m1, v1, a1,
                       w2, b2, g2, be2, m2, v2, a2)
    assert out.shape == (N, Cout, H, W), out.shape
    # bf16 MXU operands (f32 accumulation) vs pure-f32 reference -> looser tolerance
    assert jnp.allclose(out, ref, atol=2e-2, rtol=2e-2), float(jnp.max(jnp.abs(out - ref)))
    print("KERNEL_OK")
</pallas_src>

<mosaic_0001>
module attributes {stable_mosaic.version = 11 : i64} {
  func.func @kernel(%arg0: i32, %arg1: i32, %arg2: memref<2x378x128xf32, #tpu.memory_space<any>>, %arg3: memref<3x3x128x128xbf16, #tpu.memory_space<vmem>>, %arg4: memref<1x128xf32, #tpu.memory_space<vmem>>, %arg5: memref<1x128xf32, #tpu.memory_space<vmem>>, %arg6: memref<1x128xf32, #tpu.memory_space<vmem>>, %arg7: memref<3x3x128x128xbf16, #tpu.memory_space<vmem>>, %arg8: memref<1x128xf32, #tpu.memory_space<vmem>>, %arg9: memref<1x128xf32, #tpu.memory_space<vmem>>, %arg10: memref<1x128xf32, #tpu.memory_space<vmem>>, %arg11: memref<1x288x128xf32, #tpu.memory_space<vmem>>, %arg12: memref<2x378x128xf32, #tpu.memory_space<vmem>>, %arg13: memref<342x128xf32, #tpu.memory_space<vmem>>, %arg14: memref<2x!tpu.dma_semaphore, #tpu.memory_space<semaphore_mem>>) attributes {dimension_semantics = [#tpu.dimension_semantics<parallel>, #tpu.dimension_semantics<arbitrary>], iteration_bounds = array<i64: 2, 1>, scalar_prefetch = 0 : i64, scratch_operands = 3 : i64, tpu.core_type = #tpu.core_type<tc>, window_params = [{}, {pipeline_mode = #tpu.pipeline_mode<synchronous>, transform_indices = @transform_1, window_bounds = array<i64: 3, 3, 128, 128>}, {pipeline_mode = #tpu.pipeline_mode<synchronous>, transform_indices = @transform_2, window_bounds = array<i64: 1, 128>}, {pipeline_mode = #tpu.pipeline_mode<synchronous>, transform_indices = @transform_3, window_bounds = array<i64: 1, 128>}, {pipeline_mode = #tpu.pipeline_mode<synchronous>, transform_indices = @transform_4, window_bounds = array<i64: 1, 128>}, {pipeline_mode = #tpu.pipeline_mode<synchronous>, transform_indices = @transform_5, window_bounds = array<i64: 3, 3, 128, 128>}, {pipeline_mode = #tpu.pipeline_mode<synchronous>, transform_indices = @transform_6, window_bounds = array<i64: 1, 128>}, {pipeline_mode = #tpu.pipeline_mode<synchronous>, transform_indices = @transform_7, window_bounds = array<i64: 1, 128>}, {pipeline_mode = #tpu.pipeline_mode<synchronous>, transform_indices = @transform_8, window_bounds = array<i64: 1, 128>}, {transform_indices = @transform_9, window_bounds = array<i64: 1, 288, 128>}]} {
    %c2_i32 = arith.constant 2 : i32
    %c0_i32 = arith.constant 0 : i32
    %0 = arith.cmpi eq, %c2_i32, %c0_i32 : i32
    %c1_i32 = arith.constant 1 : i32
    %1 = arith.select %0, %c1_i32, %c2_i32 : i32
    %2 = arith.remsi %arg1, %1 : i32
    %c0_i32_0 = arith.constant 0 : i32
    %3 = arith.cmpi ne, %2, %c0_i32_0 : i32
    %c0_i32_1 = arith.constant 0 : i32
    %4 = arith.cmpi slt, %2, %c0_i32_1 : i32
    %c0_i32_2 = arith.constant 0 : i32
    %5 = arith.cmpi slt, %1, %c0_i32_2 : i32
    %6 = arith.xori %4, %5 : i1
    %7 = arith.andi %6, %3 : i1
    %8 = arith.addi %2, %1 : i32
    %9 = arith.select %7, %8, %2 : i32
    %c1_i32_3 = arith.constant 1 : i32
    %10 = arith.subi %c1_i32_3, %9 : i32
    %c0_i32_4 = arith.constant 0 : i32
    %11 = arith.cmpi eq, %arg1, %c0_i32_4 : i32
    %12 = arith.extui %11 : i1 to i32
    %c0_i32_5 = arith.constant 0 : i32
    %13 = arith.cmpi ne, %12, %c0_i32_5 : i32
    scf.if %13 {
      %c0_i32_184 = arith.constant 0 : i32
      %c0_i32_185 = arith.constant 0 : i32
      %c0_i32_186 = arith.constant 0 : i32
      %c0_i32_187 = arith.constant 0 : i32
      %215 = tpu.memref_slice %arg2[%arg0, %c0_i32_186, %c0_i32_187] : memref<2x378x128xf32, #tpu.memory_space<any>> -> memref<1x378x128xf32, #tpu.memory_space<any>>
      %216 = tpu.memref_squeeze %215 : memref<1x378x128xf32, #tpu.memory_space<any>> -> memref<378x128xf32, #tpu.memory_space<any>>
      %c0_i32_188 = arith.constant 0 : i32
      %c0_i32_189 = arith.constant 0 : i32
      %217 = tpu.memref_slice %arg12[%c0_i32_184, %c0_i32_188, %c0_i32_189] : memref<2x378x128xf32, #tpu.memory_space<vmem>> -> memref<1x378x128xf32, #tpu.memory_space<vmem>>
      %218 = tpu.memref_squeeze %217 : memref<1x378x128xf32, #tpu.memory_space<vmem>> -> memref<378x128xf32, #tpu.memory_space<vmem>>
      %219 = tpu.memref_slice %arg14[%c0_i32_185] : memref<2x!tpu.dma_semaphore, #tpu.memory_space<semaphore_mem>> -> memref<1x!tpu.dma_semaphore, #tpu.memory_space<semaphore_mem>>
      %220 = tpu.memref_squeeze %219 : memref<1x!tpu.dma_semaphore, #tpu.memory_space<semaphore_mem>> -> memref<!tpu.dma_semaphore, #tpu.memory_space<semaphore_mem>>
      tpu.enqueue_dma source(%216 : memref<378x128xf32, #tpu.memory_space<any>>) target(%218 : memref<378x128xf32, #tpu.memory_space<vmem>>) target_semaphore(%220 : memref<!tpu.dma_semaphore, #tpu.memory_space<semaphore_mem>>)
    } else {
    }
    %c1_i32_6 = arith.constant 1 : i32
    %14 = arith.addi %arg1, %c1_i32_6 : i32
    %c1_i32_7 = arith.constant 1 : i32
    %15 = arith.cmpi slt, %14, %c1_i32_7 : i32
    %16 = arith.extui %15 : i1 to i32
    %c0_i32_8 = arith.constant 0 : i32
    %17 = arith.cmpi ne, %16, %c0_i32_8 : i32
    scf.if %17 {
      %c1_i32_184 = arith.constant 1 : i32
      %215 = arith.addi %arg1, %c1_i32_184 : i32
      %c16_i32_185 = arith.constant 16 : i32
      %216 = arith.muli %215, %c16_i32_185 : i32
      %c18_i32_186 = arith.constant 18 : i32
      %217 = arith.muli %216, %c18_i32_186 : i32
      %c0_i32_187 = arith.constant 0 : i32
      %218 = tpu.memref_slice %arg2[%arg0, %217, %c0_i32_187] : memref<2x378x128xf32, #tpu.memory_space<any>> -> memref<1x378x128xf32, #tpu.memory_space<any>>
      %219 = tpu.memref_squeeze %218 : memref<1x378x128xf32, #tpu.memory_space<any>> -> memref<378x128xf32, #tpu.memory_space<any>>
      %c0_i32_188 = arith.constant 0 : i32
      %c0_i32_189 = arith.constant 0 : i32
      %220 = tpu.memref_slice %arg12[%10, %c0_i32_188, %c0_i32_189] : memref<2x378x128xf32, #tpu.memory_space<vmem>> -> memref<1x378x128xf32, #tpu.memory_space<vmem>>
      %221 = tpu.memref_squeeze %220 : memref<1x378x128xf32, #tpu.memory_space<vmem>> -> memref<378x128xf32, #tpu.memory_space<vmem>>
      %222 = tpu.memref_slice %arg14[%10] : memref<2x!tpu.dma_semaphore, #tpu.memory_space<semaphore_mem>> -> memref<1x!tpu.dma_semaphore, #tpu.memory_space<semaphore_mem>>
      %223 = tpu.memref_squeeze %222 : memref<1x!tpu.dma_semaphore, #tpu.memory_space<semaphore_mem>> -> memref<!tpu.dma_semaphore, #tpu.memory_space<semaphore_mem>>
      tpu.enqueue_dma source(%219 : memref<378x128xf32, #tpu.memory_space<any>>) target(%221 : memref<378x128xf32, #tpu.memory_space<vmem>>) target_semaphore(%223 : memref<!tpu.dma_semaphore, #tpu.memory_space<semaphore_mem>>)
    } else {
    }
    %c16_i32 = arith.constant 16 : i32
    %18 = arith.muli %arg1, %c16_i32 : i32
    %c18_i32 = arith.constant 18 : i32
    %19 = arith.muli %18, %c18_i32 : i32
    %c0_i32_9 = arith.constant 0 : i32
    %20 = tpu.memref_slice %arg2[%arg0, %19, %c0_i32_9] : memref<2x378x128xf32, #tpu.memory_space<any>> -> memref<1x378x128xf32, #tpu.memory_space<any>>
    %21 = tpu.memref_squeeze %20 : memref<1x378x128xf32, #tpu.memory_space<any>> -> memref<378x128xf32, #tpu.memory_space<any>>
    %c0_i32_10 = arith.constant 0 : i32
    %c0_i32_11 = arith.constant 0 : i32
    %22 = tpu.memref_slice %arg12[%9, %c0_i32_10, %c0_i32_11] : memref<2x378x128xf32, #tpu.memory_space<vmem>> -> memref<1x378x128xf32, #tpu.memory_space<vmem>>
    %23 = tpu.memref_squeeze %22 : memref<1x378x128xf32, #tpu.memory_space<vmem>> -> memref<378x128xf32, #tpu.memory_space<vmem>>
    %24 = tpu.memref_slice %arg14[%9] : memref<2x!tpu.dma_semaphore, #tpu.memory_space<semaphore_mem>> -> memref<1x!tpu.dma_semaphore, #tpu.memory_space<semaphore_mem>>
    %25 = tpu.memref_squeeze %24 : memref<1x!tpu.dma_semaphore, #tpu.memory_space<semaphore_mem>> -> memref<!tpu.dma_semaphore, #tpu.memory_space<semaphore_mem>>
    tpu.wait_dma2 semaphore(%25 : memref<!tpu.dma_semaphore, #tpu.memory_space<semaphore_mem>>) src(%21 : memref<378x128xf32, #tpu.memory_space<any>>) dst(%23 : memref<378x128xf32, #tpu.memory_space<vmem>>)
    %cst = arith.constant 0.000000e+00 : f32
    %26 = vector.broadcast %cst : f32 to vector<324x128xf32>
    %c0_i32_12 = arith.constant 0 : i32
    %c0_i32_13 = arith.constant 0 : i32
    %27 = tpu.memref_slice %arg12[%9, %c0_i32_12, %c0_i32_13] : memref<2x378x128xf32, #tpu.memory_space<vmem>> -> memref<1x378x128xf32, #tpu.memory_space<vmem>>
    %28 = tpu.memref_squeeze %27 : memref<1x378x128xf32, #tpu.memory_space<vmem>> -> memref<378x128xf32, #tpu.memory_space<vmem>>
    %c0 = arith.constant 0 : index
    %c0_14 = arith.constant 0 : index
    %29 = vector.load %28[%c0, %c0_14] : memref<378x128xf32, #tpu.memory_space<vmem>>, vector<324x128xf32>
    %30 = arith.truncf %29 : vector<324x128xf32> to vector<324x128xbf16>
    %c0_15 = arith.constant 0 : index
    %c0_16 = arith.constant 0 : index
    %c0_17 = arith.constant 0 : index
    %c0_18 = arith.constant 0 : index
    %31 = vector.load %arg3[%c0_15, %c0_16, %c0_17, %c0_18] : memref<3x3x128x128xbf16, #tpu.memory_space<vmem>>, vector<1x1x128x128xbf16>
    %32 = vector.shape_cast %31 : vector<1x1x128x128xbf16> to vector<128x128xbf16>
    %cst_19 = arith.constant dense<0.000000e+00> : vector<324x128xf32>
    %33 = tpu.matmul %30, %32, %cst_19 {dimension_numbers = #tpu.dot_dimension_numbers<[1], [0], [0], [1], [0, 0, 1, 1], [], []>} : vector<324x128xbf16>, vector<128x128xbf16>, vector<324x128xf32> -> vector<324x128xf32>
    %34 = arith.addf %26, %33 : vector<324x128xf32>
    %c0_i32_20 = arith.constant 0 : i32
    %c0_i32_21 = arith.constant 0 : i32
    %35 = tpu.memref_slice %arg12[%9, %c0_i32_20, %c0_i32_21] : memref<2x378x128xf32, #tpu.memory_space<vmem>> -> memref<1x378x128xf32, #tpu.memory_space<vmem>>
    %36 = tpu.memref_squeeze %35 : memref<1x378x128xf32, #tpu.memory_space<vmem>> -> memref<378x128xf32, #tpu.memory_space<vmem>>
    %c1 = arith.constant 1 : index
    %c0_22 = arith.constant 0 : index
    %37 = vector.load %36[%c1, %c0_22] : memref<378x128xf32, #tpu.memory_space<vmem>>, vector<324x128xf32>
    %38 = arith.truncf %37 : vector<324x128xf32> to vector<324x128xbf16>
    %c0_23 = arith.constant 0 : index
    %c1_24 = arith.constant 1 : index
    %c0_25 = arith.constant 0 : index
    %c0_26 = arith.constant 0 : index
    %39 = vector.load %arg3[%c0_23, %c1_24, %c0_25, %c0_26] : memref<3x3x128x128xbf16, #tpu.memory_space<vmem>>, vector<1x1x128x128xbf16>
    %40 = vector.shape_cast %39 : vector<1x1x128x128xbf16> to vector<128x128xbf16>
    %cst_27 = arith.constant dense<0.000000e+00> : vector<324x128xf32>
    %41 = tpu.matmul %38, %40, %cst_27 {dimension_numbers = #tpu.dot_dimension_numbers<[1], [0], [0], [1], [0, 0, 1, 1], [], []>} : vector<324x128xbf16>, vector<128x128xbf16>, vector<324x128xf32> -> vector<324x128xf32>
    %42 = arith.addf %34, %41 : vector<324x128xf32>
    %c0_i32_28 = arith.constant 0 : i32
    %c0_i32_29 = arith.constant 0 : i32
    %43 = tpu.memref_slice %arg12[%9, %c0_i32_28, %c0_i32_29] : memref<2x378x128xf32, #tpu.memory_space<vmem>> -> memref<1x378x128xf32, #tpu.memory_space<vmem>>
    %44 = tpu.memref_squeeze %43 : memref<1x378x128xf32, #tpu.memory_space<vmem>> -> memref<378x128xf32, #tpu.memory_space<vmem>>
    %c2 = arith.constant 2 : index
    %c0_30 = arith.constant 0 : index
    %45 = vector.load %44[%c2, %c0_30] : memref<378x128xf32, #tpu.memory_space<vmem>>, vector<324x128xf32>
    %46 = arith.truncf %45 : vector<324x128xf32> to vector<324x128xbf16>
    %c0_31 = arith.constant 0 : index
    %c2_32 = arith.constant 2 : index
    %c0_33 = arith.constant 0 : index
    %c0_34 = arith.constant 0 : index
    %47 = vector.load %arg3[%c0_31, %c2_32, %c0_33, %c0_34] : memref<3x3x128x128xbf16, #tpu.memory_space<vmem>>, vector<1x1x128x128xbf16>
    %48 = vector.shape_cast %47 : vector<1x1x128x128xbf16> to vector<128x128xbf16>
    %cst_35 = arith.constant dense<0.000000e+00> : vector<324x128xf32>
    %49 = tpu.matmul %46, %48, %cst_35 {dimension_numbers = #tpu.dot_dimension_numbers<[1], [0], [0], [1], [0, 0, 1, 1], [], []>} : vector<324x128xbf16>, vector<128x128xbf16>, vector<324x128xf32> -> vector<324x128xf32>
    %50 = arith.addf %42, %49 : vector<324x128xf32>
    %c0_i32_36 = arith.constant 0 : i32
    %c0_i32_37 = arith.constant 0 : i32
    %51 = tpu.memref_slice %arg12[%9, %c0_i32_36, %c0_i32_37] : memref<2x378x128xf32, #tpu.memory_space<vmem>> -> memref<1x378x128xf32, #tpu.memory_space<vmem>>
    %52 = tpu.memref_squeeze %51 : memref<1x378x128xf32, #tpu.memory_space<vmem>> -> memref<378x128xf32, #tpu.memory_space<vmem>>
    %c18 = arith.constant 18 : index
    %c0_38 = arith.constant 0 : index
    %53 = vector.load %52[%c18, %c0_38] : memref<378x128xf32, #tpu.memory_space<vmem>>, vector<324x128xf32>
    %54 = arith.truncf %53 : vector<324x128xf32> to vector<324x128xbf16>
    %c1_39 = arith.constant 1 : index
    %c0_40 = arith.constant 0 : index
    %c0_41 = arith.constant 0 : index
    %c0_42 = arith.constant 0 : index
    %55 = vector.load %arg3[%c1_39, %c0_40, %c0_41, %c0_42] : memref<3x3x128x128xbf16, #tpu.memory_space<vmem>>, vector<1x1x128x128xbf16>
    %56 = vector.shape_cast %55 : vector<1x1x128x128xbf16> to vector<128x128xbf16>
    %cst_43 = arith.constant dense<0.000000e+00> : vector<324x128xf32>
    %57 = tpu.matmul %54, %56, %cst_43 {dimension_numbers = #tpu.dot_dimension_numbers<[1], [0], [0], [1], [0, 0, 1, 1], [], []>} : vector<324x128xbf16>, vector<128x128xbf16>, vector<324x128xf32> -> vector<324x128xf32>
    %58 = arith.addf %50, %57 : vector<324x128xf32>
    %c0_i32_44 = arith.constant 0 : i32
    %c0_i32_45 = arith.constant 0 : i32
    %59 = tpu.memref_slice %arg12[%9, %c0_i32_44, %c0_i32_45] : memref<2x378x128xf32, #tpu.memory_space<vmem>> -> memref<1x378x128xf32, #tpu.memory_space<vmem>>
    %60 = tpu.memref_squeeze %59 : memref<1x378x128xf32, #tpu.memory_space<vmem>> -> memref<378x128xf32, #tpu.memory_space<vmem>>
    %c19 = arith.constant 19 : index
    %c0_46 = arith.constant 0 : index
    %61 = vector.load %60[%c19, %c0_46] : memref<378x128xf32, #tpu.memory_space<vmem>>, vector<324x128xf32>
    %62 = arith.truncf %61 : vector<324x128xf32> to vector<324x128xbf16>
    %c1_47 = arith.constant 1 : index
    %c1_48 = arith.constant 1 : index
    %c0_49 = arith.constant 0 : index
    %c0_50 = arith.constant 0 : index
    %63 = vector.load %arg3[%c1_47, %c1_48, %c0_49, %c0_50] : memref<3x3x128x128xbf16, #tpu.memory_space<vmem>>, vector<1x1x128x128xbf16>
    %64 = vector.shape_cast %63 : vector<1x1x128x128xbf16> to vector<128x128xbf16>
    %cst_51 = arith.constant dense<0.000000e+00> : vector<324x128xf32>
    %65 = tpu.matmul %62, %64, %cst_51 {dimension_numbers = #tpu.dot_dimension_numbers<[1], [0], [0], [1], [0, 0, 1, 1], [], []>} : vector<324x128xbf16>, vector<128x128xbf16>, vector<324x128xf32> -> vector<324x128xf32>
    %66 = arith.addf %58, %65 : vector<324x128xf32>
    %c0_i32_52 = arith.constant 0 : i32
    %c0_i32_53 = arith.constant 0 : i32
    %67 = tpu.memref_slice %arg12[%9, %c0_i32_52, %c0_i32_53] : memref<2x378x128xf32, #tpu.memory_space<vmem>> -> memref<1x378x128xf32, #tpu.memory_space<vmem>>
    %68 = tpu.memref_squeeze %67 : memref<1x378x128xf32, #tpu.memory_space<vmem>> -> memref<378x128xf32, #tpu.memory_space<vmem>>
    %c20 = arith.constant 20 : index
    %c0_54 = arith.constant 0 : index
    %69 = vector.load %68[%c20, %c0_54] : memref<378x128xf32, #tpu.memory_space<vmem>>, vector<324x128xf32>
    %70 = arith.truncf %69 : vector<324x128xf32> to vector<324x128xbf16>
    %c1_55 = arith.constant 1 : index
    %c2_56 = arith.constant 2 : index
    %c0_57 = arith.constant 0 : index
    %c0_58 = arith.constant 0 : index
    %71 = vector.load %arg3[%c1_55, %c2_56, %c0_57, %c0_58] : memref<3x3x128x128xbf16, #tpu.memory_space<vmem>>, vector<1x1x128x128xbf16>
    %72 = vector.shape_cast %71 : vector<1x1x128x128xbf16> to vector<128x128xbf16>
    %cst_59 = arith.constant dense<0.000000e+00> : vector<324x128xf32>
    %73 = tpu.matmul %70, %72, %cst_59 {dimension_numbers = #tpu.dot_dimension_numbers<[1], [0], [0], [1], [0, 0, 1, 1], [], []>} : vector<324x128xbf16>, vector<128x128xbf16>, vector<324x128xf32> -> vector<324x128xf32>
    %74 = arith.addf %66, %73 : vector<324x128xf32>
    %c0_i32_60 = arith.constant 0 : i32
    %c0_i32_61 = arith.constant 0 : i32
    %75 = tpu.memref_slice %arg12[%9, %c0_i32_60, %c0_i32_61] : memref<2x378x128xf32, #tpu.memory_space<vmem>> -> memref<1x378x128xf32, #tpu.memory_space<vmem>>
    %76 = tpu.memref_squeeze %75 : memref<1x378x128xf32, #tpu.memory_space<vmem>> -> memref<378x128xf32, #tpu.memory_space<vmem>>
    %c36 = arith.constant 36 : index
    %c0_62 = arith.constant 0 : index
    %77 = vector.load %76[%c36, %c0_62] : memref<378x128xf32, #tpu.memory_space<vmem>>, vector<324x128xf32>
    %78 = arith.truncf %77 : vector<324x128xf32> to vector<324x128xbf16>
    %c2_63 = arith.constant 2 : index
    %c0_64 = arith.constant 0 : index
    %c0_65 = arith.constant 0 : index
    %c0_66 = arith.constant 0 : index
    %79 = vector.load %arg3[%c2_63, %c0_64, %c0_65, %c0_66] : memref<3x3x128x128xbf16, #tpu.memory_space<vmem>>, vector<1x1x128x128xbf16>
    %80 = vector.shape_cast %79 : vector<1x1x128x128xbf16> to vector<128x128xbf16>
    %cst_67 = arith.constant dense<0.000000e+00> : vector<324x128xf32>
    %81 = tpu.matmul %78, %80, %cst_67 {dimension_numbers = #tpu.dot_dimension_numbers<[1], [0], [0], [1], [0, 0, 1, 1], [], []>} : vector<324x128xbf16>, vector<128x128xbf16>, vector<324x128xf32> -> vector<324x128xf32>
    %82 = arith.addf %74, %81 : vector<324x128xf32>
    %c0_i32_68 = arith.constant 0 : i32
    %c0_i32_69 = arith.constant 0 : i32
    %83 = tpu.memref_slice %arg12[%9, %c0_i32_68, %c0_i32_69] : memref<2x378x128xf32, #tpu.memory_space<vmem>> -> memref<1x378x128xf32, #tpu.memory_space<vmem>>
    %84 = tpu.memref_squeeze %83 : memref<1x378x128xf32, #tpu.memory_space<vmem>> -> memref<378x128xf32, #tpu.memory_space<vmem>>
    %c37 = arith.constant 37 : index
    %c0_70 = arith.constant 0 : index
    %85 = vector.load %84[%c37, %c0_70] : memref<378x128xf32, #tpu.memory_space<vmem>>, vector<324x128xf32>
    %86 = arith.truncf %85 : vector<324x128xf32> to vector<324x128xbf16>
    %c2_71 = arith.constant 2 : index
    %c1_72 = arith.constant 1 : index
    %c0_73 = arith.constant 0 : index
    %c0_74 = arith.constant 0 : index
    %87 = vector.load %arg3[%c2_71, %c1_72, %c0_73, %c0_74] : memref<3x3x128x128xbf16, #tpu.memory_space<vmem>>, vector<1x1x128x128xbf16>
    %88 = vector.shape_cast %87 : vector<1x1x128x128xbf16> to vector<128x128xbf16>
    %cst_75 = arith.constant dense<0.000000e+00> : vector<324x128xf32>
    %89 = tpu.matmul %86, %88, %cst_75 {dimension_numbers = #tpu.dot_dimension_numbers<[1], [0], [0], [1], [0, 0, 1, 1], [], []>} : vector<324x128xbf16>, vector<128x128xbf16>, vector<324x128xf32> -> vector<324x128xf32>
    %90 = arith.addf %82, %89 : vector<324x128xf32>
    %c0_i32_76 = arith.constant 0 : i32
    %c0_i32_77 = arith.constant 0 : i32
    %91 = tpu.memref_slice %arg12[%9, %c0_i32_76, %c0_i32_77] : memref<2x378x128xf32, #tpu.memory_space<vmem>> -> memref<1x378x128xf32, #tpu.memory_space<vmem>>
    %92 = tpu.memref_squeeze %91 : memref<1x378x128xf32, #tpu.memory_space<vmem>> -> memref<378x128xf32, #tpu.memory_space<vmem>>
    %c38 = arith.constant 38 : index
    %c0_78 = arith.constant 0 : index
    %93 = vector.load %92[%c38, %c0_78] : memref<378x128xf32, #tpu.memory_space<vmem>>, vector<324x128xf32>
    %94 = arith.truncf %93 : vector<324x128xf32> to vector<324x128xbf16>
    %c2_79 = arith.constant 2 : index
    %c2_80 = arith.constant 2 : index
    %c0_81 = arith.constant 0 : index
    %c0_82 = arith.constant 0 : index
    %95 = vector.load %arg3[%c2_79, %c2_80, %c0_81, %c0_82] : memref<3x3x128x128xbf16, #tpu.memory_space<vmem>>, vector<1x1x128x128xbf16>
    %96 = vector.shape_cast %95 : vector<1x1x128x128xbf16> to vector<128x128xbf16>
    %cst_83 = arith.constant dense<0.000000e+00> : vector<324x128xf32>
    %97 = tpu.matmul %94, %96, %cst_83 {dimension_numbers = #tpu.dot_dimension_numbers<[1], [0], [0], [1], [0, 0, 1, 1], [], []>} : vector<324x128xbf16>, vector<128x128xbf16>, vector<324x128xf32> -> vector<324x128xf32>
    %98 = arith.addf %90, %97 : vector<324x128xf32>
    %c0_84 = arith.constant 0 : index
    %c0_85 = arith.constant 0 : index
    %99 = vector.load %arg4[%c0_84, %c0_85] : memref<1x128xf32, #tpu.memory_space<vmem>>, vector<1x128xf32>
    %100 = vector.broadcast %99 : vector<1x128xf32> to vector<324x128xf32>
    %101 = arith.mulf %98, %100 : vector<324x128xf32>
    %c0_86 = arith.constant 0 : index
    %c0_87 = arith.constant 0 : index
    %102 = vector.load %arg5[%c0_86, %c0_87] : memref<1x128xf32, #tpu.memory_space<vmem>>, vector<1x128xf32>
    %103 = vector.broadcast %102 : vector<1x128xf32> to vector<324x128xf32>
    %104 = arith.addf %101, %103 : vector<324x128xf32>
    %cst_88 = arith.constant 0.000000e+00 : f32
    %105 = vector.broadcast %cst_88 : f32 to vector<324x128xf32>
    %106 = arith.cmpf ogt, %104, %105 : vector<324x128xf32>
    %c0_89 = arith.constant 0 : index
    %c0_90 = arith.constant 0 : index
    %107 = vector.load %arg6[%c0_89, %c0_90] : memref<1x128xf32, #tpu.memory_space<vmem>>, vector<1x128xf32>
    %108 = vector.broadcast %107 : vector<1x128xf32> to vector<324x128xf32>
    %109 = arith.mulf %108, %104 : vector<324x128xf32>
    %110 = arith.select %106, %104, %109 : vector<324x128xi1>, vector<324x128xf32>
    %111 = tpu.iota {dimensions = array<i32: 0>} : vector<324x1xi32>
    %c18_i32_91 = arith.constant 18 : i32
    %c0_i32_92 = arith.constant 0 : i32
    %112 = arith.cmpi eq, %c18_i32_91, %c0_i32_92 : i32
    %c1_i32_93 = arith.constant 1 : i32
    %113 = arith.select %112, %c1_i32_93, %c18_i32_91 : i32
    %114 = vector.broadcast %113 : i32 to vector<324x1xi32>
    %115 = arith.remsi %111, %114 : vector<324x1xi32>
    %c0_i32_94 = arith.constant 0 : i32
    %116 = vector.broadcast %c0_i32_94 : i32 to vector<324x1xi32>
    %117 = arith.cmpi ne, %115, %116 : vector<324x1xi32>
    %c0_i32_95 = arith.constant 0 : i32
    %118 = vector.broadcast %c0_i32_95 : i32 to vector<324x1xi32>
    %119 = arith.cmpi slt, %115, %118 : vector<324x1xi32>
    %c0_i32_96 = arith.constant 0 : i32
    %120 = arith.cmpi slt, %113, %c0_i32_96 : i32
    %121 = vector.broadcast %120 : i1 to vector<324x1xi1>
    %122 = vector.broadcast %121 : vector<324x1xi1> to vector<324x1xi1>
    %123 = arith.xori %119, %122 : vector<324x1xi1>
    %124 = arith.andi %123, %117 : vector<324x1xi1>
    %125 = vector.broadcast %113 : i32 to vector<324x1xi32>
    %126 = arith.addi %115, %125 : vector<324x1xi32>
    %127 = arith.select %124, %126, %115 : vector<324x1xi1>, vector<324x1xi32>
    %c16_i32_97 = arith.constant 16 : i32
    %128 = vector.broadcast %c16_i32_97 : i32 to vector<324x1xi32>
    %129 = arith.cmpi slt, %127, %128 : vector<324x1xi32>
    %cst_98 = arith.constant 0.000000e+00 : f32
    %130 = vector.shape_cast %129 : vector<324x1xi1> to vector<324x1xi1>
    %131 = vector.broadcast %130 : vector<324x1xi1> to vector<324x128xi1>
    %132 = vector.broadcast %cst_98 : f32 to vector<324x128xf32>
    %133 = arith.select %131, %110, %132 : vector<324x128xi1>, vector<324x128xf32>
    %c1_99 = arith.constant 1 : index
    %c0_100 = arith.constant 0 : index
    %134 = vector.load %arg13[%c1_99, %c0_100] : memref<342x128xf32, #tpu.memory_space<vmem>>, vector<324x128xf32>
    tpu.vector_store %arg13[%c1_99, %c0_100], %133 {strides = array<i32>} : memref<342x128xf32, #tpu.memory_space<vmem>>, vector<324x128xf32>,
    %cst_101 = arith.constant 0.000000e+00 : f32
    %135 = vector.broadcast %cst_101 : f32 to vector<1x128xf32>
    %c0_102 = arith.constant 0 : index
    %c0_103 = arith.constant 0 : index
    %136 = vector.load %arg13[%c0_102, %c0_103] : memref<342x128xf32, #tpu.memory_space<vmem>>, vector<1x128xf32>
    tpu.vector_store %arg13[%c0_102, %c0_103], %135 {strides = array<i32>} : memref<342x128xf32, #tpu.memory_space<vmem>>, vector<1x128xf32>,
    %cst_104 = arith.constant 0.000000e+00 : f32
    %137 = vector.broadcast %cst_104 : f32 to vector<18x128xf32>
    %c324 = arith.constant 324 : index
    %c0_105 = arith.constant 0 : index
    %138 = vector.load %arg13[%c324, %c0_105] : memref<342x128xf32, #tpu.memory_space<vmem>>, vector<18x128xf32>
    tpu.vector_store %arg13[%c324, %c0_105], %137 {strides = array<i32>} : memref<342x128xf32, #tpu.memory_space<vmem>>, vector<18x128xf32>,
    %c0_i32_106 = arith.constant 0 : i32
    %139 = arith.cmpi eq, %arg1, %c0_i32_106 : i32
    %140 = arith.extui %139 : i1 to i32
    %c0_i32_107 = arith.constant 0 : i32
    %141 = arith.cmpi ne, %140, %c0_i32_107 : i32
    scf.if %141 {
      %cst_184 = arith.constant 0.000000e+00 : f32
      %215 = vector.broadcast %cst_184 : f32 to vector<18x128xf32>
      %c0_185 = arith.constant 0 : index
      %c0_186 = arith.constant 0 : index
      %216 = vector.load %arg13[%c0_185, %c0_186] : memref<342x128xf32, #tpu.memory_space<vmem>>, vector<18x128xf32>
      tpu.vector_store %arg13[%c0_185, %c0_186], %215 {strides = array<i32>} : memref<342x128xf32, #tpu.memory_space<vmem>>, vector<18x128xf32>,
    } else {
    }
    %c0_i32_108 = arith.constant 0 : i32
    %142 = arith.cmpi eq, %arg1, %c0_i32_108 : i32
    %143 = arith.extui %142 : i1 to i32
    %c0_i32_109 = arith.constant 0 : i32
    %144 = arith.cmpi ne, %143, %c0_i32_109 : i32
    scf.if %144 {
      %cst_184 = arith.constant 0.000000e+00 : f32
      %215 = vector.broadcast %cst_184 : f32 to vector<18x128xf32>
      %c306 = arith.constant 306 : index
      %c0_185 = arith.constant 0 : index
      %216 = vector.load %arg13[%c306, %c0_185] : memref<342x128xf32, #tpu.memory_space<vmem>>, vector<18x128xf32>
      tpu.vector_store %arg13[%c306, %c0_185], %215 {strides = array<i32>} : memref<342x128xf32, #tpu.memory_space<vmem>>, vector<18x128xf32>,
    } else {
    }
    %cst_110 = arith.constant 0.000000e+00 : f32
    %145 = vector.broadcast %cst_110 : f32 to vector<288x128xf32>
    %c0_111 = arith.constant 0 : index
    %c0_112 = arith.constant 0 : index
    %146 = vector.load %arg13[%c0_111, %c0_112] : memref<342x128xf32, #tpu.memory_space<vmem>>, vector<288x128xf32>
    %147 = arith.truncf %146 : vector<288x128xf32> to vector<288x128xbf16>
    %c0_113 = arith.constant 0 : index
    %c0_114 = arith.constant 0 : index
    %c0_115 = arith.constant 0 : index
    %c0_116 = arith.constant 0 : index
    %148 = vector.load %arg7[%c0_113, %c0_114, %c0_115, %c0_116] : memref<3x3x128x128xbf16, #tpu.memory_space<vmem>>, vector<1x1x128x128xbf16>
    %149 = vector.shape_cast %148 : vector<1x1x128x128xbf16> to vector<128x128xbf16>
    %cst_117 = arith.constant dense<0.000000e+00> : vector<288x128xf32>
    %150 = tpu.matmul %147, %149, %cst_117 {dimension_numbers = #tpu.dot_dimension_numbers<[1], [0], [0], [1], [0, 0, 1, 1], [], []>} : vector<288x128xbf16>, vector<128x128xbf16>, vector<288x128xf32> -> vector<288x128xf32>
    %151 = arith.addf %145, %150 : vector<288x128xf32>
    %c1_118 = arith.constant 1 : index
    %c0_119 = arith.constant 0 : index
    %152 = vector.load %arg13[%c1_118, %c0_119] : memref<342x128xf32, #tpu.memory_space<vmem>>, vector<288x128xf32>
    %153 = arith.truncf %152 : vector<288x128xf32> to vector<288x128xbf16>
    %c0_120 = arith.constant 0 : index
    %c1_121 = arith.constant 1 : index
    %c0_122 = arith.constant 0 : index
    %c0_123 = arith.constant 0 : index
    %154 = vector.load %arg7[%c0_120, %c1_121, %c0_122, %c0_123] : memref<3x3x128x128xbf16, #tpu.memory_space<vmem>>, vector<1x1x128x128xbf16>
    %155 = vector.shape_cast %154 : vector<1x1x128x128xbf16> to vector<128x128xbf16>
    %cst_124 = arith.constant dense<0.000000e+00> : vector<288x128xf32>
    %156 = tpu.matmul %153, %155, %cst_124 {dimension_numbers = #tpu.dot_dimension_numbers<[1], [0], [0], [1], [0, 0, 1, 1], [], []>} : vector<288x128xbf16>, vector<128x128xbf16>, vector<288x128xf32> -> vector<288x128xf32>
    %157 = arith.addf %151, %156 : vector<288x128xf32>
    %c2_125 = arith.constant 2 : index
    %c0_126 = arith.constant 0 : index
    %158 = vector.load %arg13[%c2_125, %c0_126] : memref<342x128xf32, #tpu.memory_space<vmem>>, vector<288x128xf32>
    %159 = arith.truncf %158 : vector<288x128xf32> to vector<288x128xbf16>
    %c0_127 = arith.constant 0 : index
    %c2_128 = arith.constant 2 : index
    %c0_129 = arith.constant 0 : index
    %c0_130 = arith.constant 0 : index
    %160 = vector.load %arg7[%c0_127, %c2_128, %c0_129, %c0_130] : memref<3x3x128x128xbf16, #tpu.memory_space<vmem>>, vector<1x1x128x128xbf16>
    %161 = vector.shape_cast %160 : vector<1x1x128x128xbf16> to vector<128x128xbf16>
    %cst_131 = arith.constant dense<0.000000e+00> : vector<288x128xf32>
    %162 = tpu.matmul %159, %161, %cst_131 {dimension_numbers = #tpu.dot_dimension_numbers<[1], [0], [0], [1], [0, 0, 1, 1], [], []>} : vector<288x128xbf16>, vector<128x128xbf16>, vector<288x128xf32> -> vector<288x128xf32>
    %163 = arith.addf %157, %162 : vector<288x128xf32>
    %c18_132 = arith.constant 18 : index
    %c0_133 = arith.constant 0 : index
    %164 = vector.load %arg13[%c18_132, %c0_133] : memref<342x128xf32, #tpu.memory_space<vmem>>, vector<288x128xf32>
    %165 = arith.truncf %164 : vector<288x128xf32> to vector<288x128xbf16>
    %c1_134 = arith.constant 1 : index
    %c0_135 = arith.constant 0 : index
    %c0_136 = arith.constant 0 : index
    %c0_137 = arith.constant 0 : index
    %166 = vector.load %arg7[%c1_134, %c0_135, %c0_136, %c0_137] : memref<3x3x128x128xbf16, #tpu.memory_space<vmem>>, vector<1x1x128x128xbf16>
    %167 = vector.shape_cast %166 : vector<1x1x128x128xbf16> to vector<128x128xbf16>
    %cst_138 = arith.constant dense<0.000000e+00> : vector<288x128xf32>
    %168 = tpu.matmul %165, %167, %cst_138 {dimension_numbers = #tpu.dot_dimension_numbers<[1], [0], [0], [1], [0, 0, 1, 1], [], []>} : vector<288x128xbf16>, vector<128x128xbf16>, vector<288x128xf32> -> vector<288x128xf32>
    %169 = arith.addf %163, %168 : vector<288x128xf32>
    %c19_139 = arith.constant 19 : index
    %c0_140 = arith.constant 0 : index
    %170 = vector.load %arg13[%c19_139, %c0_140] : memref<342x128xf32, #tpu.memory_space<vmem>>, vector<288x128xf32>
    %171 = arith.truncf %170 : vector<288x128xf32> to vector<288x128xbf16>
    %c1_141 = arith.constant 1 : index
    %c1_142 = arith.constant 1 : index
    %c0_143 = arith.constant 0 : index
    %c0_144 = arith.constant 0 : index
    %172 = vector.load %arg7[%c1_141, %c1_142, %c0_143, %c0_144] : memref<3x3x128x128xbf16, #tpu.memory_space<vmem>>, vector<1x1x128x128xbf16>
    %173 = vector.shape_cast %172 : vector<1x1x128x128xbf16> to vector<128x128xbf16>
    %cst_145 = arith.constant dense<0.000000e+00> : vector<288x128xf32>
    %174 = tpu.matmul %171, %173, %cst_145 {dimension_numbers = #tpu.dot_dimension_numbers<[1], [0], [0], [1], [0, 0, 1, 1], [], []>} : vector<288x128xbf16>, vector<128x128xbf16>, vector<288x128xf32> -> vector<288x128xf32>
    %175 = arith.addf %169, %174 : vector<288x128xf32>
    %c20_146 = arith.constant 20 : index
    %c0_147 = arith.constant 0 : index
    %176 = vector.load %arg13[%c20_146, %c0_147] : memref<342x128xf32, #tpu.memory_space<vmem>>, vector<288x128xf32>
    %177 = arith.truncf %176 : vector<288x128xf32> to vector<288x128xbf16>
    %c1_148 = arith.constant 1 : index
    %c2_149 = arith.constant 2 : index
    %c0_150 = arith.constant 0 : index
    %c0_151 = arith.constant 0 : index
    %178 = vector.load %arg7[%c1_148, %c2_149, %c0_150, %c0_151] : memref<3x3x128x128xbf16, #tpu.memory_space<vmem>>, vector<1x1x128x128xbf16>
    %179 = vector.shape_cast %178 : vector<1x1x128x128xbf16> to vector<128x128xbf16>
    %cst_152 = arith.constant dense<0.000000e+00> : vector<288x128xf32>
    %180 = tpu.matmul %177, %179, %cst_152 {dimension_numbers = #tpu.dot_dimension_numbers<[1], [0], [0], [1], [0, 0, 1, 1], [], []>} : vector<288x128xbf16>, vector<128x128xbf16>, vector<288x128xf32> -> vector<288x128xf32>
    %181 = arith.addf %175, %180 : vector<288x128xf32>
    %c36_153 = arith.constant 36 : index
    %c0_154 = arith.constant 0 : index
    %182 = vector.load %arg13[%c36_153, %c0_154] : memref<342x128xf32, #tpu.memory_space<vmem>>, vector<288x128xf32>
    %183 = arith.truncf %182 : vector<288x128xf32> to vector<288x128xbf16>
    %c2_155 = arith.constant 2 : index
    %c0_156 = arith.constant 0 : index
    %c0_157 = arith.constant 0 : index
    %c0_158 = arith.constant 0 : index
    %184 = vector.load %arg7[%c2_155, %c0_156, %c0_157, %c0_158] : memref<3x3x128x128xbf16, #tpu.memory_space<vmem>>, vector<1x1x128x128xbf16>
    %185 = vector.shape_cast %184 : vector<1x1x128x128xbf16> to vector<128x128xbf16>
    %cst_159 = arith.constant dense<0.000000e+00> : vector<288x128xf32>
    %186 = tpu.matmul %183, %185, %cst_159 {dimension_numbers = #tpu.dot_dimension_numbers<[1], [0], [0], [1], [0, 0, 1, 1], [], []>} : vector<288x128xbf16>, vector<128x128xbf16>, vector<288x128xf32> -> vector<288x128xf32>
    %187 = arith.addf %181, %186 : vector<288x128xf32>
    %c37_160 = arith.constant 37 : index
    %c0_161 = arith.constant 0 : index
    %188 = vector.load %arg13[%c37_160, %c0_161] : memref<342x128xf32, #tpu.memory_space<vmem>>, vector<288x128xf32>
    %189 = arith.truncf %188 : vector<288x128xf32> to vector<288x128xbf16>
    %c2_162 = arith.constant 2 : index
    %c1_163 = arith.constant 1 : index
    %c0_164 = arith.constant 0 : index
    %c0_165 = arith.constant 0 : index
    %190 = vector.load %arg7[%c2_162, %c1_163, %c0_164, %c0_165] : memref<3x3x128x128xbf16, #tpu.memory_space<vmem>>, vector<1x1x128x128xbf16>
    %191 = vector.shape_cast %190 : vector<1x1x128x128xbf16> to vector<128x128xbf16>
    %cst_166 = arith.constant dense<0.000000e+00> : vector<288x128xf32>
    %192 = tpu.matmul %189, %191, %cst_166 {dimension_numbers = #tpu.dot_dimension_numbers<[1], [0], [0], [1], [0, 0, 1, 1], [], []>} : vector<288x128xbf16>, vector<128x128xbf16>, vector<288x128xf32> -> vector<288x128xf32>
    %193 = arith.addf %187, %192 : vector<288x128xf32>
    %c38_167 = arith.constant 38 : index
    %c0_168 = arith.constant 0 : index
    %194 = vector.load %arg13[%c38_167, %c0_168] : memref<342x128xf32, #tpu.memory_space<vmem>>, vector<288x128xf32>
    %195 = arith.truncf %194 : vector<288x128xf32> to vector<288x128xbf16>
    %c2_169 = arith.constant 2 : index
    %c2_170 = arith.constant 2 : index
    %c0_171 = arith.constant 0 : index
    %c0_172 = arith.constant 0 : index
    %196 = vector.load %arg7[%c2_169, %c2_170, %c0_171, %c0_172] : memref<3x3x128x128xbf16, #tpu.memory_space<vmem>>, vector<1x1x128x128xbf16>
    %197 = vector.shape_cast %196 : vector<1x1x128x128xbf16> to vector<128x128xbf16>
    %cst_173 = arith.constant dense<0.000000e+00> : vector<288x128xf32>
    %198 = tpu.matmul %195, %197, %cst_173 {dimension_numbers = #tpu.dot_dimension_numbers<[1], [0], [0], [1], [0, 0, 1, 1], [], []>} : vector<288x128xbf16>, vector<128x128xbf16>, vector<288x128xf32> -> vector<288x128xf32>
    %199 = arith.addf %193, %198 : vector<288x128xf32>
    %c0_174 = arith.constant 0 : index
    %c0_175 = arith.constant 0 : index
    %200 = vector.load %arg8[%c0_174, %c0_175] : memref<1x128xf32, #tpu.memory_space<vmem>>, vector<1x128xf32>
    %201 = vector.broadcast %200 : vector<1x128xf32> to vector<288x128xf32>
    %202 = arith.mulf %199, %201 : vector<288x128xf32>
    %c0_176 = arith.constant 0 : index
    %c0_177 = arith.constant 0 : index
    %203 = vector.load %arg9[%c0_176, %c0_177] : memref<1x128xf32, #tpu.memory_space<vmem>>, vector<1x128xf32>
    %204 = vector.broadcast %203 : vector<1x128xf32> to vector<288x128xf32>
    %205 = arith.addf %202, %204 : vector<288x128xf32>
    %cst_178 = arith.constant 0.000000e+00 : f32
    %206 = vector.broadcast %cst_178 : f32 to vector<288x128xf32>
    %207 = arith.cmpf ogt, %205, %206 : vector<288x128xf32>
    %c0_179 = arith.constant 0 : index
    %c0_180 = arith.constant 0 : index
    %208 = vector.load %arg10[%c0_179, %c0_180] : memref<1x128xf32, #tpu.memory_space<vmem>>, vector<1x128xf32>
    %209 = vector.broadcast %208 : vector<1x128xf32> to vector<288x128xf32>
    %210 = arith.mulf %209, %205 : vector<288x128xf32>
    %211 = arith.select %207, %205, %210 : vector<288x128xi1>, vector<288x128xf32>
    %c0_181 = arith.constant 0 : index
    %c0_182 = arith.constant 0 : index
    %c0_183 = arith.constant 0 : index
    %212 = vector.load %arg11[%c0_181, %c0_182, %c0_183] : memref<1x288x128xf32, #tpu.memory_space<vmem>>, vector<1x288x128xf32>
    %213 = vector.shape_cast %212 : vector<1x288x128xf32> to vector<288x128xf32>
    %214 = vector.shape_cast %211 : vector<288x128xf32> to vector<1x288x128xf32>
    tpu.vector_store %arg11[%c0_181, %c0_182, %c0_183], %214 {strides = array<i32>} : memref<1x288x128xf32, #tpu.memory_space<vmem>>, vector<1x288x128xf32>,
    return
  }
  func.func @transform_1(%arg0: i32, %arg1: i32) -> (i32, i32, i32, i32) {
    %c0_i32 = arith.constant 0 : i32
    %c0_i32_0 = arith.constant 0 : i32
    %c0_i32_1 = arith.constant 0 : i32
    %c0_i32_2 = arith.constant 0 : i32
    %c0_i32_3 = arith.constant 0 : i32
    return %c0_i32, %c0_i32_0, %c0_i32_1, %c0_i32_2 : i32, i32, i32, i32
  }
  func.func @transform_2(%arg0: i32, %arg1: i32) -> (i32, i32) {
    %c0_i32 = arith.constant 0 : i32
    %c0_i32_0 = arith.constant 0 : i32
    %c0_i32_1 = arith.constant 0 : i32
    return %c0_i32, %c0_i32_0 : i32, i32
  }
  func.func @transform_3(%arg0: i32, %arg1: i32) -> (i32, i32) {
    %c0_i32 = arith.constant 0 : i32
    %c0_i32_0 = arith.constant 0 : i32
    %c0_i32_1 = arith.constant 0 : i32
    return %c0_i32, %c0_i32_0 : i32, i32
  }
  func.func @transform_4(%arg0: i32, %arg1: i32) -> (i32, i32) {
    %c0_i32 = arith.constant 0 : i32
    %c0_i32_0 = arith.constant 0 : i32
    %c0_i32_1 = arith.constant 0 : i32
    return %c0_i32, %c0_i32_0 : i32, i32
  }
  func.func @transform_5(%arg0: i32, %arg1: i32) -> (i32, i32, i32, i32) {
    %c0_i32 = arith.constant 0 : i32
    %c0_i32_0 = arith.constant 0 : i32
    %c0_i32_1 = arith.constant 0 : i32
    %c0_i32_2 = arith.constant 0 : i32
    %c0_i32_3 = arith.constant 0 : i32
    return %c0_i32, %c0_i32_0, %c0_i32_1, %c0_i32_2 : i32, i32, i32, i32
  }
  func.func @transform_6(%arg0: i32, %arg1: i32) -> (i32, i32) {
    %c0_i32 = arith.constant 0 : i32
    %c0_i32_0 = arith.constant 0 : i32
    %c0_i32_1 = arith.constant 0 : i32
    return %c0_i32, %c0_i32_0 : i32, i32
  }
  func.func @transform_7(%arg0: i32, %arg1: i32) -> (i32, i32) {
    %c0_i32 = arith.constant 0 : i32
    %c0_i32_0 = arith.constant 0 : i32
    %c0_i32_1 = arith.constant 0 : i32
    return %c0_i32, %c0_i32_0 : i32, i32
  }
  func.func @transform_8(%arg0: i32, %arg1: i32) -> (i32, i32) {
    %c0_i32 = arith.constant 0 : i32
    %c0_i32_0 = arith.constant 0 : i32
    %c0_i32_1 = arith.constant 0 : i32
    return %c0_i32, %c0_i32_0 : i32, i32
  }
  func.func @transform_9(%arg0: i32, %arg1: i32) -> (i32, i32, i32) {
    %c0_i32 = arith.constant 0 : i32
    %c0_i32_0 = arith.constant 0 : i32
    return %arg0, %arg1, %c0_i32 : i32, i32, i32
  }
}

</mosaic_0001>

<bundles_post_ra>
// kernel: tpu_custom_call.1
= control target key start
LH: loop header
LB: loop body
LE: loop exit
PB: predicated region body
PF: predicated region fallthrough
CT: control target
= control target key end

     0   :  { %14 = vsyncpa [#allocation6], 0  ;;  %s15215_s0 = inlined_call_operand.vmem [shape: f32[2,378,128], index: 0, kind: input, shape index: {}]   ;;  %s15216_s1 = inlined_call_operand.vmem [shape: bf16[3,3,128,128], index: 1, kind: input, shape index: {}]   ;;  %s15217_s2 = inlined_call_operand.vmem [shape: f32[1,128], index: 2, kind: input, shape index: {}]   ;;  %s15218_s3 = inlined_call_operand.vmem [shape: f32[1,128], index: 3, kind: input, shape index: {}]   ;;  %s15219_s4 = inlined_call_operand.vmem [shape: f32[1,128], index: 4, kind: input, shape index: {}]   ;;  %s15220_s5 = inlined_call_operand.vmem [shape: bf16[3,3,128,128], index: 5, kind: input, shape index: {}]   ;;  %s15221_s6 = inlined_call_operand.vmem [shape: f32[1,128], index: 6, kind: input, shape index: {}]   ;;  %s15222_s7 = inlined_call_operand.vmem [shape: f32[1,128], index: 7, kind: input, shape index: {}]   ;;  %s15223_s8 = inlined_call_operand.vmem [shape: f32[1,128], index: 8, kind: input, shape index: {}]   ;;  %s15224_s9 = inlined_call_operand.hbm [shape: f32[2,288,128], index: 9, kind: output, shape index: {}]  }
   0x1   :  { %16 = vsyncpa [#allocation6 + $0x1], 0  ;;  %s12089_s30 = smov 0   ;;  %s12091_s10 = smov 0  }
   0x2   :  { %s12093_s11 = smov 0   ;;  %s12095_s12 = smov 0  }
   0x3   :  { %s12097_s13 = smov 0   ;;  %s12099_s14 = smov 0  }
   0x4 LB: > { %s8285_s15 = sadd.s32 4294967295, %s12031_s14   ;;  %s8286_s16 = sadd.s32 4294967294, %s12031_s14   ;;  %s12031_s14 = sphi %s12099_s14, %s22_s14   ;;  %s12027_s13 = sphi %s12097_s13, %s15450_s13   ;;  %s12023_s12 = sphi %s12095_s12, %s15449_s12   ;;  %s12019_s11 = sphi %s12093_s11, %s15448_s11   ;;  %s12015_s10 = sphi %s12091_s10, %s15447_s10   ;;  %s12011_s30 = sphi %s12089_s30, %s15446_s30  }
   0x5   : > { %s34_s17 = sadd.s32 1, %s12027_s13  ;;  %s211_s18 = sadd.s32 1, %s12019_s11 }
   0x6   : > { %p36_p0 = scmp.ge.s32.totalorder %s34_s17, 2  ;;  %p221_p1 = scmp.ne.s32.totalorder %s12019_s11, %s12015_s10 }
   0x7   : > { %p222_p2 = scmp.eq.s32.totalorder %s8285_s15, 1  ;;  %p227_p3 = scmp.ne.s32.totalorder %s12015_s10, %s12011_s30 }
   0x8   : > { %s15452_s17 = smov (%p36_p0, %s34_s17), 0  ;;  %p228_p5 = scmp.eq.s32.totalorder %s8286_s16, 1 }
   0x9   : > { %p12129_p4 = por %p222_p2, %p221_p1  ;;  %s206_s20 = ssub.s32 %s12027_s13, %s15452_s17 }
   0xa   : > { %p8288_p6 = scmp.ge.s32.totalorder %s12031_s14, 1  ;;  %p209_p7 = scmp.eq.s32.totalorder %s206_s20, 0 }
   0xb   : > { %p12136_p8 = por %p228_p5, %p227_p3  ;;  %p270_p9 = scmp.lt.s32.totalorder %s12031_s14, 3 }
   0xc   : > { %s12142_s22 = scalar_select %p209_p7, %s12019_s11, %s211_s18  }
   0xd   : > { %p271_p10 = pnand %p8288_p6, %p270_p9 }
   0xf   : > { %274 = sbr.rel (%p271_p10) target bundleno = 2179 (0x883), region = 52 }
  0x16   : > { %s296_s23 = sand.u32 1, %s12015_s10   ;;  %s318_s24 = smul.u32 384, %s12023_s12 }
  0x17   : > { %s12148_s25 = smul.u32 288, %s296_s23 }
  0x18   : > { %s12153_s28 = scalar_lea.vmem %s15215_s0, %s318_s24 }
  0x19   : > { %v357_v0 = vld [vmem:[%s12153_s28] sm:$0xff]  ;;  %v359_v1 = vld [vmem:[%s12153_s28 + $0x8] sm:$0xff]  ;;  %v361_v2 = vld [vmem:[%s12153_s28 + $0x10] sm:$0xff]  ;;  %s12202_s29 = scalar_lea.vmem [#allocation5], %s12148_s25 }
  0x1a   : > { %358 = vst [vmem:[#allocation2] sm:$0xff] %v357_v0  ;;  %360 = vst [vmem:[#allocation2 + $0x8] sm:$0xff] %v359_v1  ;;  %v363_v3 = vld [vmem:[%s12153_s28 + $0x18] sm:$0xff]  ;;  %v365_v4 = vld [vmem:[%s12153_s28 + $0x20] sm:$0xff] }
  0x1b   : > { %362 = vst [vmem:[#allocation2 + $0x10] sm:$0xff] %v361_v2  ;;  %v367_v5 = vld [vmem:[%s12153_s28 + $0x28] sm:$0xff]  ;;  %364 = vst [vmem:[#allocation2 + $0x18] sm:$0xff] %v363_v3  ;;  %v369_v6 = vld [vmem:[%s12153_s28 + $0x30] sm:$0xff] }
  0x1c   : > { %366 = vst [vmem:[#allocation2 + $0x20] sm:$0xff] %v365_v4  ;;  %368 = vst [vmem:[#allocation2 + $0x28] sm:$0xff] %v367_v5  ;;  %v371_v7 = vld [vmem:[%s12153_s28 + $0x38] sm:$0xff]  ;;  %v373_v8 = vld [vmem:[%s12153_s28 + $0x40] sm:$0xff] }
  0x1d   : > { %370 = vst [vmem:[#allocation2 + $0x30] sm:$0xff] %v369_v6  ;;  %372 = vst [vmem:[#allocation2 + $0x38] sm:$0xff] %v371_v7  ;;  %v375_v9 = vld [vmem:[%s12153_s28 + $0x48] sm:$0xff]  ;;  %v377_v10 = vld [vmem:[%s12153_s28 + $0x50] sm:$0xff] }
  0x1e   : > { %374 = vst [vmem:[#allocation2 + $0x40] sm:$0xff] %v373_v8  ;;  %v379_v11 = vld [vmem:[%s12153_s28 + $0x58] sm:$0xff]  ;;  %376 = vst [vmem:[#allocation2 + $0x48] sm:$0xff] %v375_v9  ;;  %v381_v12 = vld [vmem:[%s12153_s28 + $0x60] sm:$0xff] }
  0x1f   : > { %378 = vst [vmem:[#allocation2 + $0x50] sm:$0xff] %v377_v10  ;;  %380 = vst [vmem:[#allocation2 + $0x58] sm:$0xff] %v379_v11  ;;  %v383_v13 = vld [vmem:[%s12153_s28 + $0x68] sm:$0xff]  ;;  %v385_v14 = vld [vmem:[%s12153_s28 + $0x70] sm:$0xff] }
  0x20   : > { %382 = vst [vmem:[#allocation2 + $0x60] sm:$0xff] %v381_v12  ;;  %384 = vst [vmem:[#allocation2 + $0x68] sm:$0xff] %v383_v13  ;;  %v387_v15 = vld [vmem:[%s12153_s28 + $0x78] sm:$0xff]  ;;  %v389_v16 = vld [vmem:[%s12153_s28 + $0x80] sm:$0xff] }
  0x21   : > { %386 = vst [vmem:[#allocation2 + $0x70] sm:$0xff] %v385_v14  ;;  %v391_v17 = vld [vmem:[%s12153_s28 + $0x88] sm:$0xff]  ;;  %388 = vst [vmem:[#allocation2 + $0x78] sm:$0xff] %v387_v15  ;;  %v393_v18 = vld [vmem:[%s12153_s28 + $0x90] sm:$0xff] }
  0x22   : > { %390 = vst [vmem:[#allocation2 + $0x80] sm:$0xff] %v389_v16  ;;  %392 = vst [vmem:[#allocation2 + $0x88] sm:$0xff] %v391_v17  ;;  %v395_v19 = vld [vmem:[%s12153_s28 + $0x98] sm:$0xff]  ;;  %v397_v20 = vld [vmem:[%s12153_s28 + $0xa0] sm:$0xff] }
  0x23   : > { %394 = vst [vmem:[#allocation2 + $0x90] sm:$0xff] %v393_v18  ;;  %396 = vst [vmem:[#allocation2 + $0x98] sm:$0xff] %v395_v19  ;;  %v399_v21 = vld [vmem:[%s12153_s28 + $0xa8] sm:$0xff]  ;;  %v401_v22 = vld [vmem:[%s12153_s28 + $0xb0] sm:$0xff] }
  0x24   : > { %398 = vst [vmem:[#allocation2 + $0xa0] sm:$0xff] %v397_v20  ;;  %v403_v23 = vld [vmem:[%s12153_s28 + $0xb8] sm:$0xff]  ;;  %400 = vst [vmem:[#allocation2 + $0xa8] sm:$0xff] %v399_v21  ;;  %v405_v24 = vld [vmem:[%s12153_s28 + $0xc0] sm:$0xff] }
  0x25   : > { %402 = vst [vmem:[#allocation2 + $0xb0] sm:$0xff] %v401_v22  ;;  %404 = vst [vmem:[#allocation2 + $0xb8] sm:$0xff] %v403_v23  ;;  %v407_v25 = vld [vmem:[%s12153_s28 + $0xc8] sm:$0xff]  ;;  %v409_v26 = vld [vmem:[%s12153_s28 + $0xd0] sm:$0xff] }
  0x26   : > { %406 = vst [vmem:[#allocation2 + $0xc0] sm:$0xff] %v405_v24  ;;  %408 = vst [vmem:[#allocation2 + $0xc8] sm:$0xff] %v407_v25  ;;  %v411_v27 = vld [vmem:[%s12153_s28 + $0xd8] sm:$0xff]  ;;  %v413_v28 = vld [vmem:[%s12153_s28 + $0xe0] sm:$0xff] }
  0x27   : > { %410 = vst [vmem:[#allocation2 + $0xd0] sm:$0xff] %v409_v26  ;;  %v415_v29 = vld [vmem:[%s12153_s28 + $0xe8] sm:$0xff]  ;;  %412 = vst [vmem:[#allocation2 + $0xd8] sm:$0xff] %v411_v27  ;;  %v417_v30 = vld [vmem:[%s12153_s28 + $0xf0] sm:$0xff] }
  0x28   : > { %414 = vst [vmem:[#allocation2 + $0xe0] sm:$0xff] %v413_v28  ;;  %416 = vst [vmem:[#allocation2 + $0xe8] sm:$0xff] %v415_v29  ;;  %v419_v31 = vld [vmem:[%s12153_s28 + $0xf8] sm:$0xff]  ;;  %v421_v32 = vld [vmem:[%s12153_s28 + $0x100] sm:$0xff] }
  0x29   : > { %418 = vst [vmem:[#allocation2 + $0xf0] sm:$0xff] %v417_v30  ;;  %420 = vst [vmem:[#allocation2 + $0xf8] sm:$0xff] %v419_v31  ;;  %v423_v33 = vld [vmem:[%s12153_s28 + $0x108] sm:$0xff]  ;;  %v425_v34 = vld [vmem:[%s12153_s28 + $0x110] sm:$0xff] }
  0x2a   : > { %422 = vst [vmem:[#allocation2 + $0x100] sm:$0xff] %v421_v32  ;;  %v427_v35 = vld [vmem:[%s12153_s28 + $0x118] sm:$0xff]  ;;  %424 = vst [vmem:[#allocation2 + $0x108] sm:$0xff] %v423_v33  ;;  %v429_v36 = vld [vmem:[%s12153_s28 + $0x120] sm:$0xff] }
  0x2b   : > { %426 = vst [vmem:[#allocation2 + $0x110] sm:$0xff] %v425_v34  ;;  %428 = vst [vmem:[#allocation2 + $0x118] sm:$0xff] %v427_v35  ;;  %v431_v37 = vld [vmem:[%s12153_s28 + $0x128] sm:$0xff]  ;;  %v433_v38 = vld [vmem:[%s12153_s28 + $0x130] sm:$0xff] }
  0x2c   : > { %430 = vst [vmem:[#allocation2 + $0x120] sm:$0xff] %v429_v36  ;;  %432 = vst [vmem:[#allocation2 + $0x128] sm:$0xff] %v431_v37  ;;  %v435_v39 = vld [vmem:[%s12153_s28 + $0x138] sm:$0xff]  ;;  %v437_v40 = vld [vmem:[%s12153_s28 + $0x140] sm:$0xff] }
  0x2d   : > { %434 = vst [vmem:[#allocation2 + $0x130] sm:$0xff] %v433_v38  ;;  %v439_v41 = vld [vmem:[%s12153_s28 + $0x148] sm:$0xff]  ;;  %436 = vst [vmem:[#allocation2 + $0x138] sm:$0xff] %v435_v39  ;;  %v441_v42 = vld [vmem:[%s12153_s28 + $0x150] sm:$0xff] }
  0x2e   : > { %438 = vst [vmem:[#allocation2 + $0x140] sm:$0xff] %v437_v40  ;;  %440 = vst [vmem:[#allocation2 + $0x148] sm:$0xff] %v439_v41  ;;  %v443_v43 = vld [vmem:[%s12153_s28 + $0x158] sm:$0xff]  ;;  %v445_v44 = vld [vmem:[%s12153_s28 + $0x160] sm:$0xff] }
  0x2f   : > { %442 = vst [vmem:[#allocation2 + $0x150] sm:$0xff] %v441_v42  ;;  %444 = vst [vmem:[#allocation2 + $0x158] sm:$0xff] %v443_v43  ;;  %v447_v45 = vld [vmem:[%s12153_s28 + $0x168] sm:$0xff] }
  0x30   : > { %446 = vst [vmem:[#allocation2 + $0x160] sm:$0xff] %v445_v44  ;;  %448 = vst [vmem:[#allocation2 + $0x168] sm:$0xff] %v447_v45 }
  0x31   : > { %465 = vsyncadd [#allocation4], 6048 }
  0x32   : > { %12003 = dma.done.wait [#allocation4], 6048 }
  0x33   : > { %12004 = vsyncadd [#allocation4], 4294961248  ;;  %v12033_v46 = vmov 0.0   ;;  %vm12034_vm0 = vmmov 0   ;;  %v11740_v47 = vld [vmem:[%s15216_s1 + $0x80] sm:$0xff]   ;;  %v11741_v48 = vld [vmem:[%s15216_s1 + $0x88] sm:$0xff]  }
  0x34   : > { %4990 = vst [vmem:[#allocation3 + $0x14c] sm:$0xff] %v12033_v46  ;;  %9496 = vmatprep.subr.bf16.mxu0 %v12033_v46  ;;  %9512 = vmatprep.mubr.msk.bf16.mxu0 %vm12034_vm0, %v12033_v46  ;;  %v11742_v49 = vld [vmem:[%s15216_s1 + $0x90] sm:$0xff]   ;;  %v11743_v50 = vld [vmem:[%s15216_s1 + $0x98] sm:$0xff]   ;;  %v11744_v51 = vld [vmem:[%s15216_s1 + $0xa0] sm:$0xff]   ;;  %s11680_s15 = smul.u32 4608, %s12023_s12  ;;  %s8169_s16 = sshll.u32 %s12202_s29, 4  ;;  %s15163_s16 = int_to_ptr.vmem [resolvable:$true] %s8169_s16 }
  0x35   : > { %9296 = vmatprep.subr.bf16.mxu1 %v12033_v46  ;;  %9312 = vmatprep.mubr.msk.bf16.mxu1 %vm12034_vm0, %v12033_v46  ;;  %v11745_v52 = vld [vmem:[%s15216_s1 + $0xa8] sm:$0xff]   ;;  %v11746_v53 = vld [vmem:[%s15216_s1 + $0xb0] sm:$0xff]   ;;  %v11747_v54 = vld [vmem:[%s15216_s1 + $0xb8] sm:$0xff]   ;;  %s15169_s24 = scalar_lea.sflag [#allocation6], %s296_s23  ;;  %s11951_s25 = scalar_lea.vmem %s15163_s16, 4608 }
  0x36   : > { %9497 = vmatpush3.bf16.msra.mxu0 %v11740_v47  ;;  %v1283_v55 = vld [vmem:[#allocation2 + $0x2] sm:$0xff]  ;;  %v1284_v56 = vld [vmem:[#allocation2 + $0xa] sm:$0xff]  ;;  %v1285_v59 = vld [vmem:[#allocation2 + $0x12] sm:$0xff]  ;;  %s15160_s20 = scalar_lea.hbm %s15224_s9, %s11680_s15  ;;  %p11952_p11 = scmp.ne.s32.totalorder %s15163_s16, %s11951_s25 }
  0x37   : > { %9498 = vmatprep.subr.bf16.mxu0 %v12033_v46  ;;  %v11748_v57 = vld [vmem:[%s15216_s1 + $0xc0] sm:$0xff]   ;;  %v1324_v58 = vpack.c.bf16 %v1284_v56, %v1283_v55  ;;  %v11749_v61 = vld [vmem:[%s15216_s1 + $0xc8] sm:$0xff]   ;;  %v11750_v62 = vld [vmem:[%s15216_s1 + $0xd0] sm:$0xff]   ;;  %s12036_s26 = smov [#allocation5]  }
  0x38   : > { %v1286_v60 = vld [vmem:[#allocation2 + $0x1a] sm:$0xff]  ;;  %v1287_v0 = vld [vmem:[#allocation2 + $0x22] sm:$0xff]  ;;  %v1288_v1 = vld [vmem:[#allocation2 + $0x2a] sm:$0xff]  ;;  %p11953_p12 = pnand %p11952_p11, %p12129_p4  ;;  %s11955_s27 = sshll.u32 %s12036_s26, 4  ;;  %s11956_s27 = int_to_ptr.vmem [resolvable:$false] %s11955_s27 }
  0x39   : > { %v1325_v63 = vpack.c.bf16 %v1286_v60, %v1285_v59  ;;  %v11751_v2 = vld [vmem:[%s15216_s1 + $0xd8] sm:$0xff]   ;;  %v11752_v3 = vld [vmem:[%s15216_s1 + $0xe0] sm:$0xff]   ;;  %v1326_v4 = vpack.c.bf16 %v1288_v1, %v1287_v0  ;;  %v11753_v7 = vld [vmem:[%s15216_s1 + $0xe8] sm:$0xff]   ;;  %s11957_s28 = scalar_lea.vmem %s11956_s27, 9216  ;;  %p11958_p0 = scmp.lt.s32.totalorder %s15163_s16, %s11956_s27 }
  0x3a   : > { %9499 = vmatpush3.bf16.msra.mxu0 %v11741_v48  ;;  %v1289_v5 = vld [vmem:[#allocation2 + $0x32] sm:$0xff]  ;;  %v1290_v6 = vld [vmem:[#allocation2 + $0x3a] sm:$0xff]  ;;  %v1291_v10 = vld [vmem:[#allocation2 + $0x42] sm:$0xff]  ;;  %p11954_p13 = pneg %p11953_p12  ;;  %p11959_p1 = scmp.lt.s32.totalorder %s11957_s28, %s11951_s25 }
  0x3b   : > { %9500 = vmatprep.subr.bf16.mxu0 %v12033_v46  ;;  %v11754_v8 = vld [vmem:[%s15216_s1 + $0xf0] sm:$0xff]   ;;  %v1327_v9 = vpack.c.bf16 %v1290_v6, %v1289_v5  ;;  %v11755_v12 = vld [vmem:[%s15216_s1 + $0xf8] sm:$0xff]   ;;  %v1295_v17 = vld [vmem:[#allocation2 + $0x62] sm:$0xff] }
  0x3c   : > { %v1292_v11 = vld [vmem:[#allocation2 + $0x4a] sm:$0xff]  ;;  %v1293_v14 = vld [vmem:[#allocation2 + $0x52] sm:$0xff]  ;;  %v1294_v15 = vld [vmem:[#allocation2 + $0x5a] sm:$0xff]  ;;  %p11960_p2 = por %p11959_p1, %p11958_p0 }
  0x3d   : > { %v1328_v13 = vpack.c.bf16 %v1292_v11, %v1291_v10  ;;  %v1329_v16 = vpack.c.bf16 %v1294_v15, %v1293_v14  ;;  %v1296_v18 = vld [vmem:[#allocation2 + $0x6a] sm:$0xff]  ;;  %v1297_v20 = vld [vmem:[#allocation2 + $0x72] sm:$0xff]  ;;  %v1298_v21 = vld [vmem:[#allocation2 + $0x7a] sm:$0xff] }
  0x3e   : > { %9501 = vmatpush3.bf16.msra.mxu0 %v11742_v49  ;;  %v1330_v19 = vpack.c.bf16 %v1296_v18, %v1295_v17  ;;  %v1331_v22 = vpack.c.bf16 %v1298_v21, %v1297_v20  ;;  %v1299_v23 = vld [vmem:[#allocation2 + $0x82] sm:$0xff]  ;;  %v1300_v24 = vld [vmem:[#allocation2 + $0x8a] sm:$0xff]  ;;  %v11759_v29 = vld [vmem:[%s15216_s1 + $0x118] sm:$0xff]   ;;  %p11961_p3 = pnand %p11960_p2, %p11954_p13 }
  0x3f   : > { %9502 = vmatprep.subr.bf16.mxu0 %v12033_v46  ;;  %v1332_v25 = vpack.c.bf16 %v1300_v24, %v1299_v23  ;;  %v11756_v26 = vld [vmem:[%s15216_s1 + $0x100] sm:$0xff]   ;;  %v11757_v27 = vld [vmem:[%s15216_s1 + $0x108] sm:$0xff]   ;;  %v11758_v28 = vld [vmem:[%s15216_s1 + $0x110] sm:$0xff]  }
  0x40   : > { %v11760_v30 = vld [vmem:[%s15216_s1 + $0x120] sm:$0xff]   ;;  %v11761_v31 = vld [vmem:[%s15216_s1 + $0x128] sm:$0xff]   ;;  %v11762_v32 = vld [vmem:[%s15216_s1 + $0x130] sm:$0xff]  }
  0x41   : > { %v11763_v33 = vld [vmem:[%s15216_s1 + $0x138] sm:$0xff]   ;;  %v1669_v37 = vld [vmem:[#allocation2 + $0xa2] sm:$0xff]  ;;  %v1670_v38 = vld [vmem:[#allocation2 + $0xaa] sm:$0xff] }
  0x42   : > { %9503 = vmatpush3.bf16.msra.mxu0 %v11743_v50  ;;  %v1667_v34 = vld [vmem:[#allocation2 + $0x92] sm:$0xff]  ;;  %v1668_v35 = vld [vmem:[#allocation2 + $0x9a] sm:$0xff]  ;;  %v1701_v39 = vpack.c.bf16 %v1670_v38, %v1669_v37  ;;  %v1673_v43 = vld [vmem:[#allocation2 + $0xc2] sm:$0xff] }
  0x43   : > { %9504 = vmatprep.subr.bf16.mxu0 %v12033_v46  ;;  %v1700_v36 = vpack.c.bf16 %v1668_v35, %v1667_v34  ;;  %v1671_v40 = vld [vmem:[#allocation2 + $0xb2] sm:$0xff]  ;;  %v1672_v41 = vld [vmem:[#allocation2 + $0xba] sm:$0xff]  ;;  %v1674_v44 = vld [vmem:[#allocation2 + $0xca] sm:$0xff] }
  0x44   : > { %v1702_v42 = vpack.c.bf16 %v1672_v41, %v1671_v40  ;;  %v1703_v45 = vpack.c.bf16 %v1674_v44, %v1673_v43  ;;  %v1675_v47 = vld [vmem:[#allocation2 + $0xd2] sm:$0xff]  ;;  %v1676_v48 = vld [vmem:[#allocation2 + $0xda] sm:$0xff]  ;;  %v1677_v50 = vld [vmem:[#allocation2 + $0xe2] sm:$0xff] }
  0x45   : > { %v1704_v49 = vpack.c.bf16 %v1676_v48, %v1675_v47  ;;  %v1681_v56 = vld [vmem:[#allocation2 + $0x102] sm:$0xff]  ;;  %v1683_v59 = vld [vmem:[#allocation2 + $0x112] sm:$0xff]  ;;  %v1684_v60 = vld [vmem:[#allocation2 + $0x11a] sm:$0xff] }
  0x46   : > { %9505 = vmatpush3.bf16.msra.mxu0 %v11744_v51  ;;  %v1678_v51 = vld [vmem:[#allocation2 + $0xea] sm:$0xff]  ;;  %v1687_v1 = vld [vmem:[#allocation2 + $0x132] sm:$0xff]  ;;  %v1689_v5 = vld [vmem:[#allocation2 + $0x142] sm:$0xff] }
  0x47   : > { %9506 = vmatprep.subr.bf16.mxu0 %v12033_v46  ;;  %v1690_v6 = vld [vmem:[#allocation2 + $0x14a] sm:$0xff]  ;;  %v2020_v14 = vld [vmem:[#allocation2 + $0x1b] sm:$0xff]  ;;  %v2027_v44 = vld [vmem:[#allocation2 + $0x53] sm:$0xff] }
  0x48   : > { %v11772_v10 = vld [vmem:[%s15216_s1 + $0x50] sm:$0xff]   ;;  %v11774_v15 = vld [vmem:[%s15216_s1 + $0x60] sm:$0xff]   ;;  %v11776_v18 = vld [vmem:[%s15216_s1 + $0x68] sm:$0xff]  }
  0x49   : > { %v11764_v17 = vld [vmem:[%s15216_s1 + $0x140] sm:$0xff]   ;;  %v2022_v21 = vld [vmem:[#allocation2 + $0x2b] sm:$0xff]  ;;  %v11779_v47 = vld [vmem:[%s15216_s1 + $0x178] sm:$0xff]  }
  0x4a   : > { %9507 = vmatpush3.bf16.msra.mxu0 %v11745_v52  ;;  %v1705_v52 = vpack.c.bf16 %v1678_v51, %v1677_v50  ;;  %v2021_v20 = vld [vmem:[#allocation2 + $0x23] sm:$0xff]  ;;  %v11766_v24 = vld [vmem:[%s15216_s1 + $0x150] sm:$0xff]   ;;  %v711_v35 = vld [vmem:[#allocation2 + $0x19] sm:$0xff] }
  0x4b   : > { %9508 = vmatprep.subr.bf16.mxu0 %v12033_v46  ;;  %v2061_v23 = vpack.c.bf16 %v2022_v21, %v2021_v20  ;;  %v710_v34 = vld [vmem:[#allocation2 + $0x11] sm:$0xff]  ;;  %v11769_v38 = vld [vmem:[%s15216_s1 + $0x168] sm:$0xff]   ;;  %v715_v51 = vld [vmem:[#allocation2 + $0x39] sm:$0xff] }
  0x4c   : > { %v2026_v37 = vld [vmem:[#allocation2 + $0x4b] sm:$0xff]  ;;  %v2040_v20 = vld [vmem:[#allocation2 + $0xbb] sm:$0xff] }
  0x4d   : > { %v11775_v41 = vld [vmem:[%s15216_s1 + $0x170] sm:$0xff]  }
  0x4e   : > { %9509 = vmatpush3.bf16.msra.mxu0 %v11746_v53  ;;  %v1679_v53 = vld [vmem:[#allocation2 + $0xf2] sm:$0xff]  ;;  %v713_v43 = vld [vmem:[#allocation2 + $0x29] sm:$0xff] }
  0x4f   : > { %9510 = vmatprep.subr.bf16.mxu0 %v12033_v46  ;;  %v714_v50 = vld [vmem:[#allocation2 + $0x31] sm:$0xff] }
  0x52   : > { %9511 = vmatpush3.bf16.msra.mxu0 %v11747_v54  ;;  %v1680_v54 = vld [vmem:[#allocation2 + $0xfa] sm:$0xff] }
  0x53   : > { %9596 = vmatprep.subr.bf16.mxu0 %v12033_v46  ;;  %v1706_v55 = vpack.c.bf16 %v1680_v54, %v1679_v53  ;;  %v2030_v53 = vld [vmem:[#allocation2 + $0x6b] sm:$0xff]  ;;  %v752_v54 = vpack.c.bf16 %v715_v51, %v714_v50 }
  0x54   : > { %v2050_v50 = vld [vmem:[#allocation2 + $0x10b] sm:$0xff] }
  0x55   : > { %9513 = vmatmul.mubr.bf16.vlgmr.msra.gmra.mrb[0].mxu0 %v1324_v58 }
  0x56   : > { %9597 = vmatpush3.bf16.msra.mxu0 %v11748_v57  ;;  %9516 = vmatprep.mubr.msk.bf16.mxu0 %vm12034_vm0, %v12033_v46  ;;  %v1682_v57 = vld [vmem:[#allocation2 + $0x10a] sm:$0xff] }
  0x57   : > { %9598 = vmatprep.subr.bf16.mxu0 %v12033_v46  ;;  %v1707_v58 = vpack.c.bf16 %v1682_v57, %v1681_v56  ;;  %v2031_v56 = vld [vmem:[#allocation2 + $0x73] sm:$0xff]  ;;  %v2032_v57 = vld [vmem:[#allocation2 + $0x7b] sm:$0xff] }
  0x5a   : > { %9599 = vmatpush3.bf16.msra.mxu0 %v11749_v61  ;;  %v1708_v61 = vpack.c.bf16 %v1684_v60, %v1683_v59  ;;  %v717_v59 = vld [vmem:[#allocation2 + $0x49] sm:$0xff] }
  0x5b   : > { %9600 = vmatprep.subr.bf16.mxu0 %v12033_v46 }
  0x5d   : > { %9517 = vmatmul.mubr.bf16.gmra.mrb[4].mxu0 %v1325_v63 }
  0x5e   : > { %9520 = vmatprep.mubr.msk.bf16.mxu0 %vm12034_vm0, %v12033_v46  ;;  %9601 = vmatpush3.bf16.msra.mxu0 %v11750_v62  ;;  %v1685_v62 = vld [vmem:[#allocation2 + $0x122] sm:$0xff] }
  0x5f   : > { %9602 = vmatprep.subr.bf16.mxu0 %v12033_v46 }
  0x62   : > { %9603 = vmatpush3.bf16.msra.mxu0 %v11751_v2  ;;  %v1688_v2 = vld [vmem:[#allocation2 + $0x13a] sm:$0xff] }
  0x63   : > { %9604 = vmatprep.subr.bf16.mxu0 %v12033_v46 }
  0x65   : > { %9521 = vmatmul.mubr.bf16.gmra.mrb[8].mxu0 %v1326_v4 }
  0x66   : > { %9524 = vmatprep.mubr.msk.bf16.mxu0 %vm12034_vm0, %v12033_v46  ;;  %9605 = vmatpush3.bf16.msra.mxu0 %v11752_v3  ;;  %v1710_v3 = vpack.c.bf16 %v1688_v2, %v1687_v1  ;;  %v2034_v1 = vld [vmem:[#allocation2 + $0x8b] sm:$0xff] }
  0x67   : > { %9606 = vmatprep.subr.bf16.mxu0 %v12033_v46 }
  0x6a   : > { %9607 = vmatpush3.bf16.msra.mxu0 %v11753_v7  ;;  %v1711_v7 = vpack.c.bf16 %v1690_v6, %v1689_v5  ;;  %v721_v5 = vld [vmem:[#allocation2 + $0x69] sm:$0xff]  ;;  %v2035_v6 = vld [vmem:[#allocation2 + $0x93] sm:$0xff] }
  0x6b   : > { %9608 = vmatprep.subr.bf16.mxu0 %v12033_v46 }
  0x6d   : > { %9525 = vmatmul.mubr.bf16.gmra.mrb[12].mxu0 %v1327_v9 }
  0x6e   : > { %9528 = vmatprep.mubr.msk.bf16.mxu0 %vm12034_vm0, %v12033_v46  ;;  %9609 = vmatpush3.bf16.msra.mxu0 %v11754_v8  ;;  %v11771_v8 = vld [vmem:[%s15216_s1 + $0x48] sm:$0xff]  }
  0x6f   : > { %9610 = vmatprep.subr.bf16.mxu0 %v12033_v46 }
  0x72   : > { %9611 = vmatpush3.bf16.msra.mxu0 %v11755_v12  ;;  %v11773_v12 = vld [vmem:[%s15216_s1 + $0x58] sm:$0xff]  }
  0x73   : > { %9696 = vmatprep.subr.bf16.mxu0 %v12033_v46 }
  0x75   : > { %9529 = vmatmul.mubr.bf16.gmra.mrb[16].mxu0 %v1328_v13 }
  0x76   : > { %9532 = vmatprep.mubr.msk.bf16.mxu0 %vm12034_vm0, %v12033_v46 }
  0x7d   : > { %9533 = vmatmul.mubr.bf16.gmra.mrb[20].mxu0 %v1329_v16 }
  0x7e   : > { %9536 = vmatprep.mubr.msk.bf16.mxu0 %vm12034_vm0, %v12033_v46 }
  0x85   : > { %9537 = vmatmul.mubr.bf16.gmra.mrb[24].mxu0 %v1330_v19 }
  0x86   : > { %9540 = vmatprep.mubr.msk.bf16.mxu0 %vm12034_vm0, %v12033_v46 }
  0x8d   : > { %9541 = vmatmul.mubr.bf16.gmra.mrb[28].mxu0 %v1331_v22 }
  0x8e   : > { %9544 = vmatprep.mubr.msk.bf16.mxu0 %vm12034_vm0, %v12033_v46 }
  0x95   : > { %9545 = vmatmul.mubr.bf16.gmra.mrb[32].mxu0 %v1332_v25 }
  0x96   : > { %9612 = vmatprep.mubr.msk.bf16.mxu0 %vm12034_vm0, %v12033_v46 }
  0x9d   : > { %9613 = vmatmul.mubr.bf16.vlgmr.msra.gmra.mrb[0].mxu0 %v1325_v63  ;;  %v1686_v63 = vld [vmem:[#allocation2 + $0x12a] sm:$0xff] }
  0x9e   : > { %9697 = vmatpush3.bf16.msra.mxu0 %v11756_v26  ;;  %9616 = vmatprep.mubr.msk.bf16.mxu0 %vm12034_vm0, %v12033_v46  ;;  %v1709_v0 = vpack.c.bf16 %v1686_v63, %v1685_v62  ;;  %v708_v26 = vld [vmem:[#allocation2 + $0x1] sm:$0xff]  ;;  %v718_v62 = vld [vmem:[#allocation2 + $0x51] sm:$0xff]  ;;  %v719_v63 = vld [vmem:[#allocation2 + $0x59] sm:$0xff] }
  0x9f   : > { %9698 = vmatprep.subr.bf16.mxu0 %v12033_v46  ;;  %v754_v2 = vpack.c.bf16 %v719_v63, %v718_v62  ;;  %v2054_v62 = vld [vmem:[#allocation2 + $0x12b] sm:$0xff] }
  0xa2   : > { %9699 = vmatpush3.bf16.msra.mxu0 %v11757_v27  ;;  %v709_v27 = vld [vmem:[#allocation2 + $0x9] sm:$0xff] }
  0xa3   : > { %9700 = vmatprep.subr.bf16.mxu0 %v12033_v46 }
  0xa5   : > { %9617 = vmatmul.mubr.bf16.gmra.mrb[4].mxu0 %v1326_v4  ;;  %v11770_v4 = vld [vmem:[%s15216_s1 + $0x40] sm:$0xff]  }
  0xa6   : > { %9620 = vmatprep.mubr.msk.bf16.mxu0 %vm12034_vm0, %v12033_v46  ;;  %9701 = vmatpush3.bf16.msra.mxu0 %v11758_v28  ;;  %v2023_v28 = vld [vmem:[#allocation2 + $0x33] sm:$0xff] }
  0xa7   : > { %9702 = vmatprep.subr.bf16.mxu0 %v12033_v46  ;;  %9297 = vmatpush3.bf16.msra.mxu1 %v11770_v4  ;;  %v720_v4 = vld [vmem:[#allocation2 + $0x61] sm:$0xff] }
  0xa8   : > { %9298 = vmatprep.subr.bf16.mxu1 %v12033_v46 }
  0xaa   : > { %9703 = vmatpush3.bf16.msra.mxu0 %v11759_v29  ;;  %v2024_v29 = vld [vmem:[#allocation2 + $0x3b] sm:$0xff] }
  0xab   : > { %9704 = vmatprep.subr.bf16.mxu0 %v12033_v46  ;;  %9299 = vmatpush3.bf16.msra.mxu1 %v11771_v8  ;;  %v755_v8 = vpack.c.bf16 %v721_v5, %v720_v4  ;;  %v2056_v4 = vld [vmem:[#allocation2 + $0x13b] sm:$0xff] }
  0xac   : > { %9300 = vmatprep.subr.bf16.mxu1 %v12033_v46 }
  0xad   : > { %9621 = vmatmul.mubr.bf16.gmra.mrb[8].mxu0 %v1327_v9  ;;  %v1691_v9 = vld [vmem:[#allocation2 + $0x152] sm:$0xf] }
  0xae   : > { %9624 = vmatprep.mubr.msk.bf16.mxu0 %vm12034_vm0, %v12033_v46  ;;  %9705 = vmatpush3.bf16.msra.mxu0 %v11760_v30  ;;  %v1712_v11 = vpack.c.bf16 %v1691_v9, %v1691_v9  ;;  %v11767_v30 = vld [vmem:[%s15216_s1 + $0x158] sm:$0xff]  }
  0xaf   : > { %9706 = vmatprep.subr.bf16.mxu0 %v12033_v46  ;;  %9301 = vmatpush3.bf16.msra.mxu1 %v11772_v10  ;;  %v722_v10 = vld [vmem:[#allocation2 + $0x71] sm:$0xff] }
  0xb0   : > { %9302 = vmatprep.subr.bf16.mxu1 %v12033_v46 }
  0xb2   : > { %9707 = vmatpush3.bf16.msra.mxu0 %v11761_v31  ;;  %v749_v31 = vpack.c.bf16 %v709_v27, %v708_v26 }
  0xb3   : > { %9708 = vmatprep.subr.bf16.mxu0 %v12033_v46  ;;  %9303 = vmatpush3.bf16.msra.mxu1 %v11773_v12  ;;  %v2037_v12 = vld [vmem:[#allocation2 + $0xa3] sm:$0xff] }
  0xb4   : > { %9304 = vmatprep.subr.bf16.mxu1 %v12033_v46 }
  0xb5   : > { %9625 = vmatmul.mubr.bf16.gmra.mrb[12].mxu0 %v1328_v13  ;;  %v2019_v13 = vld [vmem:[#allocation2 + $0x13] sm:$0xff] }
  0xb6   : > { %9628 = vmatprep.mubr.msk.bf16.mxu0 %vm12034_vm0, %v12033_v46  ;;  %9709 = vmatpush3.bf16.msra.mxu0 %v11762_v32  ;;  %v2062_v32 = vpack.c.bf16 %v2024_v29, %v2023_v28  ;;  %v728_v28 = vld [vmem:[#allocation2 + $0xa1] sm:$0xff]  ;;  %v729_v29 = vld [vmem:[#allocation2 + $0xa9] sm:$0xff] }
  0xb7   : > { %9710 = vmatprep.subr.bf16.mxu0 %v12033_v46  ;;  %9305 = vmatpush3.bf16.msra.mxu1 %v11774_v15 }
  0xb8   : > { %9306 = vmatprep.subr.bf16.mxu1 %v12033_v46 }
  0xba   : > { %9711 = vmatpush3.bf16.msra.mxu0 %v11763_v33  ;;  %v11768_v33 = vld [vmem:[%s15216_s1 + $0x160] sm:$0xff]  }
  0xbb   : > { %9796 = vmatprep.subr.bf16.mxu0 %v12033_v46  ;;  %9307 = vmatpush3.bf16.msra.mxu1 %v11776_v18  ;;  %v2039_v18 = vld [vmem:[#allocation2 + $0xb3] sm:$0xff] }
  0xbd   : > { %9629 = vmatmul.mubr.bf16.gmra.mrb[16].mxu0 %v1329_v16  ;;  %v2060_v16 = vpack.c.bf16 %v2020_v14, %v2019_v13  ;;  %v2038_v13 = vld [vmem:[#allocation2 + $0xab] sm:$0xff] }
  0xbe   : > { %9632 = vmatprep.mubr.msk.bf16.mxu0 %vm12034_vm0, %v12033_v46  ;;  %v2069_v15 = vpack.c.bf16 %v2038_v13, %v2037_v12  ;;  %v11786_v12 = vld [vmem:[%s15216_s1] sm:$0xff]  }
  0xc5   : > { %9633 = vmatmul.mubr.bf16.gmra.mrb[20].mxu0 %v1330_v19  ;;  %v12393_v19 = vld [vmem:[#allocation3 + $0x14c] sm:$0xff] }
  0xc6   : > { %9636 = vmatprep.mubr.msk.bf16.mxu0 %vm12034_vm0, %v12033_v46  ;;  %9308 = vmatprep.subr.bf16.mxu1 %v12393_v19 }
  0xcd   : > { %9637 = vmatmul.mubr.bf16.gmra.mrb[24].mxu0 %v1331_v22  ;;  %v11765_v22 = vld [vmem:[%s15216_s1 + $0x148] sm:$0xff]  }
  0xce   : > { %9640 = vmatprep.mubr.msk.bf16.mxu0 %vm12034_vm0, %v12033_v46 }
  0xd5   : > { %9641 = vmatmul.mubr.bf16.gmra.mrb[28].mxu0 %v1332_v25  ;;  %v11778_v25 = vld [vmem:[%s15216_s1 + $0x78] sm:$0xff]  }
  0xd6   : > { %9644 = vmatprep.mubr.msk.bf16.mxu0 %vm12034_vm0, %v12033_v46 }
  0xdd   : > { %9645 = vmatmul.mubr.bf16.gmra.mrb[32].mxu0 %v1700_v36  ;;  %v2025_v36 = vld [vmem:[#allocation2 + $0x43] sm:$0xff] }
  0xde   : > { %9648 = vmatprep.mubr.msk.bf16.mxu0 %vm12034_vm0, %v12033_v46  ;;  %v2063_v40 = vpack.c.bf16 %v2026_v37, %v2025_v36  ;;  %v2045_v36 = vld [vmem:[#allocation2 + $0xe3] sm:$0xff]  ;;  %v2046_v37 = vld [vmem:[#allocation2 + $0xeb] sm:$0xff] }
  0xe5   : > { %9649 = vmatmul.mubr.bf16.gmra.mrb[36].mxu0 %v1701_v39  ;;  %v750_v39 = vpack.c.bf16 %v711_v35, %v710_v34  ;;  %v730_v34 = vld [vmem:[#allocation2 + $0xb1] sm:$0xff]  ;;  %v731_v35 = vld [vmem:[#allocation2 + $0xb9] sm:$0xff] }
  0xe6   : > { %9652 = vmatprep.mubr.msk.bf16.mxu0 %vm12034_vm0, %v12033_v46 }
  0xed   : > { %9653 = vmatmul.mubr.bf16.gmra.mrb[40].mxu0 %v1702_v42  ;;  %v712_v42 = vld [vmem:[#allocation2 + $0x21] sm:$0xff] }
  0xee   : > { %9656 = vmatprep.mubr.msk.bf16.mxu0 %vm12034_vm0, %v12033_v46  ;;  %v751_v48 = vpack.c.bf16 %v713_v43, %v712_v42  ;;  %v2047_v42 = vld [vmem:[#allocation2 + $0xf3] sm:$0xff]  ;;  %v2048_v43 = vld [vmem:[#allocation2 + $0xfb] sm:$0xff] }
  0xf5   : > { %9657 = vmatmul.mubr.bf16.gmra.mrb[44].mxu0 %v1703_v45  ;;  %v2028_v45 = vld [vmem:[#allocation2 + $0x5b] sm:$0xff] }
  0xf6   : > { %9660 = vmatprep.mubr.msk.bf16.mxu0 %vm12034_vm0, %v12033_v46 }
  0xfd   : > { %9661 = vmatmul.mubr.bf16.gmra.mrb[48].mxu0 %v1704_v49  ;;  %v2064_v49 = vpack.c.bf16 %v2028_v45, %v2027_v44  ;;  %v2074_v45 = vpack.c.bf16 %v2048_v43, %v2047_v42  ;;  %v2391_v42 = vld [vmem:[#allocation2 + $0x34] sm:$0xff]  ;;  %v2392_v43 = vld [vmem:[#allocation2 + $0x3c] sm:$0xff] }
  0xfe   : > { %9664 = vmatprep.mubr.msk.bf16.mxu0 %vm12034_vm0, %v12033_v46 }
 0x105   : > { %9665 = vmatmul.mubr.bf16.gmra.mrb[52].mxu0 %v1705_v52  ;;  %v2029_v52 = vld [vmem:[#allocation2 + $0x63] sm:$0xff] }
 0x106   : > { %9668 = vmatprep.mubr.msk.bf16.mxu0 %vm12034_vm0, %v12033_v46 }
 0x10d   : > { %9669 = vmatmul.mubr.bf16.gmra.mrb[56].mxu0 %v1706_v55  ;;  %v2065_v55 = vpack.c.bf16 %v2030_v53, %v2029_v52  ;;  %v736_v53 = vld [vmem:[#allocation2 + $0xe1] sm:$0xff] }
 0x10e   : > { %9672 = vmatprep.mubr.msk.bf16.mxu0 %vm12034_vm0, %v12033_v46 }
 0x115   : > { %9673 = vmatmul.mubr.bf16.gmra.mrb[60].mxu0 %v1707_v58  ;;  %v716_v58 = vld [vmem:[#allocation2 + $0x41] sm:$0xff] }
 0x116   : > { %9676 = vmatprep.mubr.msk.bf16.mxu0 %vm12034_vm0, %v12033_v46  ;;  %v753_v60 = vpack.c.bf16 %v717_v59, %v716_v58  ;;  %v738_v59 = vld [vmem:[#allocation2 + $0xf1] sm:$0xff] }
 0x11d   : > { %9677 = vmatmul.mubr.bf16.gmra.mrb[64].mxu0 %v1708_v61  ;;  %v2066_v61 = vpack.c.bf16 %v2032_v57, %v2031_v56  ;;  %v2052_v56 = vld [vmem:[#allocation2 + $0x11b] sm:$0xff] }
 0x11e   : > { %9680 = vmatprep.mubr.msk.bf16.mxu0 %vm12034_vm0, %v12033_v46 }
 0x125   : > { %9681 = vmatmul.mubr.bf16.gmra.mrb[68].mxu0 %v1709_v0  ;;  %v2033_v0 = vld [vmem:[#allocation2 + $0x83] sm:$0xff] }
 0x126   : > { %9684 = vmatprep.mubr.msk.bf16.mxu0 %vm12034_vm0, %v12033_v46 }
 0x12d   : > { %9685 = vmatmul.mubr.bf16.gmra.mrb[72].mxu0 %v1710_v3  ;;  %v2067_v3 = vpack.c.bf16 %v2034_v1, %v2033_v0  ;;  %v740_v1 = vld [vmem:[#allocation2 + $0x101] sm:$0xff] }
 0x12e   : > { %9688 = vmatprep.mubr.msk.bf16.mxu0 %vm12034_vm0, %v12033_v46 }
 0x135   : > { %9689 = vmatmul.mubr.bf16.gmra.mrb[76].mxu0 %v1711_v7  ;;  %v2036_v7 = vld [vmem:[#allocation2 + $0x9b] sm:$0xff] }
 0x136   : > { %9692 = vmatprep.mubr.msk.bf16.mxu0 %vm12034_vm0, %v12033_v46  ;;  %v2068_v9 = vpack.c.bf16 %v2036_v7, %v2035_v6  ;;  %v742_v7 = vld [vmem:[#allocation2 + $0x111] sm:$0xff] }
 0x13d   : > { %9693 = vmatmul.mubr.bf16.gmra.mrb[80].mxu0 %v1712_v11  ;;  %v723_v11 = vld [vmem:[#allocation2 + $0x79] sm:$0xff] }
 0x13e   : > { %9712 = vmatprep.mubr.msk.bf16.mxu0 %vm12034_vm0, %v12033_v46  ;;  %v11777_v46 = vld [vmem:[%s15216_s1 + $0x70] sm:$0xff]   ;;  %v756_v14 = vpack.c.bf16 %v723_v11, %v722_v10 }
 0x13f   : > { %9309 = vmatpush3.bf16.msra.mxu1 %v11777_v46  ;;  %v726_v46 = vld [vmem:[#allocation2 + $0x91] sm:$0xff] }
 0x140   : > { %9310 = vmatprep.subr.bf16.mxu1 %v12393_v19  ;;  %v2058_v10 = vld [vmem:[#allocation2 + $0x14b] sm:$0xff] }
 0x143   : > { %9311 = vmatpush3.bf16.msra.mxu1 %v11778_v25  ;;  %v2042_v25 = vld [vmem:[#allocation2 + $0xcb] sm:$0xff] }
 0x144   : > { %9396 = vmatprep.subr.bf16.mxu1 %v12393_v19 }
 0x145   : > { %9713 = vmatmul.mubr.bf16.vlgmr.msra.gmra.mrb[0].mxu0 %v2060_v16  ;;  %v724_v16 = vld [vmem:[#allocation2 + $0x81] sm:$0xff] }
 0x146   : > { %9797 = vmatpush3.bf16.msra.mxu0 %v11764_v17  ;;  %9716 = vmatprep.mubr.msk.bf16.mxu0 %vm12034_vm0, %v12393_v19  ;;  %v725_v17 = vld [vmem:[#allocation2 + $0x89] sm:$0xff] }
 0x147   : > { %9798 = vmatprep.subr.bf16.mxu0 %v12393_v19  ;;  %9313 = vmatmul.mubr.bf16.vlgmr.msra.gmra.mrb[0].mxu1 %v749_v31  ;;  %v757_v21 = vpack.c.bf16 %v725_v17, %v724_v16  ;;  %v2044_v31 = vld [vmem:[#allocation2 + $0xdb] sm:$0xff]  ;;  %v745_v16 = vld [vmem:[#allocation2 + $0x129] sm:$0xff]  ;;  %v2059_v17 = vld [vmem:[#allocation2 + $0x153] sm:$0xf] }
 0x148   : > { %9316 = vmatprep.mubr.msk.bf16.mxu1 %vm12034_vm0, %v12393_v19  ;;  %9397 = vmatpush3.bf16.msra.mxu1 %v11786_v12  ;;  %v11891_v12 = vld [vmem:[%s15216_s1 + $0xb0] sm:$0xff]  }
 0x149   : > { %9398 = vmatprep.subr.bf16.mxu1 %v12393_v19 }
 0x14a   : > { %9799 = vmatpush3.bf16.msra.mxu0 %v11765_v22  ;;  %v2070_v22 = vpack.c.bf16 %v2040_v20, %v2039_v18  ;;  %v11788_v20 = vld [vmem:[%s15216_s1 + $0x10] sm:$0xff]  }
 0x14b   : > { %9800 = vmatprep.subr.bf16.mxu0 %v12393_v19 }
 0x14d   : > { %9717 = vmatmul.mubr.bf16.gmra.mrb[4].mxu0 %v2061_v23  ;;  %v727_v23 = vld [vmem:[#allocation2 + $0x99] sm:$0xff] }
 0x14e   : > { %9720 = vmatprep.mubr.msk.bf16.mxu0 %vm12034_vm0, %v12393_v19  ;;  %9801 = vmatpush3.bf16.msra.mxu0 %v11766_v24  ;;  %v2041_v24 = vld [vmem:[#allocation2 + $0xc3] sm:$0xff]  ;;  %v758_v26 = vpack.c.bf16 %v727_v23, %v726_v46  ;;  %v746_v46 = vld [vmem:[#allocation2 + $0x131] sm:$0xff]  ;;  %v747_v23 = vld [vmem:[#allocation2 + $0x139] sm:$0xff] }
 0x14f   : > { %9802 = vmatprep.subr.bf16.mxu0 %v12393_v19  ;;  %9317 = vmatmul.mubr.bf16.gmra.mrb[4].mxu1 %v750_v39  ;;  %v2071_v27 = vpack.c.bf16 %v2042_v25, %v2041_v24  ;;  %v2073_v39 = vpack.c.bf16 %v2046_v37, %v2045_v36  ;;  %v2387_v24 = vld [vmem:[#allocation2 + $0x14] sm:$0xff]  ;;  %v2388_v25 = vld [vmem:[#allocation2 + $0x1c] sm:$0xff] }
 0x150   : > { %9320 = vmatprep.mubr.msk.bf16.mxu1 %vm12034_vm0, %v12393_v19  ;;  %v11793_v36 = vld [vmem:[%s15216_s1 + $0x30] sm:$0xff]  }
 0x152   : > { %9803 = vmatpush3.bf16.msra.mxu0 %v11767_v30  ;;  %v2043_v30 = vld [vmem:[#allocation2 + $0xd3] sm:$0xff] }
 0x153   : > { %9804 = vmatprep.subr.bf16.mxu0 %v12393_v19 }
 0x155   : > { %9721 = vmatmul.mubr.bf16.gmra.mrb[8].mxu0 %v2062_v32  ;;  %v759_v32 = vpack.c.bf16 %v729_v29, %v728_v28  ;;  %v2428_v28 = vpack.c.bf16 %v2388_v25, %v2387_v24  ;;  %v11780_v29 = vld [vmem:[%s15216_s1 + $0x180] sm:$0xff]  }
 0x156   : > { %9724 = vmatprep.mubr.msk.bf16.mxu0 %vm12034_vm0, %v12393_v19  ;;  %9805 = vmatpush3.bf16.msra.mxu0 %v11768_v33  ;;  %v2072_v33 = vpack.c.bf16 %v2044_v31, %v2043_v30  ;;  %v11792_v30 = vld [vmem:[%s15216_s1 + $0x28] sm:$0xff]   ;;  %v748_v31 = vld [vmem:[#allocation2 + $0x141] sm:$0xf] }
 0x157   : > { %9806 = vmatprep.subr.bf16.mxu0 %v12393_v19  ;;  %9321 = vmatmul.mubr.bf16.gmra.mrb[8].mxu1 %v751_v48  ;;  %v735_v48 = vld [vmem:[#allocation2 + $0xd9] sm:$0xff] }
 0x158   : > { %9324 = vmatprep.mubr.msk.bf16.mxu1 %vm12034_vm0, %v12393_v19 }
 0x15a   : > { %9807 = vmatpush3.bf16.msra.mxu0 %v11769_v38  ;;  %v760_v38 = vpack.c.bf16 %v731_v35, %v730_v34  ;;  %v11781_v34 = vld [vmem:[%s15216_s1 + $0x188] sm:$0xff]   ;;  %v769_v35 = vpack.c.bf16 %v748_v31, %v748_v31 }
 0x15b   : > { %9808 = vmatprep.subr.bf16.mxu0 %v12393_v19 }
 0x15d   : > { %9725 = vmatmul.mubr.bf16.gmra.mrb[12].mxu0 %v2063_v40  ;;  %v732_v40 = vld [vmem:[#allocation2 + $0xc1] sm:$0xff] }
 0x15e   : > { %9728 = vmatprep.mubr.msk.bf16.mxu0 %vm12034_vm0, %v12393_v19  ;;  %9809 = vmatpush3.bf16.msra.mxu0 %v11775_v41  ;;  %v733_v41 = vld [vmem:[#allocation2 + $0xc9] sm:$0xff] }
 0x15f   : > { %9810 = vmatprep.subr.bf16.mxu0 %v12393_v19  ;;  %9325 = vmatmul.mubr.bf16.gmra.mrb[12].mxu1 %v752_v54  ;;  %v761_v44 = vpack.c.bf16 %v733_v41, %v732_v40  ;;  %v737_v54 = vld [vmem:[#allocation2 + $0xe9] sm:$0xff]  ;;  %v630_v40 = vld [vmem:[#allocation2] sm:$0xff] }
 0x160   : > { %9328 = vmatprep.mubr.msk.bf16.mxu1 %vm12034_vm0, %v12393_v19  ;;  %v763_v57 = vpack.c.bf16 %v737_v54, %v736_v53  ;;  %v631_v41 = vld [vmem:[#allocation2 + $0x8] sm:$0xff] }
 0x161   : > { %v2394_v53 = vld [vmem:[#allocation2 + $0x4c] sm:$0xff] }
 0x162   : > { %9811 = vmatpush3.bf16.msra.mxu0 %v11779_v47  ;;  %v734_v47 = vld [vmem:[#allocation2 + $0xd1] sm:$0xff]  ;;  %v11785_v54 = vld [vmem:[%s15216_s1 + $0x1a8] sm:$0xff]  }
 0x163   : > { %9896 = vmatprep.subr.bf16.mxu0 %v12393_v19  ;;  %v762_v51 = vpack.c.bf16 %v735_v48, %v734_v47  ;;  %v12571_v47 = vpack.c.bf16 %v2392_v43, %v2391_v42  ;;  %v11784_v48 = vld [vmem:[%s15216_s1 + $0x1a0] sm:$0xff]  }
 0x164   : > { %v2408_v42 = vld [vmem:[#allocation2 + $0xbc] sm:$0xff] }
 0x165   : > { %9729 = vmatmul.mubr.bf16.gmra.mrb[16].mxu0 %v2064_v49  ;;  %v2049_v49 = vld [vmem:[#allocation2 + $0x103] sm:$0xff] }
 0x166   : > { %9732 = vmatprep.mubr.msk.bf16.mxu0 %vm12034_vm0, %v12393_v19  ;;  %v2075_v52 = vpack.c.bf16 %v2050_v50, %v2049_v49  ;;  %v11885_v49 = vld [vmem:[%s15216_s1 + $0x80] sm:$0xff]   ;;  %v632_v50 = vld [vmem:[#allocation2 + $0x10] sm:$0xff] }
 0x167   : > { %9329 = vmatmul.mubr.bf16.gmra.mrb[16].mxu1 %v753_v60  ;;  %v739_v60 = vld [vmem:[#allocation2 + $0xf9] sm:$0xff] }
 0x168   : > { %9332 = vmatprep.mubr.msk.bf16.mxu1 %vm12034_vm0, %v12393_v19  ;;  %v764_v63 = vpack.c.bf16 %v739_v60, %v738_v59  ;;  %v11887_v59 = vld [vmem:[%s15216_s1 + $0x90] sm:$0xff]   ;;  %v634_v60 = vld [vmem:[#allocation2 + $0x20] sm:$0xff] }
 0x16d   : > { %9733 = vmatmul.mubr.bf16.gmra.mrb[20].mxu0 %v2065_v55  ;;  %v2051_v55 = vld [vmem:[#allocation2 + $0x113] sm:$0xff] }
 0x16e   : > { %9736 = vmatprep.mubr.msk.bf16.mxu0 %vm12034_vm0, %v12393_v19  ;;  %v2076_v58 = vpack.c.bf16 %v2052_v56, %v2051_v55  ;;  %v11886_v56 = vld [vmem:[%s15216_s1 + $0x88] sm:$0xff]  }
 0x16f   : > { %9333 = vmatmul.mubr.bf16.gmra.mrb[20].mxu1 %v754_v2  ;;  %v741_v2 = vld [vmem:[#allocation2 + $0x109] sm:$0xff] }
 0x170   : > { %9336 = vmatprep.mubr.msk.bf16.mxu1 %vm12034_vm0, %v12393_v19  ;;  %v765_v5 = vpack.c.bf16 %v741_v2, %v740_v1  ;;  %v11888_v2 = vld [vmem:[%s15216_s1 + $0x98] sm:$0xff]  }
 0x175   : > { %9737 = vmatmul.mubr.bf16.gmra.mrb[24].mxu0 %v2066_v61  ;;  %v2053_v61 = vld [vmem:[#allocation2 + $0x123] sm:$0xff] }
 0x176   : > { %9740 = vmatprep.mubr.msk.bf16.mxu0 %vm12034_vm0, %v12393_v19  ;;  %v2077_v0 = vpack.c.bf16 %v2054_v62, %v2053_v61  ;;  %v635_v61 = vld [vmem:[#allocation2 + $0x28] sm:$0xff]  ;;  %v2395_v62 = vld [vmem:[#allocation2 + $0x54] sm:$0xff] }
 0x177   : > { %9337 = vmatmul.mubr.bf16.gmra.mrb[24].mxu1 %v755_v8  ;;  %v743_v8 = vld [vmem:[#allocation2 + $0x119] sm:$0xff]  ;;  %v673_v1 = vpack.c.bf16 %v635_v61, %v634_v60  ;;  %v652_v60 = vld [vmem:[#allocation2 + $0xb0] sm:$0xff] }
 0x178   : > { %9340 = vmatprep.mubr.msk.bf16.mxu1 %vm12034_vm0, %v12393_v19  ;;  %v766_v11 = vpack.c.bf16 %v743_v8, %v742_v7  ;;  %v2397_v7 = vld [vmem:[#allocation2 + $0x64] sm:$0xff]  ;;  %v2398_v8 = vld [vmem:[#allocation2 + $0x6c] sm:$0xff]  ;;  %v653_v61 = vld [vmem:[#allocation2 + $0xb8] sm:$0xff] }
 0x17d   : > { %9741 = vmatmul.mubr.bf16.gmra.mrb[28].mxu0 %v2067_v3  ;;  %v2055_v3 = vld [vmem:[#allocation2 + $0x133] sm:$0xff] }
 0x17e   : > { %9744 = vmatprep.mubr.msk.bf16.mxu0 %vm12034_vm0, %v12393_v19  ;;  %v2078_v6 = vpack.c.bf16 %v2056_v4, %v2055_v3  ;;  %v11889_v4 = vld [vmem:[%s15216_s1 + $0xa0] sm:$0xff]  }
 0x17f   : > { %9341 = vmatmul.mubr.bf16.gmra.mrb[28].mxu1 %v756_v14  ;;  %v11787_v14 = vld [vmem:[%s15216_s1 + $0x8] sm:$0xff]  }
 0x180   : > { %9344 = vmatprep.mubr.msk.bf16.mxu1 %vm12034_vm0, %v12393_v19  ;;  %9399 = vmatpush3.bf16.msra.mxu1 %v11787_v14  ;;  %v2400_v14 = vld [vmem:[#allocation2 + $0x7c] sm:$0xff] }
 0x181   : > { %9400 = vmatprep.subr.bf16.mxu1 %v12393_v19 }
 0x184   : > { %9401 = vmatpush3.bf16.msra.mxu1 %v11788_v20 }
 0x185   : > { %9745 = vmatmul.mubr.bf16.gmra.mrb[32].mxu0 %v2068_v9  ;;  %v2057_v9 = vld [vmem:[#allocation2 + $0x143] sm:$0xff]  ;;  %9402 = vmatprep.subr.bf16.mxu1 %v12393_v19 }
 0x186   : > { %9748 = vmatprep.mubr.msk.bf16.mxu0 %vm12034_vm0, %v12393_v19  ;;  %v2079_v13 = vpack.c.bf16 %v2058_v10, %v2057_v9  ;;  %v11890_v10 = vld [vmem:[%s15216_s1 + $0xa8] sm:$0xff]  }
 0x187   : > { %9345 = vmatmul.mubr.bf16.gmra.mrb[32].mxu1 %v757_v21  ;;  %v2080_v21 = vpack.c.bf16 %v2059_v17, %v2059_v17 }
 0x188   : > { %9348 = vmatprep.mubr.msk.bf16.mxu1 %vm12034_vm0, %v12393_v19 }
 0x18d   : > { %9749 = vmatmul.mubr.bf16.gmra.mrb[36].mxu0 %v2069_v15  ;;  %v744_v15 = vld [vmem:[#allocation2 + $0x121] sm:$0xff] }
 0x18e   : > { %9752 = vmatprep.mubr.msk.bf16.mxu0 %vm12034_vm0, %v12393_v19  ;;  %v767_v18 = vpack.c.bf16 %v745_v16, %v744_v15  ;;  %v638_v15 = vld [vmem:[#allocation2 + $0x40] sm:$0xff]  ;;  %v639_v16 = vld [vmem:[#allocation2 + $0x48] sm:$0xff] }
 0x18f   : > { %9349 = vmatmul.mubr.bf16.gmra.mrb[36].mxu1 %v758_v26  ;;  %v768_v26 = vpack.c.bf16 %v747_v23, %v746_v46  ;;  %v675_v17 = vpack.c.bf16 %v639_v16, %v638_v15  ;;  %v2401_v46 = vld [vmem:[#allocation2 + $0x84] sm:$0xff]  ;;  %v2402_v23 = vld [vmem:[#allocation2 + $0x8c] sm:$0xff] }
 0x190   : > { %9352 = vmatprep.mubr.msk.bf16.mxu1 %vm12034_vm0, %v12393_v19  ;;  %v12654_v25 = vpack.c.bf16 %v2402_v23, %v2401_v46  ;;  %v658_v16 = vld [vmem:[#allocation2 + $0xe0] sm:$0xff]  ;;  %v660_v23 = vld [vmem:[#allocation2 + $0xf0] sm:$0xff] }
 0x195   : > { %9753 = vmatmul.mubr.bf16.gmra.mrb[40].mxu0 %v2070_v22  ;;  %v11789_v22 = vld [vmem:[%s15216_s1 + $0x18] sm:$0xff]  }
 0x196   : > { %9756 = vmatprep.mubr.msk.bf16.mxu0 %vm12034_vm0, %v12393_v19  ;;  %9403 = vmatpush3.bf16.msra.mxu1 %v11789_v22  ;;  %v641_v22 = vld [vmem:[#allocation2 + $0x58] sm:$0xff] }
 0x197   : > { %9353 = vmatmul.mubr.bf16.gmra.mrb[40].mxu1 %v759_v32  ;;  %9404 = vmatprep.subr.bf16.mxu1 %v12393_v19  ;;  %v2389_v32 = vld [vmem:[#allocation2 + $0x24] sm:$0xff] }
 0x198   : > { %9356 = vmatprep.mubr.msk.bf16.mxu1 %vm12034_vm0, %v12393_v19 }
 0x19d   : > { %9757 = vmatmul.mubr.bf16.gmra.mrb[44].mxu0 %v2071_v27  ;;  %v11790_v27 = vld [vmem:[%s15216_s1 + $0x20] sm:$0xff]  }
 0x19e   : > { %9760 = vmatprep.mubr.msk.bf16.mxu0 %vm12034_vm0, %v12393_v19  ;;  %9405 = vmatpush3.bf16.msra.mxu1 %v11790_v27  ;;  %v643_v27 = vld [vmem:[#allocation2 + $0x68] sm:$0xff] }
 0x19f   : > { %9357 = vmatmul.mubr.bf16.gmra.mrb[44].mxu1 %v760_v38  ;;  %9406 = vmatprep.subr.bf16.mxu1 %v12393_v19  ;;  %v11782_v38 = vld [vmem:[%s15216_s1 + $0x190] sm:$0xff]  }
 0x1a0   : > { %9360 = vmatprep.mubr.msk.bf16.mxu1 %vm12034_vm0, %v12393_v19 }
 0x1a2   : > { %9407 = vmatpush3.bf16.msra.mxu1 %v11792_v30 }
 0x1a3   : > { %9408 = vmatprep.subr.bf16.mxu1 %v12393_v19 }
 0x1a5   : > { %9761 = vmatmul.mubr.bf16.gmra.mrb[48].mxu0 %v2072_v33  ;;  %v2390_v33 = vld [vmem:[#allocation2 + $0x2c] sm:$0xff] }
 0x1a6   : > { %9764 = vmatprep.mubr.msk.bf16.mxu0 %vm12034_vm0, %v12393_v19  ;;  %v12551_v37 = vpack.c.bf16 %v2390_v33, %v2389_v32  ;;  %9409 = vmatpush3.bf16.msra.mxu1 %v11793_v36  ;;  %v644_v32 = vld [vmem:[#allocation2 + $0x70] sm:$0xff]  ;;  %v645_v33 = vld [vmem:[#allocation2 + $0x78] sm:$0xff] }
 0x1a7   : > { %9361 = vmatmul.mubr.bf16.gmra.mrb[48].mxu1 %v761_v44  ;;  %9410 = vmatprep.subr.bf16.mxu1 %v12393_v19  ;;  %v11783_v44 = vld [vmem:[%s15216_s1 + $0x198] sm:$0xff]   ;;  %v678_v36 = vpack.c.bf16 %v645_v33, %v644_v32  ;;  %v663_v32 = vld [vmem:[#allocation2 + $0x108] sm:$0xff] }
 0x1a8   : > { %9364 = vmatprep.mubr.msk.bf16.mxu1 %vm12034_vm0, %v12393_v19  ;;  %v2423_v33 = vld [vmem:[#allocation2 + $0x134] sm:$0xff] }
 0x1ad   : > { %9765 = vmatmul.mubr.bf16.gmra.mrb[52].mxu0 %v2073_v39  ;;  %v11794_v39 = vld [vmem:[%s15216_s1 + $0x38] sm:$0xff]  }
 0x1ae   : > { %9768 = vmatprep.mubr.msk.bf16.mxu0 %vm12034_vm0, %v12393_v19  ;;  %9411 = vmatpush3.bf16.msra.mxu1 %v11794_v39  ;;  %v646_v39 = vld [vmem:[#allocation2 + $0x80] sm:$0xff] }
 0x1af   : > { %9365 = vmatmul.mubr.bf16.gmra.mrb[52].mxu1 %v762_v51  ;;  %10664 = vmatprep.subr.bf16.mxu1 %v12393_v19  ;;  %v633_v51 = vld [vmem:[#allocation2 + $0x18] sm:$0xff] }
 0x1b0   : > { %9368 = vmatprep.mubr.msk.bf16.mxu1 %vm12034_vm0, %v12393_v19  ;;  %v672_v55 = vpack.c.bf16 %v633_v51, %v632_v50  ;;  %v2410_v50 = vld [vmem:[#allocation2 + $0xcc] sm:$0xff] }
 0x1b5   : > { %9769 = vmatmul.mubr.bf16.gmra.mrb[56].mxu0 %v2074_v45  ;;  %v671_v45 = vpack.c.bf16 %v631_v41, %v630_v40  ;;  %v647_v40 = vld [vmem:[#allocation2 + $0x88] sm:$0xff]  ;;  %v2407_v41 = vld [vmem:[#allocation2 + $0xb4] sm:$0xff] }
 0x1b6   : > { %9772 = vmatprep.mubr.msk.bf16.mxu0 %vm12034_vm0, %v12393_v19  ;;  %v679_v43 = vpack.c.bf16 %v647_v40, %v646_v39  ;;  %v664_v39 = vld [vmem:[#allocation2 + $0x110] sm:$0xff]  ;;  %v665_v40 = vld [vmem:[#allocation2 + $0x118] sm:$0xff] }
 0x1b7   : > { %9369 = vmatmul.mubr.bf16.gmra.mrb[56].mxu1 %v763_v57 }
 0x1b8   : > { %9372 = vmatprep.mubr.msk.bf16.mxu1 %vm12034_vm0, %v12393_v19 }
 0x1bd   : > { %9773 = vmatmul.mubr.bf16.gmra.mrb[60].mxu0 %v2075_v52  ;;  %v2393_v52 = vld [vmem:[#allocation2 + $0x44] sm:$0xff] }
 0x1be   : > { %9776 = vmatprep.mubr.msk.bf16.mxu0 %vm12034_vm0, %v12393_v19  ;;  %v12593_v57 = vpack.c.bf16 %v2394_v53, %v2393_v52  ;;  %v650_v53 = vld [vmem:[#allocation2 + $0xa0] sm:$0xff] }
 0x1bf   : > { %9373 = vmatmul.mubr.bf16.gmra.mrb[60].mxu1 %v764_v63  ;;  %v2396_v63 = vld [vmem:[#allocation2 + $0x5c] sm:$0xff] }
 0x1c0   : > { %9376 = vmatprep.mubr.msk.bf16.mxu1 %vm12034_vm0, %v12393_v19  ;;  %v12616_v3 = vpack.c.bf16 %v2396_v63, %v2395_v62  ;;  %v2413_v62 = vld [vmem:[#allocation2 + $0xe4] sm:$0xff]  ;;  %v2414_v63 = vld [vmem:[#allocation2 + $0xec] sm:$0xff] }
 0x1c5   : > { %9777 = vmatmul.mubr.bf16.gmra.mrb[64].mxu0 %v2076_v58  ;;  %v11791_v58 = vld [vmem:[%s15216_s1 + $0x1b0] sm:$0xff]  }
 0x1c6   : > { %9780 = vmatprep.mubr.msk.bf16.mxu0 %vm12034_vm0, %v12393_v19 }
 0x1c7   : > { %9377 = vmatmul.mubr.bf16.gmra.mrb[64].mxu1 %v765_v5  ;;  %v636_v5 = vld [vmem:[#allocation2 + $0x30] sm:$0xff] }
 0x1c8   : > { %9380 = vmatprep.mubr.msk.bf16.mxu1 %vm12034_vm0, %v12393_v19 }
 0x1cd   : > { %9781 = vmatmul.mubr.bf16.gmra.mrb[68].mxu0 %v2077_v0  ;;  %v11795_v0 = vld [vmem:[%s15216_s1 + $0x1b8] sm:$0xff]  }
 0x1ce   : > { %9784 = vmatprep.mubr.msk.bf16.mxu0 %vm12034_vm0, %v12393_v19 }
 0x1cf   : > { %9381 = vmatmul.mubr.bf16.gmra.mrb[68].mxu1 %v766_v11  ;;  %v12632_v11 = vpack.c.bf16 %v2398_v8, %v2397_v7 }
 0x1d0   : > { %9384 = vmatprep.mubr.msk.bf16.mxu1 %vm12034_vm0, %v12393_v19 }
 0x1d5   : > { %9785 = vmatmul.mubr.bf16.gmra.mrb[72].mxu0 %v2078_v6  ;;  %v637_v6 = vld [vmem:[#allocation2 + $0x38] sm:$0xff] }
 0x1d6   : > { %9788 = vmatprep.mubr.msk.bf16.mxu0 %vm12034_vm0, %v12393_v19  ;;  %v674_v9 = vpack.c.bf16 %v637_v6, %v636_v5  ;;  %v2415_v5 = vld [vmem:[#allocation2 + $0xf4] sm:$0xff]  ;;  %v2416_v6 = vld [vmem:[#allocation2 + $0xfc] sm:$0xff] }
 0x1d7   : > { %9385 = vmatmul.mubr.bf16.gmra.mrb[72].mxu1 %v767_v18  ;;  %v11892_v18 = vld [vmem:[%s15216_s1 + $0xb8] sm:$0xff]   ;;  %v12703_v8 = vpack.c.bf16 %v2416_v6, %v2415_v5  ;;  %v11800_v5 = vld [vmem:[%s15216_s1 + $0x1e0] sm:$0xff]   ;;  %v1304_v6 = vld [vmem:[#allocation2 + $0xaa] sm:$0xff] }
 0x1d8   : > { %9388 = vmatprep.mubr.msk.bf16.mxu1 %vm12034_vm0, %v12393_v19 }
 0x1dd   : > { %9789 = vmatmul.mubr.bf16.gmra.mrb[76].mxu0 %v2079_v13  ;;  %v2399_v13 = vld [vmem:[#allocation2 + $0x74] sm:$0xff] }
 0x1de   : > { %9792 = vmatprep.mubr.msk.bf16.mxu0 %vm12034_vm0, %v12393_v19  ;;  %v12647_v20 = vpack.c.bf16 %v2400_v14, %v2399_v13  ;;  %v2418_v13 = vld [vmem:[#allocation2 + $0x10c] sm:$0xff] }
 0x1df   : > { %9389 = vmatmul.mubr.bf16.gmra.mrb[76].mxu1 %v768_v26  ;;  %v642_v26 = vld [vmem:[#allocation2 + $0x60] sm:$0xff] }
 0x1e0   : > { %9392 = vmatprep.mubr.msk.bf16.mxu1 %vm12034_vm0, %v12393_v19  ;;  %v677_v30 = vpack.c.bf16 %v643_v27, %v642_v26  ;;  %v2421_v26 = vld [vmem:[#allocation2 + $0x124] sm:$0xff]  ;;  %v2422_v27 = vld [vmem:[#allocation2 + $0x12c] sm:$0xff] }
 0x1e5   : > { %9793 = vmatmul.mubr.bf16.gmra.mrb[80].mxu0 %v2080_v21  ;;  %v640_v21 = vld [vmem:[#allocation2 + $0x50] sm:$0xff] }
 0x1e6   : > { %9812 = vmatprep.mubr.msk.bf16.mxu0 %vm12034_vm0, %v12393_v19  ;;  %v676_v24 = vpack.c.bf16 %v641_v22, %v640_v21  ;;  %v2420_v21 = vld [vmem:[#allocation2 + $0x11c] sm:$0xff] }
 0x1e7   : > { %9393 = vmatmul.mubr.bf16.gmra.mrb[80].mxu1 %v769_v35  ;;  %v2406_v35 = vld [vmem:[#allocation2 + $0xac] sm:$0xff] }
 0x1e8   : > { %9412 = vmatprep.mubr.msk.bf16.mxu1 %vm12034_vm0, %v12393_v19 }
 0x1ed   : > { %9813 = vmatmul.mubr.bf16.vlgmr.msra.gmra.mrb[0].mxu0 %v2428_v28  ;;  %v2403_v28 = vld [vmem:[#allocation2 + $0x94] sm:$0xff] }
 0x1ee   : > { %9897 = vmatpush3.bf16.msra.mxu0 %v11780_v29  ;;  %9816 = vmatprep.mubr.msk.bf16.mxu0 %vm12034_vm0, %v12393_v19  ;;  %v2404_v29 = vld [vmem:[#allocation2 + $0x9c] sm:$0xff] }
 0x1ef   : > { %9898 = vmatprep.subr.bf16.mxu0 %v12393_v19  ;;  %9413 = vmatmul.mubr.bf16.vlgmr.msra.gmra.mrb[0].mxu1 %v671_v45  ;;  %v12661_v31 = vpack.c.bf16 %v2404_v29, %v2403_v28  ;;  %v648_v45 = vld [vmem:[#allocation2 + $0x90] sm:$0xff]  ;;  %v12724_v29 = vpack.c.bf16 %v2422_v27, %v2421_v26  ;;  %v1314_v26 = vld [vmem:[#allocation2 + $0xfa] sm:$0xff] }
 0x1f0   : > { %9416 = vmatprep.mubr.msk.bf16.mxu1 %vm12034_vm0, %v12393_v19  ;;  %10672 = vmatpush3.bf16.msra.mxu1 %v11885_v49  ;;  %v2409_v49 = vld [vmem:[#allocation2 + $0xc4] sm:$0xff] }
 0x1f1   : > { %10665 = vmatprep.subr.bf16.mxu1 %v12393_v19  ;;  %v12682_v52 = vpack.c.bf16 %v2410_v50, %v2409_v49  ;;  %v667_v49 = vld [vmem:[#allocation2 + $0x128] sm:$0xff]  ;;  %v2427_v50 = vld [vmem:[#allocation2 + $0x154] sm:$0xf] }
 0x1f2   : > { %9899 = vmatpush3.bf16.msra.mxu0 %v11781_v34  ;;  %v2405_v34 = vld [vmem:[#allocation2 + $0xa4] sm:$0xff] }
 0x1f3   : > { %9900 = vmatprep.subr.bf16.mxu0 %v12393_v19 }
 0x1f4   : > { %10673 = vmatpush3.bf16.msra.mxu1 %v11886_v56  ;;  %v2412_v56 = vld [vmem:[#allocation2 + $0xdc] sm:$0xff] }
 0x1f5   : > { %9817 = vmatmul.mubr.bf16.gmra.mrb[4].mxu0 %v12551_v37  ;;  %10666 = vmatprep.subr.bf16.mxu1 %v12393_v19 }
 0x1f6   : > { %9820 = vmatprep.mubr.msk.bf16.mxu0 %vm12034_vm0, %v12393_v19  ;;  %9901 = vmatpush3.bf16.msra.mxu0 %v11782_v38  ;;  %v12668_v38 = vpack.c.bf16 %v2406_v35, %v2405_v34  ;;  %v2424_v34 = vld [vmem:[#allocation2 + $0x13c] sm:$0xff] }
 0x1f7   : > { %9902 = vmatprep.subr.bf16.mxu0 %v12393_v19  ;;  %9417 = vmatmul.mubr.bf16.gmra.mrb[4].mxu1 %v672_v55  ;;  %v2411_v55 = vld [vmem:[#allocation2 + $0xd4] sm:$0xff] }
 0x1f8   : > { %9420 = vmatprep.mubr.msk.bf16.mxu1 %vm12034_vm0, %v12393_v19  ;;  %10674 = vmatpush3.bf16.msra.mxu1 %v11887_v59  ;;  %v12689_v59 = vpack.c.bf16 %v2412_v56, %v2411_v55  ;;  %v669_v55 = vld [vmem:[#allocation2 + $0x138] sm:$0xff] }
 0x1f9   : > { %10667 = vmatprep.subr.bf16.mxu1 %v12393_v19 }
 0x1fa   : > { %9903 = vmatpush3.bf16.msra.mxu0 %v11783_v44  ;;  %v12675_v44 = vpack.c.bf16 %v2408_v42, %v2407_v41  ;;  %v2425_v41 = vld [vmem:[#allocation2 + $0x144] sm:$0xff]  ;;  %v2426_v42 = vld [vmem:[#allocation2 + $0x14c] sm:$0xff] }
 0x1fb   : > { %9904 = vmatprep.subr.bf16.mxu0 %v12393_v19 }
 0x1fc   : > { %10675 = vmatpush3.bf16.msra.mxu1 %v11888_v2  ;;  %v654_v2 = vld [vmem:[#allocation2 + $0xc0] sm:$0xff] }
 0x1fd   : > { %9821 = vmatmul.mubr.bf16.gmra.mrb[8].mxu0 %v12571_v47  ;;  %10668 = vmatprep.subr.bf16.mxu1 %v12393_v19 }
 0x1fe   : > { %9824 = vmatprep.mubr.msk.bf16.mxu0 %vm12034_vm0, %v12393_v19  ;;  %9905 = vmatpush3.bf16.msra.mxu0 %v11784_v48  ;;  %v649_v48 = vld [vmem:[#allocation2 + $0x98] sm:$0xff] }
 0x1ff   : > { %9906 = vmatprep.subr.bf16.mxu0 %v12393_v19  ;;  %9421 = vmatmul.mubr.bf16.gmra.mrb[8].mxu1 %v673_v1  ;;  %v680_v51 = vpack.c.bf16 %v649_v48, %v648_v45  ;;  %v12696_v1 = vpack.c.bf16 %v2414_v63, %v2413_v62  ;;  %v12738_v45 = vpack.c.bf16 %v2426_v42, %v2425_v41  ;;  %v666_v48 = vld [vmem:[#allocation2 + $0x120] sm:$0xff]  ;;  %v11798_v63 = vld [vmem:[%s15216_s1 + $0x1d0] sm:$0xff]  }
 0x200   : > { %9424 = vmatprep.mubr.msk.bf16.mxu1 %vm12034_vm0, %v12393_v19  ;;  %10676 = vmatpush3.bf16.msra.mxu1 %v11889_v4  ;;  %v655_v4 = vld [vmem:[#allocation2 + $0xc8] sm:$0xff] }
 0x201   : > { %10669 = vmatprep.subr.bf16.mxu1 %v12393_v19  ;;  %v683_v7 = vpack.c.bf16 %v655_v4, %v654_v2  ;;  %v1302_v2 = vld [vmem:[#allocation2 + $0x9a] sm:$0xff] }
 0x202   : > { %9907 = vmatpush3.bf16.msra.mxu0 %v11785_v54  ;;  %v651_v54 = vld [vmem:[#allocation2 + $0xa8] sm:$0xff] }
 0x203   : > { %9908 = vmatprep.subr.bf16.mxu0 %v12393_v19 }
 0x204   : > { %10677 = vmatpush3.bf16.msra.mxu1 %v11890_v10  ;;  %v657_v10 = vld [vmem:[#allocation2 + $0xd8] sm:$0xff] }
 0x205   : > { %9825 = vmatmul.mubr.bf16.gmra.mrb[12].mxu0 %v12593_v57  ;;  %10670 = vmatprep.subr.bf16.mxu1 %v12393_v19 }
 0x206   : > { %9828 = vmatprep.mubr.msk.bf16.mxu0 %vm12034_vm0, %v12393_v19  ;;  %9909 = vmatpush3.bf16.msra.mxu0 %v11791_v58  ;;  %v681_v58 = vpack.c.bf16 %v651_v54, %v650_v53  ;;  %v2448_v53 = vpack.c.bf16 %v2427_v50, %v2427_v50  ;;  %v668_v54 = vld [vmem:[#allocation2 + $0x130] sm:$0xff] }
 0x207   : > { %9910 = vmatprep.subr.bf16.mxu0 %v12393_v19  ;;  %9425 = vmatmul.mubr.bf16.gmra.mrb[12].mxu1 %v674_v9  ;;  %v656_v9 = vld [vmem:[#allocation2 + $0xd0] sm:$0xff]  ;;  %v690_v56 = vpack.c.bf16 %v669_v55, %v668_v54  ;;  %v11804_v55 = vld [vmem:[%s15216_s1 + $0x200] sm:$0xff]  }
 0x208   : > { %9428 = vmatprep.mubr.msk.bf16.mxu1 %vm12034_vm0, %v12393_v19  ;;  %10678 = vmatpush3.bf16.msra.mxu1 %v11891_v12  ;;  %v2417_v12 = vld [vmem:[#allocation2 + $0x104] sm:$0xff]  ;;  %v684_v14 = vpack.c.bf16 %v657_v10, %v656_v9  ;;  %v11802_v10 = vld [vmem:[%s15216_s1 + $0x1f0] sm:$0xff]  }
 0x209   : > { %10671 = vmatprep.subr.bf16.mxu1 %v12393_v19  ;;  %v12710_v15 = vpack.c.bf16 %v2418_v13, %v2417_v12  ;;  %v1306_v12 = vld [vmem:[#allocation2 + $0xba] sm:$0xff] }
 0x20a   : > { %9911 = vmatpush3.bf16.msra.mxu0 %v11795_v0  ;;  %v682_v0 = vpack.c.bf16 %v653_v61, %v652_v60  ;;  %v670_v60 = vld [vmem:[#allocation2 + $0x140] sm:$0xf]  ;;  %v11797_v61 = vld [vmem:[%s15216_s1 + $0x1c8] sm:$0xff]   ;;  %v11803_v13 = vld [vmem:[%s15216_s1 + $0x1f8] sm:$0xff]  }
 0x20b   : > { %9996 = vmatprep.subr.bf16.mxu0 %v12393_v19  ;;  %v691_v62 = vpack.c.bf16 %v670_v60, %v670_v60  ;;  %v3126_v60 = vld [vmem:[#allocation2 + $0x3d] sm:$0xff] }
 0x20c   : > { %10679 = vmatpush3.bf16.msra.mxu1 %v11892_v18  ;;  %v2419_v18 = vld [vmem:[#allocation2 + $0x114] sm:$0xff] }
 0x20d   : > { %9829 = vmatmul.mubr.bf16.gmra.mrb[16].mxu0 %v12616_v3  ;;  %v12717_v46 = vpack.c.bf16 %v2420_v21, %v2419_v18  ;;  %v1309_v18 = vld [vmem:[#allocation2 + $0xd2] sm:$0xff]  ;;  %v1310_v21 = vld [vmem:[#allocation2 + $0xda] sm:$0xff] }
 0x20e   : > { %9832 = vmatprep.mubr.msk.bf16.mxu0 %vm12034_vm0, %v12393_v19 }
 0x20f   : > { %9429 = vmatmul.mubr.bf16.gmra.mrb[16].mxu1 %v675_v17  ;;  %v659_v17 = vld [vmem:[#allocation2 + $0xe8] sm:$0xff] }
 0x210   : > { %9432 = vmatprep.mubr.msk.bf16.mxu1 %vm12034_vm0, %v12393_v19  ;;  %v685_v22 = vpack.c.bf16 %v659_v17, %v658_v16  ;;  %v1308_v16 = vld [vmem:[#allocation2 + $0xca] sm:$0xff] }
 0x215   : > { %9833 = vmatmul.mubr.bf16.gmra.mrb[20].mxu0 %v12632_v11 }
 0x216   : > { %9836 = vmatprep.mubr.msk.bf16.mxu0 %vm12034_vm0, %v12393_v19 }
 0x217   : > { %9433 = vmatmul.mubr.bf16.gmra.mrb[20].mxu1 %v676_v24  ;;  %v661_v24 = vld [vmem:[#allocation2 + $0xf8] sm:$0xff] }
 0x218   : > { %9436 = vmatprep.mubr.msk.bf16.mxu1 %vm12034_vm0, %v12393_v19  ;;  %v686_v28 = vpack.c.bf16 %v661_v24, %v660_v23  ;;  %v1312_v23 = vld [vmem:[#allocation2 + $0xea] sm:$0xff] }
 0x21d   : > { %9837 = vmatmul.mubr.bf16.gmra.mrb[24].mxu0 %v12647_v20 }
 0x21e   : > { %9840 = vmatprep.mubr.msk.bf16.mxu0 %vm12034_vm0, %v12393_v19 }
 0x21f   : > { %9437 = vmatmul.mubr.bf16.gmra.mrb[24].mxu1 %v677_v30  ;;  %v662_v30 = vld [vmem:[#allocation2 + $0x100] sm:$0xff] }
 0x220   : > { %9440 = vmatprep.mubr.msk.bf16.mxu1 %vm12034_vm0, %v12393_v19  ;;  %v687_v35 = vpack.c.bf16 %v663_v32, %v662_v30  ;;  %v1318_v32 = vld [vmem:[#allocation2 + $0x11a] sm:$0xff] }
 0x225   : > { %9841 = vmatmul.mubr.bf16.gmra.mrb[28].mxu0 %v12654_v25 }
 0x226   : > { %9844 = vmatprep.mubr.msk.bf16.mxu0 %vm12034_vm0, %v12393_v19 }
 0x227   : > { %9441 = vmatmul.mubr.bf16.gmra.mrb[28].mxu1 %v678_v36  ;;  %v12731_v36 = vpack.c.bf16 %v2424_v34, %v2423_v33  ;;  %v1320_v34 = vld [vmem:[#allocation2 + $0x12a] sm:$0xff] }
 0x228   : > { %9444 = vmatprep.mubr.msk.bf16.mxu1 %vm12034_vm0, %v12393_v19 }
 0x22d   : > { %9845 = vmatmul.mubr.bf16.gmra.mrb[32].mxu0 %v12661_v31 }
 0x22e   : > { %9848 = vmatprep.mubr.msk.bf16.mxu0 %vm12034_vm0, %v12393_v19 }
 0x22f   : > { %9445 = vmatmul.mubr.bf16.gmra.mrb[32].mxu1 %v679_v43  ;;  %v688_v43 = vpack.c.bf16 %v665_v40, %v664_v39  ;;  %v1322_v39 = vld [vmem:[#allocation2 + $0x13a] sm:$0xff] }
 0x230   : > { %9448 = vmatprep.mubr.msk.bf16.mxu1 %vm12034_vm0, %v12393_v19 }
 0x235   : > { %9849 = vmatmul.mubr.bf16.gmra.mrb[36].mxu0 %v12668_v38 }
 0x236   : > { %9852 = vmatprep.mubr.msk.bf16.mxu0 %vm12034_vm0, %v12393_v19 }
 0x237   : > { %9449 = vmatmul.mubr.bf16.gmra.mrb[36].mxu1 %v680_v51  ;;  %v689_v51 = vpack.c.bf16 %v667_v49, %v666_v48  ;;  %v3123_v48 = vld [vmem:[#allocation2 + $0x25] sm:$0xff]  ;;  %v3124_v49 = vld [vmem:[#allocation2 + $0x2d] sm:$0xff] }
 0x238   : > { %9452 = vmatprep.mubr.msk.bf16.mxu1 %vm12034_vm0, %v12393_v19  ;;  %v3164_v54 = vpack.c.bf16 %v3124_v49, %v3123_v48 }
 0x23d   : > { %9853 = vmatmul.mubr.bf16.gmra.mrb[40].mxu0 %v12675_v44 }
 0x23e   : > { %9856 = vmatprep.mubr.msk.bf16.mxu0 %vm12034_vm0, %v12393_v19 }
 0x23f   : > { %9453 = vmatmul.mubr.bf16.gmra.mrb[40].mxu1 %v681_v58  ;;  %v11796_v58 = vld [vmem:[%s15216_s1 + $0x1c0] sm:$0xff]  }
 0x240   : > { %9456 = vmatprep.mubr.msk.bf16.mxu1 %vm12034_vm0, %v12393_v19 }
 0x245   : > { %9857 = vmatmul.mubr.bf16.gmra.mrb[44].mxu0 %v12682_v52 }
 0x246   : > { %9860 = vmatprep.mubr.msk.bf16.mxu0 %vm12034_vm0, %v12393_v19 }
 0x247   : > { %9457 = vmatmul.mubr.bf16.gmra.mrb[44].mxu1 %v682_v0  ;;  %v12764_v0 = vld [vmem:[#allocation3 + $0x14c] sm:$0xff] }
 0x248   : > { %9460 = vmatprep.mubr.msk.bf16.mxu1 %vm12034_vm0, %v12393_v19 }
 0x24d   : > { %9861 = vmatmul.mubr.bf16.gmra.mrb[48].mxu0 %v12689_v59 }
 0x24e   : > { %9864 = vmatprep.mubr.msk.bf16.mxu0 %vm12034_vm0, %v12393_v19 }
 0x24f   : > { %9461 = vmatmul.mubr.bf16.gmra.mrb[48].mxu1 %v683_v7  ;;  %v11801_v7 = vld [vmem:[%s15216_s1 + $0x1e8] sm:$0xff]  }
 0x250   : > { %9464 = vmatprep.mubr.msk.bf16.mxu1 %vm12034_vm0, %v12393_v19 }
 0x255   : > { %9865 = vmatmul.mubr.bf16.gmra.mrb[52].mxu0 %v12696_v1 }
 0x256   : > { %9868 = vmatprep.mubr.msk.bf16.mxu0 %vm12034_vm0, %v12393_v19 }
 0x257   : > { %9465 = vmatmul.mubr.bf16.gmra.mrb[52].mxu1 %v684_v14 }
 0x258   : > { %9468 = vmatprep.mubr.msk.bf16.mxu1 %vm12034_vm0, %v12393_v19 }
 0x25d   : > { %9869 = vmatmul.mubr.bf16.gmra.mrb[56].mxu0 %v12703_v8 }
 0x25e   : > { %9872 = vmatprep.mubr.msk.bf16.mxu0 %vm12034_vm0, %v12393_v19 }
 0x25f   : > { %9469 = vmatmul.mubr.bf16.gmra.mrb[56].mxu1 %v685_v22  ;;  %v1337_v22 = vpack.c.bf16 %v1310_v21, %v1309_v18 }
 0x260   : > { %9472 = vmatprep.mubr.msk.bf16.mxu1 %vm12034_vm0, %v12393_v19 }
 0x265   : > { %9873 = vmatmul.mubr.bf16.gmra.mrb[60].mxu0 %v12710_v15 }
 0x266   : > { %9876 = vmatprep.mubr.msk.bf16.mxu0 %vm12034_vm0, %v12393_v19 }
 0x267   : > { %9473 = vmatmul.mubr.bf16.gmra.mrb[60].mxu1 %v686_v28  ;;  %v1316_v28 = vld [vmem:[#allocation2 + $0x10a] sm:$0xff] }
 0x268   : > { %9476 = vmatprep.mubr.msk.bf16.mxu1 %vm12034_vm0, %v12393_v19 }
 0x26d   : > { %9877 = vmatmul.mubr.bf16.gmra.mrb[64].mxu0 %v12717_v46 }
 0x26e   : > { %9880 = vmatprep.mubr.msk.bf16.mxu0 %vm12034_vm0, %v12393_v19 }
 0x26f   : > { %9477 = vmatmul.mubr.bf16.gmra.mrb[64].mxu1 %v687_v35 }
 0x270   : > { %9480 = vmatprep.mubr.msk.bf16.mxu1 %vm12034_vm0, %v12393_v19 }
 0x275   : > { %9881 = vmatmul.mubr.bf16.gmra.mrb[68].mxu0 %v12724_v29 }
 0x276   : > { %9884 = vmatprep.mubr.msk.bf16.mxu0 %vm12034_vm0, %v12393_v19 }
 0x277   : > { %9481 = vmatmul.mubr.bf16.gmra.mrb[68].mxu1 %v688_v43 }
 0x278   : > { %9484 = vmatprep.mubr.msk.bf16.mxu1 %vm12034_vm0, %v12393_v19 }
 0x27d   : > { %9885 = vmatmul.mubr.bf16.gmra.mrb[72].mxu0 %v12731_v36 }
 0x27e   : > { %9888 = vmatprep.mubr.msk.bf16.mxu0 %vm12034_vm0, %v12393_v19 }
 0x27f   : > { %9485 = vmatmul.mubr.bf16.gmra.mrb[72].mxu1 %v689_v51 }
 0x280   : > { %9488 = vmatprep.mubr.msk.bf16.mxu1 %vm12034_vm0, %v12393_v19 }
 0x285   : > { %9889 = vmatmul.mubr.bf16.gmra.mrb[76].mxu0 %v12738_v45 }
 0x286   : > { %9892 = vmatprep.mubr.msk.bf16.mxu0 %vm12034_vm0, %v12393_v19 }
 0x287   : > { %9489 = vmatmul.mubr.bf16.gmra.mrb[76].mxu1 %v690_v56 }
 0x288   : > { %9492 = vmatprep.mubr.msk.bf16.mxu1 %vm12034_vm0, %v12393_v19 }
 0x28d   : > { %9893 = vmatmul.mubr.bf16.gmra.mrb[80].mxu0 %v2448_v53 }
 0x28e   : > { %9912 = vmatprep.mubr.msk.bf16.mxu0 %vm12034_vm0, %v12393_v19 }
 0x28f   : > { %9493 = vmatmul.mubr.bf16.gmra.mrb[80].mxu1 %v691_v62 }
 0x290   : > { %9548 = vmatprep.mubr.msk.bf16.mxu1 %vm12034_vm0, %v12764_v0 }
 0x295   : > { %9913 = vmatmul.mubr.bf16.vlgmr.msra.gmra.mrb[0].mxu0 %v12551_v37  ;;  %v1301_v37 = vld [vmem:[#allocation2 + $0x92] sm:$0xff] }
 0x296   : > { %9997 = vmatpush3.bf16.msra.mxu0 %v11796_v58  ;;  %9916 = vmatprep.mubr.msk.bf16.mxu0 %vm12034_vm0, %v12393_v19  ;;  %v1333_v4 = vpack.c.bf16 %v1302_v2, %v1301_v37  ;;  %v3125_v58 = vld [vmem:[#allocation2 + $0x35] sm:$0xff] }
 0x297   : > { %9998 = vmatprep.subr.bf16.mxu0 %v12393_v19  ;;  %v11799_v19 = vld [vmem:[%s15216_s1 + $0x1d8] sm:$0xff]   ;;  %v3165_v2 = vpack.c.bf16 %v3126_v60, %v3125_v58 }
 0x298   : > { %9549 = vmatmul.mubr.bf16.vlgmr.msra.gmra.mrb[36].mxu1 %v1333_v4 }
 0x299   : > { %9552 = vmatprep.mubr.msk.bf16.mxu1 %vm12034_vm0, %v12764_v0 }
 0x29a   : > { %9999 = vmatpush3.bf16.msra.mxu0 %v11797_v61  ;;  %v11805_v61 = vld [vmem:[%s15216_s1 + $0x208] sm:$0xff]  }
 0x29b   : > { %10000 = vmatprep.subr.bf16.mxu0 %v12764_v0 }
 0x29d   : > { %9917 = vmatmul.mubr.bf16.gmra.mrb[4].mxu0 %v12571_v47  ;;  %v1303_v47 = vld [vmem:[#allocation2 + $0xa2] sm:$0xff] }
 0x29e   : > { %9920 = vmatprep.mubr.msk.bf16.mxu0 %vm12034_vm0, %v12764_v0  ;;  %10001 = vmatpush3.bf16.msra.mxu0 %v11798_v63  ;;  %v1334_v9 = vpack.c.bf16 %v1304_v6, %v1303_v47  ;;  %v3128_v47 = vld [vmem:[#allocation2 + $0x4d] sm:$0xff]  ;;  %v11807_v6 = vld [vmem:[%s15216_s1 + $0x218] sm:$0xff]  }
 0x29f   : > { %10002 = vmatprep.subr.bf16.mxu0 %v12764_v0 }
 0x2a0   : > { %9553 = vmatmul.mubr.bf16.gmra.mrb[40].mxu1 %v1334_v9 }
 0x2a1   : > { %9556 = vmatprep.mubr.msk.bf16.mxu1 %vm12034_vm0, %v12764_v0 }
 0x2a2   : > { %10003 = vmatpush3.bf16.msra.mxu0 %v11799_v19  ;;  %v11806_v19 = vld [vmem:[%s15216_s1 + $0x210] sm:$0xff]  }
 0x2a3   : > { %10004 = vmatprep.subr.bf16.mxu0 %v12764_v0 }
 0x2a5   : > { %9921 = vmatmul.mubr.bf16.gmra.mrb[8].mxu0 %v12593_v57  ;;  %v1305_v57 = vld [vmem:[#allocation2 + $0xb2] sm:$0xff] }
 0x2a6   : > { %9924 = vmatprep.mubr.msk.bf16.mxu0 %vm12034_vm0, %v12764_v0  ;;  %10005 = vmatpush3.bf16.msra.mxu0 %v11800_v5  ;;  %v1335_v14 = vpack.c.bf16 %v1306_v12, %v1305_v57  ;;  %v3127_v5 = vld [vmem:[#allocation2 + $0x45] sm:$0xff] }
 0x2a7   : > { %10006 = vmatprep.subr.bf16.mxu0 %v12764_v0  ;;  %v3166_v57 = vpack.c.bf16 %v3128_v47, %v3127_v5  ;;  %v11808_v12 = vld [vmem:[%s15216_s1 + $0x220] sm:$0xff]  }
 0x2a8   : > { %9557 = vmatmul.mubr.bf16.gmra.mrb[44].mxu1 %v1335_v14  ;;  %v3129_v14 = vld [vmem:[#allocation2 + $0x55] sm:$0xff] }
 0x2a9   : > { %9560 = vmatprep.mubr.msk.bf16.mxu1 %vm12034_vm0, %v12764_v0 }
 0x2aa   : > { %10007 = vmatpush3.bf16.msra.mxu0 %v11801_v7 }
 0x2ab   : > { %10008 = vmatprep.subr.bf16.mxu0 %v12764_v0 }
 0x2ad   : > { %9925 = vmatmul.mubr.bf16.gmra.mrb[12].mxu0 %v12616_v3  ;;  %v1307_v3 = vld [vmem:[#allocation2 + $0xc2] sm:$0xff] }
 0x2ae   : > { %9928 = vmatprep.mubr.msk.bf16.mxu0 %vm12034_vm0, %v12764_v0  ;;  %10009 = vmatpush3.bf16.msra.mxu0 %v11802_v10  ;;  %v1336_v17 = vpack.c.bf16 %v1308_v16, %v1307_v3  ;;  %v3130_v3 = vld [vmem:[#allocation2 + $0x5d] sm:$0xff]  ;;  %v11809_v16 = vld [vmem:[%s15216_s1 + $0x228] sm:$0xff]  }
 0x2af   : > { %10010 = vmatprep.subr.bf16.mxu0 %v12764_v0 }
 0x2b0   : > { %9561 = vmatmul.mubr.bf16.gmra.mrb[48].mxu1 %v1336_v17 }
 0x2b1   : > { %9564 = vmatprep.mubr.msk.bf16.mxu1 %vm12034_vm0, %v12764_v0 }
 0x2b2   : > { %10011 = vmatpush3.bf16.msra.mxu0 %v11803_v13 }
 0x2b3   : > { %10096 = vmatprep.subr.bf16.mxu0 %v12764_v0 }
 0x2b5   : > { %9929 = vmatmul.mubr.bf16.gmra.mrb[16].mxu0 %v12632_v11  ;;  %v1311_v11 = vld [vmem:[#allocation2 + $0xe2] sm:$0xff] }
 0x2b6   : > { %9932 = vmatprep.mubr.msk.bf16.mxu0 %vm12034_vm0, %v12764_v0  ;;  %v1338_v24 = vpack.c.bf16 %v1312_v23, %v1311_v11  ;;  %v11810_v11 = vld [vmem:[%s15216_s1 + $0x230] sm:$0xff]  }
 0x2b8   : > { %9565 = vmatmul.mubr.bf16.gmra.mrb[52].mxu1 %v1337_v22  ;;  %v3167_v22 = vpack.c.bf16 %v3130_v3, %v3129_v14 }
 0x2b9   : > { %9568 = vmatprep.mubr.msk.bf16.mxu1 %vm12034_vm0, %v12764_v0 }
 0x2bd   : > { %9933 = vmatmul.mubr.bf16.gmra.mrb[20].mxu0 %v12647_v20  ;;  %v1313_v20 = vld [vmem:[#allocation2 + $0xf2] sm:$0xff] }
 0x2be   : > { %9936 = vmatprep.mubr.msk.bf16.mxu0 %vm12034_vm0, %v12764_v0  ;;  %v1339_v27 = vpack.c.bf16 %v1314_v26, %v1313_v20  ;;  %v3132_v20 = vld [vmem:[#allocation2 + $0x6d] sm:$0xff]  ;;  %v11811_v26 = vld [vmem:[%s15216_s1 + $0x238] sm:$0xff]  }
 0x2c0   : > { %9569 = vmatmul.mubr.bf16.gmra.mrb[56].mxu1 %v1338_v24  ;;  %v3131_v24 = vld [vmem:[#allocation2 + $0x65] sm:$0xff] }
 0x2c1   : > { %9572 = vmatprep.mubr.msk.bf16.mxu1 %vm12034_vm0, %v12764_v0 }
 0x2c5   : > { %9937 = vmatmul.mubr.bf16.gmra.mrb[24].mxu0 %v12654_v25  ;;  %v1315_v25 = vld [vmem:[#allocation2 + $0x102] sm:$0xff] }
 0x2c6   : > { %9940 = vmatprep.mubr.msk.bf16.mxu0 %vm12034_vm0, %v12764_v0  ;;  %v1340_v30 = vpack.c.bf16 %v1316_v28, %v1315_v25 }
 0x2c8   : > { %9573 = vmatmul.mubr.bf16.gmra.mrb[60].mxu1 %v1339_v27 }
 0x2c9   : > { %9576 = vmatprep.mubr.msk.bf16.mxu1 %vm12034_vm0, %v12764_v0 }
 0x2cd   : > { %9941 = vmatmul.mubr.bf16.gmra.mrb[28].mxu0 %v12661_v31  ;;  %v1317_v31 = vld [vmem:[#allocation2 + $0x112] sm:$0xff] }
 0x2ce   : > { %9944 = vmatprep.mubr.msk.bf16.mxu0 %vm12034_vm0, %v12764_v0  ;;  %v1341_v33 = vpack.c.bf16 %v1318_v32, %v1317_v31  ;;  %v3133_v32 = vld [vmem:[#allocation2 + $0x75] sm:$0xff] }
 0x2d0   : > { %9577 = vmatmul.mubr.bf16.gmra.mrb[64].mxu1 %v1340_v30  ;;  %v3168_v30 = vpack.c.bf16 %v3132_v20, %v3131_v24 }
 0x2d1   : > { %9580 = vmatprep.mubr.msk.bf16.mxu1 %vm12034_vm0, %v12764_v0 }
 0x2d5   : > { %9945 = vmatmul.mubr.bf16.gmra.mrb[32].mxu0 %v12668_v38  ;;  %v1319_v38 = vld [vmem:[#allocation2 + $0x122] sm:$0xff] }
 0x2d6   : > { %9948 = vmatprep.mubr.msk.bf16.mxu0 %vm12034_vm0, %v12764_v0  ;;  %v1342_v35 = vpack.c.bf16 %v1320_v34, %v1319_v38 }
 0x2d8   : > { %9581 = vmatmul.mubr.bf16.gmra.mrb[68].mxu1 %v1341_v33  ;;  %v3134_v33 = vld [vmem:[#allocation2 + $0x7d] sm:$0xff] }
 0x2d9   : > { %9584 = vmatprep.mubr.msk.bf16.mxu1 %vm12034_vm0, %v12764_v0 }
 0x2dd   : > { %9949 = vmatmul.mubr.bf16.gmra.mrb[36].mxu0 %v12675_v44  ;;  %v1321_v44 = vld [vmem:[#allocation2 + $0x132] sm:$0xff] }
 0x2de   : > { %9952 = vmatprep.mubr.msk.bf16.mxu0 %vm12034_vm0, %v12764_v0  ;;  %v1343_v40 = vpack.c.bf16 %v1322_v39, %v1321_v44  ;;  %v3169_v44 = vpack.c.bf16 %v3134_v33, %v3133_v32  ;;  %v3148_v32 = vld [vmem:[#allocation2 + $0xed] sm:$0xff] }
 0x2e0   : > { %9585 = vmatmul.mubr.bf16.gmra.mrb[72].mxu1 %v1342_v35 }
 0x2e1   : > { %9588 = vmatprep.mubr.msk.bf16.mxu1 %vm12034_vm0, %v12764_v0 }
 0x2e5   : > { %9953 = vmatmul.mubr.bf16.gmra.mrb[40].mxu0 %v12682_v52  ;;  %v1323_v52 = vld [vmem:[#allocation2 + $0x142] sm:$0xf] }
 0x2e6   : > { %9956 = vmatprep.mubr.msk.bf16.mxu0 %vm12034_vm0, %v12764_v0  ;;  %v1344_v41 = vpack.c.bf16 %v1323_v52, %v1323_v52  ;;  %v3136_v52 = vld [vmem:[#allocation2 + $0x8d] sm:$0xff] }
 0x2e8   : > { %9589 = vmatmul.mubr.bf16.gmra.mrb[76].mxu1 %v1343_v40  ;;  %v3135_v40 = vld [vmem:[#allocation2 + $0x85] sm:$0xff] }
 0x2e9   : > { %9592 = vmatprep.mubr.msk.bf16.mxu1 %vm12034_vm0, %v12764_v0 }
 0x2ed   : > { %9957 = vmatmul.mubr.bf16.gmra.mrb[44].mxu0 %v12689_v59  ;;  %v2793_v59 = vld [vmem:[#allocation2 + $0x154] sm:$0xff] }
 0x2ee   : > { %9960 = vmatprep.mubr.msk.bf16.mxu0 %vm12034_vm0, %v12764_v0 }
 0x2f0   : > { %9593 = vmatmul.mubr.bf16.gmra.mrb[80].mxu1 %v1344_v41 }
 0x2f5   : > { %9961 = vmatmul.mubr.bf16.gmra.mrb[48].mxu0 %v12696_v1  ;;  %v2794_v1 = vld [vmem:[#allocation2 + $0x15c] sm:$0xff] }
 0x2f6   : > { %9964 = vmatprep.mubr.msk.bf16.mxu0 %vm12034_vm0, %v12764_v0 }
 0x2fd   : > { %9965 = vmatmul.mubr.bf16.gmra.mrb[52].mxu0 %v12703_v8  ;;  %v2815_v8 = vpack.c.bf16 %v2794_v1, %v2793_v59 }
 0x2fe   : > { %9968 = vmatprep.mubr.msk.bf16.mxu0 %vm12034_vm0, %v12764_v0 }
 0x305   : > { %9969 = vmatmul.mubr.bf16.gmra.mrb[56].mxu0 %v12710_v15  ;;  %v12866_v15 = vpop.f32.mrb[0].mxu1 }
 0x306   : > { %9972 = vmatprep.mubr.msk.bf16.mxu0 %vm12034_vm0, %v12764_v0 }
 0x30d   : > { %9973 = vmatmul.mubr.bf16.gmra.mrb[60].mxu0 %v12717_v46  ;;  %v2795_v46 = vld [vmem:[#allocation2 + $0x164] sm:$0xf] }
 0x30e   : > { %9976 = vmatprep.mubr.msk.bf16.mxu0 %vm12034_vm0, %v12764_v0  ;;  %v2816_v43 = vpack.c.bf16 %v2795_v46, %v2795_v46 }
 0x315   : > { %9977 = vmatmul.mubr.bf16.gmra.mrb[64].mxu0 %v12724_v29  ;;  %v9414_v29 = vpop.f32.mrb[1].mxu1 }
 0x316   : > { %9980 = vmatprep.mubr.msk.bf16.mxu0 %vm12034_vm0, %v12764_v0  ;;  %v3137_v29 = vld [vmem:[#allocation2 + $0x95] sm:$0xff] }
 0x31d   : > { %9981 = vmatmul.mubr.bf16.gmra.mrb[68].mxu0 %v12731_v36  ;;  %v12870_v36 = vpop.f32.mrb[2].mxu1 }
 0x31e   : > { %9984 = vmatprep.mubr.msk.bf16.mxu0 %vm12034_vm0, %v12764_v0  ;;  %v9415_v42 = vpop.f32.mrb[3].mxu1 }
 0x31f   : > { %v3138_v42 = vld [vmem:[#allocation2 + $0x9d] sm:$0xff] }
 0x325   : > { %9985 = vmatmul.mubr.bf16.gmra.mrb[72].mxu0 %v12738_v45  ;;  %v12872_v45 = vpop.f32.mrb[4].mxu1 }
 0x326   : > { %9988 = vmatprep.mubr.msk.bf16.mxu0 %vm12034_vm0, %v12764_v0  ;;  %v9418_v50 = vpop.f32.mrb[5].mxu1 }
 0x327   : > { %v12876_v51 = vpop.f32.mrb[6].mxu1  ;;  %v3171_v50 = vpack.c.bf16 %v3138_v42, %v3137_v29 }
 0x328   : > { %v9419_v53 = vpop.f32.mrb[7].mxu1 }
 0x329   : > { %v12881_v56 = vpop.f32.mrb[8].mxu1 }
 0x32a   : > { %v9422_v62 = vpop.f32.mrb[9].mxu1 }
 0x32b   : > { %v12889_v63 = vpop.f32.mrb[10].mxu1 }
 0x32c   : > { %v9423_v37 = vpop.f32.mrb[11].mxu1 }
 0x32d   : > { %9989 = vmatmul.mubr.bf16.gmra.mrb[76].mxu0 %v2815_v8  ;;  %v12895_v4 = vpop.f32.mrb[12].mxu1  ;;  %v3170_v8 = vpack.c.bf16 %v3136_v52, %v3135_v40  ;;  %v3149_v52 = vld [vmem:[#allocation2 + $0xf5] sm:$0xff] }
 0x32e   : > { %9992 = vmatprep.mubr.msk.bf16.mxu0 %vm12034_vm0, %v12764_v0  ;;  %v9426_v7 = vpop.f32.mrb[13].mxu1 }
 0x32f   : > { %v12903_v9 = vpop.f32.mrb[14].mxu1 }
 0x330   : > { %v9427_v10 = vpop.f32.mrb[15].mxu1 }
 0x331   : > { %v12909_v13 = vpop.f32.mrb[16].mxu1 }
 0x332   : > { %v9430_v17 = vpop.f32.mrb[17].mxu1 }
 0x333   : > { %v12917_v18 = vpop.f32.mrb[18].mxu1 }
 0x334   : > { %v9431_v21 = vpop.f32.mrb[19].mxu1 }
 0x335   : > { %9993 = vmatmul.mubr.bf16.gmra.mrb[80].mxu0 %v2816_v43  ;;  %v12923_v23 = vpop.f32.mrb[20].mxu1 }
 0x336   : > { %10012 = vmatprep.mubr.msk.bf16.mxu0 %vm12034_vm0, %v12764_v0  ;;  %v9434_v27 = vpop.f32.mrb[21].mxu1 }
 0x337   : > { %v12931_v25 = vpop.f32.mrb[22].mxu1 }
 0x338   : > { %v9435_v28 = vpop.f32.mrb[23].mxu1 }
 0x339   : > { %v12933_v31 = vpop.f32.mrb[24].mxu1 }
 0x33a   : > { %v9438_v38 = vpop.f32.mrb[25].mxu1 }
 0x33b   : > { %v12937_v34 = vpop.f32.mrb[26].mxu1 }
 0x33c   : > { %v9439_v35 = vpop.f32.mrb[27].mxu1 }
 0x33d   : > { %10013 = vmatmul.mubr.bf16.vlgmr.msra.gmra.mrb[0].mxu0 %v3164_v54  ;;  %v12939_v39 = vpop.f32.mrb[28].mxu1  ;;  %v3139_v54 = vld [vmem:[#allocation2 + $0xa5] sm:$0xff] }
 0x33e   : > { %10097 = vmatpush3.bf16.msra.mxu0 %v11804_v55  ;;  %10016 = vmatprep.mubr.msk.bf16.mxu0 %vm12034_vm0, %v12764_v0  ;;  %v9442_v41 = vpop.f32.mrb[29].mxu1  ;;  %v3140_v55 = vld [vmem:[#allocation2 + $0xad] sm:$0xff] }
 0x33f   : > { %10098 = vmatprep.subr.bf16.mxu0 %v12764_v0  ;;  %v12943_v59 = vpop.f32.mrb[30].mxu1  ;;  %v3172_v62 = vpack.c.bf16 %v3140_v55, %v3139_v54  ;;  %v3150_v41 = vld [vmem:[#allocation2 + $0xfd] sm:$0xff] }
 0x340   : > { %v9443_v1 = vpop.f32.mrb[31].mxu1  ;;  %v3177_v42 = vpack.c.bf16 %v3150_v41, %v3149_v52  ;;  %v3159_v41 = vld [vmem:[#allocation2 + $0x145] sm:$0xff] }
 0x341   : > { %v12945_v46 = vpop.f32.mrb[32].mxu1 }
 0x342   : > { %10099 = vmatpush3.bf16.msra.mxu0 %v11805_v61  ;;  %v9446_v43 = vpop.f32.mrb[33].mxu1 }
 0x343   : > { %10100 = vmatprep.subr.bf16.mxu0 %v12764_v0  ;;  %v12949_v48 = vpop.f32.mrb[34].mxu1 }
 0x344   : > { %v9447_v49 = vpop.f32.mrb[35].mxu1 }
 0x345   : > { %10017 = vmatmul.mubr.bf16.gmra.mrb[4].mxu0 %v3165_v2  ;;  %v3141_v2 = vld [vmem:[#allocation2 + $0xb5] sm:$0xff]  ;;  %v3151_v49 = vld [vmem:[#allocation2 + $0x105] sm:$0xff] }
 0x346   : > { %10020 = vmatprep.mubr.msk.bf16.mxu0 %vm12034_vm0, %v12764_v0  ;;  %10101 = vmatpush3.bf16.msra.mxu0 %v11806_v19  ;;  %v3142_v19 = vld [vmem:[#allocation2 + $0xbd] sm:$0xff] }
 0x347   : > { %10102 = vmatprep.subr.bf16.mxu0 %v12764_v0  ;;  %v3173_v7 = vpack.c.bf16 %v3142_v19, %v3141_v2  ;;  %v3153_v2 = vld [vmem:[#allocation2 + $0x115] sm:$0xff]  ;;  %v3154_v19 = vld [vmem:[#allocation2 + $0x11d] sm:$0xff] }
 0x34a   : > { %10103 = vmatpush3.bf16.msra.mxu0 %v11807_v6 }
 0x34b   : > { %10104 = vmatprep.subr.bf16.mxu0 %v12764_v0 }
 0x34d   : > { %10021 = vmatmul.mubr.bf16.gmra.mrb[8].mxu0 %v3166_v57  ;;  %v3143_v57 = vld [vmem:[#allocation2 + $0xc5] sm:$0xff] }
 0x34e   : > { %10024 = vmatprep.mubr.msk.bf16.mxu0 %vm12034_vm0, %v12764_v0  ;;  %10105 = vmatpush3.bf16.msra.mxu0 %v11808_v12  ;;  %v3144_v12 = vld [vmem:[#allocation2 + $0xcd] sm:$0xff] }
 0x34f   : > { %10106 = vmatprep.subr.bf16.mxu0 %v12764_v0  ;;  %v3174_v17 = vpack.c.bf16 %v3144_v12, %v3143_v57  ;;  %v3179_v57 = vpack.c.bf16 %v3154_v19, %v3153_v2 }
 0x352   : > { %10107 = vmatpush3.bf16.msra.mxu0 %v11809_v16 }
 0x353   : > { %10108 = vmatprep.subr.bf16.mxu0 %v12764_v0 }
 0x355   : > { %10025 = vmatmul.mubr.bf16.gmra.mrb[12].mxu0 %v3167_v22  ;;  %v3145_v22 = vld [vmem:[#allocation2 + $0xd5] sm:$0xff] }
 0x356   : > { %10028 = vmatprep.mubr.msk.bf16.mxu0 %vm12034_vm0, %v12764_v0  ;;  %10109 = vmatpush3.bf16.msra.mxu0 %v11810_v11  ;;  %v3146_v11 = vld [vmem:[#allocation2 + $0xdd] sm:$0xff] }
 0x357   : > { %10110 = vmatprep.subr.bf16.mxu0 %v12764_v0  ;;  %v3175_v27 = vpack.c.bf16 %v3146_v11, %v3145_v22 }
 0x35a   : > { %10111 = vmatpush3.bf16.msra.mxu0 %v11811_v26 }
 0x35d   : > { %10029 = vmatmul.mubr.bf16.gmra.mrb[16].mxu0 %v3168_v30  ;;  %v3147_v30 = vld [vmem:[#allocation2 + $0xe5] sm:$0xff] }
 0x35e   : > { %10032 = vmatprep.mubr.msk.bf16.mxu0 %vm12034_vm0, %v12764_v0 }
 0x365   : > { %10033 = vmatmul.mubr.bf16.gmra.mrb[20].mxu0 %v3169_v44  ;;  %v3176_v44 = vpack.c.bf16 %v3148_v32, %v3147_v30  ;;  %v3158_v30 = vld [vmem:[#allocation2 + $0x13d] sm:$0xff] }
 0x366   : > { %10036 = vmatprep.mubr.msk.bf16.mxu0 %vm12034_vm0, %v12764_v0 }
 0x36b   : > { %v12951_v53 = vpop.f32.mrb[36].mxu1 }
 0x36c   : > { %v9550_v58 = vpop.f32.mrb[37].mxu1 }
 0x36d   : > { %10037 = vmatmul.mubr.bf16.gmra.mrb[24].mxu0 %v3170_v8  ;;  %v12955_v60 = vpop.f32.mrb[38].mxu1 }
 0x36e   : > { %10040 = vmatprep.mubr.msk.bf16.mxu0 %vm12034_vm0, %v12764_v0  ;;  %15227 = vst [vmem:[#allocation11_spill] sm:$0xff] %v12955_v60  ;;  %v9551_v61 = vpop.f32.mrb[39].mxu1 }
 0x373   : > { %v12957_v37 = vpop.f32.mrb[40].mxu1 }
 0x374   : > { %15228 = vst [vmem:[#allocation12_spill] sm:$0xff] %v12957_v37  ;;  %v9554_v5 = vpop.f32.mrb[41].mxu1  ;;  %v11894_v37 = vld [vmem:[#allocation3 + $0x14c] sm:$0xff] }
 0x375   : > { %10041 = vmatmul.mubr.bf16.gmra.mrb[28].mxu0 %v3171_v50  ;;  %v12961_v47 = vpop.f32.mrb[42].mxu1  ;;  %v3152_v50 = vld [vmem:[#allocation2 + $0x10d] sm:$0xff] }
 0x376   : > { %10044 = vmatprep.mubr.msk.bf16.mxu0 %vm12034_vm0, %v12764_v0  ;;  %15229 = vst [vmem:[#allocation13_spill] sm:$0xff] %v12961_v47  ;;  %v9555_v6 = vpop.f32.mrb[43].mxu1  ;;  %v3178_v61 = vpack.c.bf16 %v3152_v50, %v3151_v49 }
 0x37b   : > { %v12963_v10 = vpop.f32.mrb[44].mxu1 }
 0x37c   : > { %15230 = vst [vmem:[#allocation14_spill] sm:$0xff] %v12963_v10  ;;  %v9558_v14 = vpop.f32.mrb[45].mxu1 }
 0x37d   : > { %10045 = vmatmul.mubr.bf16.gmra.mrb[32].mxu0 %v3172_v62  ;;  %v12967_v3 = vpop.f32.mrb[46].mxu1  ;;  %v3155_v14 = vld [vmem:[#allocation2 + $0x125] sm:$0xff] }
 0x37e   : > { %10048 = vmatprep.mubr.msk.bf16.mxu0 %vm12034_vm0, %v12764_v0  ;;  %15231 = vst [vmem:[#allocation15_spill] sm:$0xff] %v12967_v3  ;;  %v9559_v16 = vpop.f32.mrb[47].mxu1 }
 0x37f   : > { %v3156_v16 = vld [vmem:[#allocation2 + $0x12d] sm:$0xff] }
 0x383   : > { %v12969_v21 = vpop.f32.mrb[48].mxu1 }
 0x384   : > { %15232 = vst [vmem:[#allocation16_spill] sm:$0xff] %v12969_v21  ;;  %v9562_v24 = vpop.f32.mrb[49].mxu1 }
 0x385   : > { %10049 = vmatmul.mubr.bf16.gmra.mrb[36].mxu0 %v3173_v7  ;;  %v12973_v20 = vpop.f32.mrb[50].mxu1  ;;  %v3180_v24 = vpack.c.bf16 %v3156_v16, %v3155_v14  ;;  %v3491_v16 = vld [vmem:[#allocation2 + $0x26] sm:$0xff] }
 0x386   : > { %10052 = vmatprep.mubr.msk.bf16.mxu0 %vm12034_vm0, %v12764_v0  ;;  %15233 = vst [vmem:[#allocation17_spill] sm:$0xff] %v12973_v20  ;;  %v9563_v26 = vpop.f32.mrb[51].mxu1 }
 0x38b   : > { %v12975_v28 = vpop.f32.mrb[52].mxu1 }
 0x38c   : > { %15234 = vst [vmem:[#allocation18_spill] sm:$0xff] %v12975_v28  ;;  %v9566_v33 = vpop.f32.mrb[53].mxu1 }
 0x38d   : > { %10053 = vmatmul.mubr.bf16.gmra.mrb[40].mxu0 %v3174_v17  ;;  %v12979_v38 = vpop.f32.mrb[54].mxu1 }
 0x38e   : > { %10056 = vmatprep.mubr.msk.bf16.mxu0 %vm12034_vm0, %v12764_v0  ;;  %15235 = vst [vmem:[#allocation19_spill] sm:$0xff] %v12979_v38  ;;  %v9567_v35 = vpop.f32.mrb[55].mxu1 }
 0x393   : > { %v12981_v40 = vpop.f32.mrb[56].mxu1 }
 0x394   : > { %15236 = vst [vmem:[#allocation20_spill] sm:$0xff] %v12981_v40  ;;  %v9570_v1 = vpop.f32.mrb[57].mxu1 }
 0x395   : > { %10057 = vmatmul.mubr.bf16.gmra.mrb[44].mxu0 %v3175_v27  ;;  %v12985_v8 = vpop.f32.mrb[58].mxu1  ;;  %v3157_v27 = vld [vmem:[#allocation2 + $0x135] sm:$0xff]  ;;  %v3160_v1 = vld [vmem:[#allocation2 + $0x14d] sm:$0xff] }
 0x396   : > { %10060 = vmatprep.mubr.msk.bf16.mxu0 %vm12034_vm0, %v12764_v0  ;;  %15237 = vst [vmem:[#allocation21_spill] sm:$0xff] %v12985_v8  ;;  %v9571_v29 = vpop.f32.mrb[59].mxu1  ;;  %v3182_v50 = vpack.c.bf16 %v3160_v1, %v3159_v41  ;;  %v3497_v41 = vld [vmem:[#allocation2 + $0x56] sm:$0xff]  ;;  %v3498_v1 = vld [vmem:[#allocation2 + $0x5e] sm:$0xff] }
 0x39b   : > { %v12987_v43 = vpop.f32.mrb[60].mxu1 }
 0x39c   : > { %15238 = vst [vmem:[#allocation22_spill] sm:$0xff] %v12987_v43  ;;  %v9574_v54 = vpop.f32.mrb[61].mxu1 }
 0x39d   : > { %10061 = vmatmul.mubr.bf16.gmra.mrb[48].mxu0 %v3176_v44  ;;  %v12991_v55 = vpop.f32.mrb[62].mxu1  ;;  %v3181_v44 = vpack.c.bf16 %v3158_v30, %v3157_v27  ;;  %v3494_v27 = vld [vmem:[#allocation2 + $0x3e] sm:$0xff] }
 0x39e   : > { %10064 = vmatprep.mubr.msk.bf16.mxu0 %vm12034_vm0, %v12764_v0  ;;  %15239 = vst [vmem:[#allocation23_spill] sm:$0xff] %v12991_v55  ;;  %v9575_v58 = vpop.f32.mrb[63].mxu1 }
 0x39f   : > { %v3161_v58 = vld [vmem:[#allocation2 + $0x155] sm:$0xff] }
 0x3a3   : > { %v12993_v62 = vpop.f32.mrb[64].mxu1 }
 0x3a4   : > { %15240 = vst [vmem:[#allocation24_spill] sm:$0xff] %v12993_v62  ;;  %v9578_v5 = vpop.f32.mrb[65].mxu1 }
 0x3a5   : > { %10065 = vmatmul.mubr.bf16.gmra.mrb[52].mxu0 %v3177_v42  ;;  %v12997_v6 = vpop.f32.mrb[66].mxu1 }
 0x3a6   : > { %10068 = vmatprep.mubr.msk.bf16.mxu0 %vm12034_vm0, %v12764_v0  ;;  %15241 = vst [vmem:[#allocation25_spill] sm:$0xff] %v12997_v6  ;;  %v9579_v7 = vpop.f32.mrb[67].mxu1 }
 0x3ab   : > { %v12999_v12 = vpop.f32.mrb[68].mxu1 }
 0x3ac   : > { %15242 = vst [vmem:[#allocation26_spill] sm:$0xff] %v12999_v12  ;;  %v9582_v17 = vpop.f32.mrb[69].mxu1 }
 0x3ad   : > { %10069 = vmatmul.mubr.bf16.gmra.mrb[56].mxu0 %v3178_v61  ;;  %v13003_v22 = vpop.f32.mrb[70].mxu1  ;;  %v3162_v61 = vld [vmem:[#allocation2 + $0x15d] sm:$0xff]  ;;  %v3492_v17 = vld [vmem:[#allocation2 + $0x2e] sm:$0xff] }
 0x3ae   : > { %10072 = vmatprep.mubr.msk.bf16.mxu0 %vm12034_vm0, %v12764_v0  ;;  %15243 = vst [vmem:[#allocation27_spill] sm:$0xff] %v13003_v22  ;;  %v9583_v11 = vpop.f32.mrb[71].mxu1  ;;  %v3183_v7 = vpack.c.bf16 %v3162_v61, %v3161_v58  ;;  %v11812_v61 = vld [vmem:[%s15220_s5 + $0x40] sm:$0xff]  }
 0x3af   : > { %v3532_v11 = vpack.c.bf16 %v3492_v17, %v3491_v16  ;;  %10196 = vmatprep.subr.bf16.mxu1 %v11812_v61  ;;  %v3505_v16 = vld [vmem:[#allocation2 + $0x96] sm:$0xff]  ;;  %v3506_v17 = vld [vmem:[#allocation2 + $0x9e] sm:$0xff] }
 0x3b0   : > { %10197 = vmatpush3.bf16.msra.mxu1 %v11812_v61  ;;  %v11813_v61 = vld [vmem:[%s15220_s5 + $0x48] sm:$0xff]  }
 0x3b1   : > { %10198 = vmatprep.subr.bf16.mxu1 %v11813_v61 }
 0x3b3   : > { %v13005_v26 = vpop.f32.mrb[72].mxu1 }
 0x3b4   : > { %15244 = vst [vmem:[#allocation28_spill] sm:$0xff] %v13005_v26  ;;  %v9586_v32 = vpop.f32.mrb[73].mxu1  ;;  %10199 = vmatpush3.bf16.msra.mxu1 %v11813_v61  ;;  %v3525_v61 = vld [vmem:[#allocation2 + $0x136] sm:$0xff] }
 0x3b5   : > { %10073 = vmatmul.mubr.bf16.gmra.mrb[60].mxu0 %v3179_v57  ;;  %v13009_v33 = vpop.f32.mrb[74].mxu1  ;;  %v3163_v57 = vld [vmem:[#allocation2 + $0x165] sm:$0xf] }
 0x3b6   : > { %10076 = vmatprep.mubr.msk.bf16.mxu0 %vm12034_vm0, %v12764_v0  ;;  %15245 = vst [vmem:[#allocation29_spill] sm:$0xff] %v13009_v33  ;;  %v9587_v35 = vpop.f32.mrb[75].mxu1  ;;  %v3184_v14 = vpack.c.bf16 %v3163_v57, %v3163_v57  ;;  %v3495_v32 = vld [vmem:[#allocation2 + $0x46] sm:$0xff]  ;;  %v3504_v57 = vld [vmem:[#allocation2 + $0x8e] sm:$0xff] }
 0x3b7   : > { %v3496_v35 = vld [vmem:[#allocation2 + $0x4e] sm:$0xff] }
 0x3bb   : > { %v13011_v52 = vpop.f32.mrb[76].mxu1 }
 0x3bc   : > { %15246 = vst [vmem:[#allocation30_spill] sm:$0xff] %v13011_v52  ;;  %v9590_v29 = vpop.f32.mrb[77].mxu1 }
 0x3bd   : > { %10077 = vmatmul.mubr.bf16.gmra.mrb[64].mxu0 %v3180_v24  ;;  %v13015_v42 = vpop.f32.mrb[78].mxu1  ;;  %v3493_v24 = vld [vmem:[#allocation2 + $0x36] sm:$0xff]  ;;  %v3535_v29 = vpack.c.bf16 %v3498_v1, %v3497_v41  ;;  %v3511_v41 = vld [vmem:[#allocation2 + $0xc6] sm:$0xff]  ;;  %v3512_v1 = vld [vmem:[#allocation2 + $0xce] sm:$0xff] }
 0x3be   : > { %10080 = vmatprep.mubr.msk.bf16.mxu0 %vm12034_vm0, %v12764_v0  ;;  %15247 = vst [vmem:[#allocation31_spill] sm:$0xff] %v13015_v42  ;;  %v9591_v49 = vpop.f32.mrb[79].mxu1  ;;  %v3533_v30 = vpack.c.bf16 %v3494_v27, %v3493_v24  ;;  %v3507_v24 = vld [vmem:[#allocation2 + $0xa6] sm:$0xff]  ;;  %v3508_v27 = vld [vmem:[#allocation2 + $0xae] sm:$0xff] }
 0x3bf   : > { %v3499_v49 = vld [vmem:[#allocation2 + $0x66] sm:$0xff] }
 0x3c3   : > { %v13017_v54 = vpop.f32.mrb[80].mxu1 }
 0x3c4   : > { %15248 = vst [vmem:[#allocation32_spill] sm:$0xff] %v13017_v54  ;;  %v9594_v2 = vpop.f32.mrb[81].mxu1 }
 0x3c5   : > { %10081 = vmatmul.mubr.bf16.gmra.mrb[68].mxu0 %v3181_v44  ;;  %v1607_v19 = vpop.f32.mrb[82].mxu1  ;;  %v3534_v44 = vpack.c.bf16 %v3496_v35, %v3495_v32  ;;  %v3501_v2 = vld [vmem:[#allocation2 + $0x76] sm:$0xff]  ;;  %v3510_v35 = vld [vmem:[#allocation2 + $0xbe] sm:$0xff] }
 0x3c6   : > { %10084 = vmatprep.mubr.msk.bf16.mxu0 %vm12034_vm0, %v12764_v0  ;;  %v9595_v5 = vpop.f32.mrb[83].mxu1  ;;  %v3502_v19 = vld [vmem:[#allocation2 + $0x7e] sm:$0xff]  ;;  %v3509_v32 = vld [vmem:[#allocation2 + $0xb6] sm:$0xff] }
 0x3c7   : > { %v3537_v5 = vpack.c.bf16 %v3502_v19, %v3501_v2  ;;  %v11814_v2 = vld [vmem:[%s15220_s5 + $0x50] sm:$0xff]   ;;  %v3515_v19 = vld [vmem:[#allocation2 + $0xe6] sm:$0xff] }
 0x3c8   : > { %10200 = vmatprep.subr.bf16.mxu1 %v11814_v2 }
 0x3c9   : > { %10201 = vmatpush3.bf16.msra.mxu1 %v11814_v2  ;;  %v3526_v2 = vld [vmem:[#allocation2 + $0x13e] sm:$0xff] }
 0x3cd   : > { %10085 = vmatmul.mubr.bf16.gmra.mrb[72].mxu0 %v3182_v50  ;;  %v3500_v50 = vld [vmem:[#allocation2 + $0x6e] sm:$0xff] }
 0x3ce   : > { %10088 = vmatprep.mubr.msk.bf16.mxu0 %vm12034_vm0, %v12764_v0  ;;  %v3536_v58 = vpack.c.bf16 %v3500_v50, %v3499_v49  ;;  %v3513_v49 = vld [vmem:[#allocation2 + $0xd6] sm:$0xff]  ;;  %v3514_v50 = vld [vmem:[#allocation2 + $0xde] sm:$0xff] }
 0x3d5   : > { %10089 = vmatmul.mubr.bf16.gmra.mrb[76].mxu0 %v3183_v7  ;;  %v3503_v7 = vld [vmem:[#allocation2 + $0x86] sm:$0xff] }
 0x3d6   : > { %10092 = vmatprep.mubr.msk.bf16.mxu0 %vm12034_vm0, %v12764_v0 }
 0x3dd   : > { %10093 = vmatmul.mubr.bf16.gmra.mrb[80].mxu0 %v3184_v14  ;;  %v3538_v14 = vpack.c.bf16 %v3504_v57, %v3503_v7  ;;  %v11815_v57 = vld [vmem:[%s15220_s5 + $0x58] sm:$0xff]  }
 0x3de   : > { %10112 = vmatprep.mubr.msk.bf16.mxu0 %vm12034_vm0, %v12764_v0  ;;  %10202 = vmatprep.subr.bf16.mxu1 %v11815_v57 }
 0x3df   : > { %10203 = vmatpush3.bf16.msra.mxu1 %v11815_v57 }
 0x3e5   : > { %10113 = vmatmul.mubr.bf16.vlgmr.msra.gmra.mrb[0].mxu0 %v3532_v11  ;;  %v3539_v11 = vpack.c.bf16 %v3506_v17, %v3505_v16  ;;  %v3517_v16 = vld [vmem:[#allocation2 + $0xf6] sm:$0xff]  ;;  %v3518_v17 = vld [vmem:[#allocation2 + $0xfe] sm:$0xff] }
 0x3e6   : > { %10116 = vmatprep.mubr.msk.bf16.mxu0 %vm12034_vm0, %v12764_v0 }
 0x3ed   : > { %10117 = vmatmul.mubr.bf16.gmra.mrb[4].mxu0 %v3533_v30  ;;  %v3540_v30 = vpack.c.bf16 %v3508_v27, %v3507_v24  ;;  %v11817_v24 = vld [vmem:[%s15220_s5 + $0x68] sm:$0xff]   ;;  %v11818_v27 = vld [vmem:[%s15220_s5 + $0x70] sm:$0xff]  }
 0x3ee   : > { %10120 = vmatprep.mubr.msk.bf16.mxu0 %vm12034_vm0, %v12764_v0 }
 0x3f5   : > { %10121 = vmatmul.mubr.bf16.gmra.mrb[8].mxu0 %v3534_v44  ;;  %v3541_v44 = vpack.c.bf16 %v3510_v35, %v3509_v32  ;;  %v3520_v32 = vld [vmem:[#allocation2 + $0x10e] sm:$0xff] }
 0x3f6   : > { %10124 = vmatprep.mubr.msk.bf16.mxu0 %vm12034_vm0, %v12764_v0 }
 0x3fd   : > { %10125 = vmatmul.mubr.bf16.gmra.mrb[12].mxu0 %v3535_v29  ;;  %v3542_v29 = vpack.c.bf16 %v3512_v1, %v3511_v41  ;;  %v3521_v41 = vld [vmem:[#allocation2 + $0x116] sm:$0xff]  ;;  %v3522_v1 = vld [vmem:[#allocation2 + $0x11e] sm:$0xff] }
 0x3fe   : > { %10128 = vmatprep.mubr.msk.bf16.mxu0 %vm12034_vm0, %v12764_v0 }
 0x405   : > { %10129 = vmatmul.mubr.bf16.gmra.mrb[16].mxu0 %v3536_v58  ;;  %v3543_v58 = vpack.c.bf16 %v3514_v50, %v3513_v49  ;;  %v3523_v49 = vld [vmem:[#allocation2 + $0x126] sm:$0xff]  ;;  %v3524_v50 = vld [vmem:[#allocation2 + $0x12e] sm:$0xff] }
 0x406   : > { %10132 = vmatprep.mubr.msk.bf16.mxu0 %vm12034_vm0, %v12764_v0 }
 0x40d   : > { %10133 = vmatmul.mubr.bf16.gmra.mrb[20].mxu0 %v3537_v5  ;;  %v3516_v5 = vld [vmem:[#allocation2 + $0xee] sm:$0xff] }
 0x40e   : > { %10136 = vmatprep.mubr.msk.bf16.mxu0 %vm12034_vm0, %v12764_v0  ;;  %v3544_v7 = vpack.c.bf16 %v3516_v5, %v3515_v19  ;;  %v3549_v19 = vpack.c.bf16 %v3526_v2, %v3525_v61  ;;  %v3527_v5 = vld [vmem:[#allocation2 + $0x146] sm:$0xff] }
 0x415   : > { %10137 = vmatmul.mubr.bf16.gmra.mrb[24].mxu0 %v3538_v14  ;;  %v11816_v14 = vld [vmem:[%s15220_s5 + $0x60] sm:$0xff]  }
 0x416   : > { %10140 = vmatprep.mubr.msk.bf16.mxu0 %vm12034_vm0, %v12764_v0  ;;  %10204 = vmatprep.subr.bf16.mxu1 %v11816_v14 }
 0x417   : > { %10205 = vmatpush3.bf16.msra.mxu1 %v11816_v14  ;;  %v3529_v14 = vld [vmem:[#allocation2 + $0x156] sm:$0xff] }
 0x418   : > { %10206 = vmatprep.subr.bf16.mxu1 %v11817_v24 }
 0x41b   : > { %10207 = vmatpush3.bf16.msra.mxu1 %v11817_v24 }
 0x41c   : > { %10208 = vmatprep.subr.bf16.mxu1 %v11818_v27 }
 0x41d   : > { %10141 = vmatmul.mubr.bf16.gmra.mrb[28].mxu0 %v3539_v11  ;;  %v3545_v11 = vpack.c.bf16 %v3518_v17, %v3517_v16  ;;  %v3530_v16 = vld [vmem:[#allocation2 + $0x15e] sm:$0xff] }
 0x41e   : > { %10144 = vmatprep.mubr.msk.bf16.mxu0 %vm12034_vm0, %v12764_v0  ;;  %v3551_v17 = vpack.c.bf16 %v3530_v16, %v3529_v14 }
 0x41f   : > { %10209 = vmatpush3.bf16.msra.mxu1 %v11818_v27  ;;  %v4085_v27 = vlaneseq }
 0x425   : > { %10145 = vmatmul.mubr.bf16.gmra.mrb[32].mxu0 %v3540_v30  ;;  %v3519_v30 = vld [vmem:[#allocation2 + $0x106] sm:$0xff] }
 0x426   : > { %10148 = vmatprep.mubr.msk.bf16.mxu0 %vm12034_vm0, %v12764_v0  ;;  %v3546_v35 = vpack.c.bf16 %v3520_v32, %v3519_v30  ;;  %v13089_v30 = vshrl.u32 %v4085_v27, 7 }
 0x428   : > { %v4087_v32 = vadd.s32 8, %v13089_v30  ;;  %v4092_v14 = vadd.s32 48, %v13089_v30  ;;  %v13172_v12 = vadd.s32 88, %v13089_v30  ;;  %v13728_v40 = vadd.s32 176, %v13089_v30 }
 0x42d   : > { %10149 = vmatmul.mubr.bf16.gmra.mrb[36].mxu0 %v3541_v44  ;;  %v11819_v44 = vld [vmem:[%s15220_s5 + $0x78] sm:$0xff]  }
 0x42e   : > { %10152 = vmatprep.mubr.msk.bf16.mxu0 %vm12034_vm0, %v12764_v0  ;;  %10210 = vmatprep.subr.bf16.mxu1 %v11819_v44 }
 0x42f   : > { %10211 = vmatpush3.bf16.msra.mxu1 %v11819_v44 }
 0x435   : > { %10153 = vmatmul.mubr.bf16.gmra.mrb[40].mxu0 %v3542_v29  ;;  %v3547_v29 = vpack.c.bf16 %v3522_v1, %v3521_v41  ;;  %v13096_v41 = vmul.u32.u64.low 3817748708, %v4087_v32  ;;  %v13097_v1 = vmul.u32.u64.high 3817748708, %v4087_v32, %v13096_v41 }
 0x436   : > { %10156 = vmatprep.mubr.msk.bf16.mxu0 %vm12034_vm0, %v12764_v0 }
 0x43d   : > { %10157 = vmatmul.mubr.bf16.gmra.mrb[44].mxu0 %v3543_v58  ;;  %v3548_v58 = vpack.c.bf16 %v3524_v50, %v3523_v49  ;;  %v4089_v49 = vadd.s32 24, %v13089_v30  ;;  %v13105_v50 = vld [vmem:[%s15220_s5] sm:$0xff]  }
 0x43e   : > { %10160 = vmatprep.mubr.msk.bf16.mxu0 %vm12034_vm0, %v12764_v0  ;;  %10248 = vmatprep.subr.bf16.mxu1 %v13105_v50 }
 0x445   : > { %10161 = vmatmul.mubr.bf16.gmra.mrb[48].mxu0 %v3544_v7  ;;  %v3528_v7 = vld [vmem:[#allocation2 + $0x14e] sm:$0xff] }
 0x446   : > { %10164 = vmatprep.mubr.msk.bf16.mxu0 %vm12034_vm0, %v12764_v0  ;;  %v3550_v57 = vpack.c.bf16 %v3528_v7, %v3527_v5  ;;  %v4144_v5 = vshrl.u32 %v13097_v1, 4 }
 0x448   : > { %v4145_v41 = vmul.u32 18, %v4144_v5 }
 0x44a   : > { %v13140_v26 = vsub.s32 %v4087_v32, %v4145_v41 }
 0x44c   : > { %vm4579_vm3 = vcmp.ne.s32.totalorder %v13140_v26, 0  ;;  %vm4620_vm4 = vcmp.lt.s32.totalorder %v13140_v26, 0 }
 0x44d   : > { %10165 = vmatmul.mubr.bf16.gmra.mrb[52].mxu0 %v3545_v11  ;;  %v3531_v11 = vld [vmem:[#allocation2 + $0x166] sm:$0xf]  ;;  %vm13165_vm6 = vmand %vm4620_vm4, %vm4579_vm3 }
 0x44e   : > { %10168 = vmatprep.mubr.msk.bf16.mxu0 %vm12034_vm0, %v12764_v0  ;;  %v3552_v24 = vpack.c.bf16 %v3531_v11, %v3531_v11  ;;  %v4093_v11 = vadd.s32 56, %v13089_v30 }
 0x455   : > { %10169 = vmatmul.mubr.bf16.gmra.mrb[56].mxu0 %v3546_v35  ;;  %v13093_v35 = vmul.u32.u64.low 3817748708, %v13089_v30  ;;  %v13094_v44 = vmul.u32.u64.high 3817748708, %v13089_v30, %v13093_v35 }
 0x456   : > { %10172 = vmatprep.mubr.msk.bf16.mxu0 %vm12034_vm0, %v12764_v0 }
 0x45d   : > { %10173 = vmatmul.mubr.bf16.gmra.mrb[60].mxu0 %v3547_v29  ;;  %v4088_v29 = vadd.s32 16, %v13089_v30 }
 0x45e   : > { %10176 = vmatprep.mubr.msk.bf16.mxu0 %vm12034_vm0, %v12764_v0 }
 0x45f   : > { %v13108_v61 = vmul.u32.u64.low 3817748708, %v4088_v29  ;;  %v13109_v2 = vmul.u32.u64.high 3817748708, %v4088_v29, %v13108_v61 }
 0x460   : > { %v13128_v1 = vmul.u32.u64.low 3817748708, %v4092_v14  ;;  %v13129_v61 = vmul.u32.u64.high 3817748708, %v4092_v14, %v13128_v1 }
 0x461   : > { %v4155_v33 = vshrl.u32 %v13109_v2, 4 }
 0x462   : > { %v4199_v32 = vshrl.u32 %v13129_v61, 4 }
 0x463   : > { %v4156_v1 = vmul.u32 18, %v4155_v33  ;;  %v4702_v33 = vadd.s32 18, %v13140_v26 }
 0x464   : > { %v4200_v62 = vmul.u32 18, %v4199_v32 }
 0x465   : > { %10177 = vmatmul.mubr.bf16.gmra.mrb[64].mxu0 %v3548_v58  ;;  %v4133_v58 = vshrl.u32 %v13094_v44, 4 }
 0x466   : > { %10180 = vmatprep.mubr.msk.bf16.mxu0 %vm12034_vm0, %v12764_v0 }
 0x467   : > { %v4134_v27 = vmul.u32 18, %v4133_v58 }
 0x46d   : > { %10181 = vmatmul.mubr.bf16.gmra.mrb[68].mxu0 %v3549_v19  ;;  %v4091_v19 = vadd.s32 40, %v13089_v30 }
 0x46e   : > { %10184 = vmatprep.mubr.msk.bf16.mxu0 %vm12034_vm0, %v12764_v0 }
 0x46f   : > { %v13125_v35 = vmul.u32.u64.low 3817748708, %v4091_v19  ;;  %v13126_v44 = vmul.u32.u64.high 3817748708, %v4091_v19, %v13125_v35 }
 0x470   : > { %v13145_v35 = vadd.s32 72, %v13089_v30 }
 0x475   : > { %10185 = vmatmul.mubr.bf16.gmra.mrb[72].mxu0 %v3550_v57  ;;  %v13113_v7 = vmul.u32.u64.low 3817748708, %v4089_v49  ;;  %v13114_v57 = vmul.u32.u64.high 3817748708, %v4089_v49, %v13113_v7 }
 0x476   : > { %10188 = vmatprep.mubr.msk.bf16.mxu0 %vm12034_vm0, %v12764_v0  ;;  %v13131_v7 = vmul.u32.u64.low 3817748708, %v4093_v11  ;;  %v13132_v54 = vmul.u32.u64.high 3817748708, %v4093_v11, %v13131_v7 }
 0x477   : > { %v4166_v58 = vshrl.u32 %v13114_v57, 4  ;;  %v4188_v7 = vshrl.u32 %v13126_v44, 4 }
 0x478   : > { %v4210_v57 = vshrl.u32 %v13132_v54, 4  ;;  %v13169_v54 = vsub.s32 %v4088_v29, %v4156_v1  ;;  %v4743_v29 = vsel %vm13165_vm6, %v4702_v33, %v13140_v26  ;;  %v13253_v33 = vadd.s32 104, %v13089_v30 }
 0x47a   : > { %vm4580_vm7 = vcmp.ne.s32.totalorder %v13169_v54, 0  ;;  %vm4621_vm8 = vcmp.lt.s32.totalorder %v13169_v54, 0 }
 0x47b   : > { %vm13218_vm13 = vmand %vm4621_vm8, %vm4580_vm7  ;;  %vm13275_vm7 = vcmp.lt.s32.totalorder %v4743_v29, 16 }
 0x47d   : > { %10189 = vmatmul.mubr.bf16.gmra.mrb[76].mxu0 %v3551_v17 }
 0x47e   : > { %10192 = vmatprep.mubr.msk.bf16.mxu0 %vm12034_vm0, %v12764_v0  ;;  %v4090_v0 = vadd.s32 32, %v13089_v30 }
 0x480   : > { %v13118_v16 = vmul.u32.u64.low 3817748708, %v4090_v0  ;;  %v13119_v17 = vmul.u32.u64.high 3817748708, %v4090_v0, %v13118_v16 }
 0x481   : > { %v4135_v16 = vsub.s32 %v13089_v30, %v4134_v27 }
 0x482   : > { %v4177_v5 = vshrl.u32 %v13119_v17, 4  ;;  %v13153_v17 = vadd.s32 80, %v13089_v30 }
 0x483   : > { %vm4578_vm1 = vcmp.ne.s32.totalorder %v4135_v16, 0  ;;  %vm4619_vm2 = vcmp.lt.s32.totalorder %v4135_v16, 0  ;;  %v4701_v2 = vadd.s32 18, %v4135_v16 }
 0x484   : > { %v4178_v27 = vmul.u32 18, %v4177_v5  ;;  %vm13155_vm5 = vmand %vm4619_vm2, %vm4578_vm1  ;;  %v4189_v5 = vmul.u32 18, %v4188_v7 }
 0x485   : > { %10193 = vmatmul.mubr.bf16.gmra.mrb[80].mxu0 %v3552_v24  ;;  %v13123_v24 = vadd.s32 64, %v13089_v30  ;;  %v13179_v43 = vmul.u32.u64.low 3817748708, %v13153_v17  ;;  %v13180_v8 = vmul.u32.u64.high 3817748708, %v13153_v17, %v13179_v43 }
 0x486   : > { %v13176_v55 = vsub.s32 %v4090_v0, %v4178_v27  ;;  %v13191_v0 = vmul.u32.u64.low 3817748708, %v13172_v12  ;;  %v13192_v7 = vmul.u32.u64.high 3817748708, %v13172_v12, %v13191_v0  ;;  %v13196_v43 = vadd.s32 18, %v13169_v54 }
 0x487   : > { %v13135_v42 = vmul.u32.u64.low 3817748708, %v13123_v24  ;;  %v13136_v52 = vmul.u32.u64.high 3817748708, %v13123_v24, %v13135_v42  ;;  %v13414_v0 = vadd.s32 128, %v13089_v30 }
 0x488   : > { %v4167_v42 = vmul.u32 18, %v4166_v58  ;;  %v13162_v22 = vmul.u32.u64.low 3817748708, %v13145_v35  ;;  %v13163_v58 = vmul.u32.u64.high 3817748708, %v13145_v35, %v13162_v22  ;;  %vm4582_vm11 = vcmp.ne.s32.totalorder %v13176_v55, 0 }
 0x489   : > { %v4221_v44 = vshrl.u32 %v13136_v52, 4  ;;  %v4211_v52 = vmul.u32 18, %v4210_v57  ;;  %v4742_v22 = vsel %vm13155_vm5, %v4701_v2, %v4135_v16  ;;  %v13199_v16 = vsub.s32 %v4092_v14, %v4200_v62 }
 0x48a   : > { %v13174_v6 = vsub.s32 %v4089_v49, %v4167_v42  ;;  %v13188_v49 = vsub.s32 %v4091_v19, %v4189_v5  ;;  %vm4623_vm12 = vcmp.lt.s32.totalorder %v13176_v55, 0  ;;  %v13210_v42 = vadd.s32 18, %v13176_v55 }
 0x48b   : > { %v4222_v1 = vmul.u32 18, %v4221_v44  ;;  %v13206_v19 = vsub.s32 %v4093_v11, %v4211_v52  ;;  %v4232_v62 = vshrl.u32 %v13163_v58, 4  ;;  %v13228_v2 = vadd.s32 96, %v13089_v30  ;;  %vm13259_vm4 = vmand %vm4623_vm12, %vm4582_vm11 }
 0x48c   : > { %vm4581_vm9 = vcmp.ne.s32.totalorder %v13174_v6, 0  ;;  %vm4622_vm10 = vcmp.lt.s32.totalorder %v13174_v6, 0  ;;  %v13203_v26 = vadd.s32 18, %v13174_v6  ;;  %vm4583_vm14 = vcmp.ne.s32.totalorder %v13188_v49, 0 }
 0x48d   : > { %v13213_v32 = vsub.s32 %v13123_v24, %v4222_v1  ;;  %vm4624_vm15 = vcmp.lt.s32.totalorder %v13188_v49, 0  ;;  %v13225_v11 = vadd.s32 18, %v13188_v49  ;;  %v13233_v24 = vld [vmem:[%s15217_s2] ss:$0 sm:$0xff]  ;;  %vm13235_vm0 = vcmp.lt.s32.totalorder %v4742_v22, 16  ;;  %vm13243_vm1 = vmand %vm4622_vm10, %vm4581_vm9 }
 0x48e   : > { %vm4584_vm2 = vcmp.ne.s32.totalorder %v13199_v16, 0  ;;  %vm4625_vm3 = vcmp.lt.s32.totalorder %v13199_v16, 0  ;;  %v13250_v41 = vadd.s32 18, %v13199_v16  ;;  %vm4585_vm5 = vcmp.ne.s32.totalorder %v13206_v19, 0  ;;  %v13273_v22 = vld [vmem:[%s15218_s3] ss:$0 sm:$0xff]  ;;  %vm13283_vm8 = vmand %vm4624_vm15, %vm4583_vm14 }
 0x48f   : > { %vm4626_vm6 = vcmp.lt.s32.totalorder %v13206_v19, 0  ;;  %v13266_v61 = vadd.s32 18, %v13206_v19  ;;  %v4243_v5 = vshrl.u32 %v13180_v8, 4  ;;  %vm4586_vm9 = vcmp.ne.s32.totalorder %v13213_v32, 0  ;;  %vm13293_vm11 = vmand %vm4625_vm3, %vm4584_vm2 }
 0x490   : > { %vm4627_vm10 = vcmp.lt.s32.totalorder %v13213_v32, 0  ;;  %v13302_v38 = vmul.u32.u64.low 3817748708, %v13228_v2  ;;  %v13303_v28 = vmul.u32.u64.high 3817748708, %v13228_v2, %v13302_v38  ;;  %vm13311_vm12 = vmand %vm4626_vm6, %vm4585_vm5 }
 0x491   : > { %v13322_v38 = vld [vmem:[%s15219_s4] ss:$0 sm:$0xff]  ;;  %vm13336_vm14 = vmand %vm4627_vm10, %vm4586_vm9 }
 0x4b8   : > { %v3652_v44 = vpop.f32.mrb[0].mxu0 }
 0x4b9   : > { %v10680_v52 = vadd.f32 %v3652_v44, %v12866_v15  ;;  %v10114_v1 = vpop.f32.mrb[1].mxu0  ;;  %v4233_v15 = vmul.u32 18, %v4232_v62  ;;  %v13298_v44 = vadd.s32 18, %v13213_v32 }
 0x4ba   : > { %v3655_v8 = vpop.f32.mrb[2].mxu0  ;;  %v4254_v1 = vshrl.u32 %v13192_v7, 4  ;;  %v13316_v10 = vmul.u32.u64.low 3817748708, %v13253_v33  ;;  %v13317_v7 = vmul.u32.u64.high 3817748708, %v13253_v33, %v13316_v10 }
 0x4bb   : > { %v3866_v62 = vmul.f32 %v10680_v52, %v13233_v24  ;;  %v10681_v20 = vadd.f32 %v3655_v8, %v12870_v36  ;;  %v10115_v21 = vpop.f32.mrb[3].mxu0  ;;  %v4744_v36 = vsel %vm13218_vm13, %v13196_v43, %v13169_v54  ;;  %v4244_v52 = vmul.u32 18, %v4243_v5 }
 0x4bc   : > { %v4745_v21 = vsel %vm13243_vm1, %v13203_v26, %v13174_v6  ;;  %v13341_v8 = vadd.s32 112, %v13089_v30  ;;  %v4746_v6 = vsel %vm13259_vm4, %v13210_v42, %v13176_v55  ;;  %v13362_v57 = vsub.s32 %v13145_v35, %v4233_v15 }
 0x4bd   : > { %v3914_v14 = vadd.f32 %v13273_v22, %v3866_v62  ;;  %v3867_v54 = vmul.f32 %v10681_v20, %v13233_v24  ;;  %v4255_v58 = vmul.u32 18, %v4254_v1  ;;  %vm13366_vm15 = vcmp.lt.s32.totalorder %v4744_v36, 16 }
 0x4be   : > { %v13375_v20 = vsub.s32 %v13153_v17, %v4244_v52  ;;  %v13378_v35 = vmul.u32.u64.low 3817748708, %v13341_v8  ;;  %v13379_v15 = vmul.u32.u64.high 3817748708, %v13341_v8, %v13378_v35  ;;  %v13382_v1 = vadd.s32 120, %v13089_v30 }
 0x4bf   : > { %vm3955_vm13 = vcmp.gt.f32.partialorder %v3914_v14, 0.0  ;;  %v4003_v55 = vmul.f32 %v13322_v38, %v3914_v14  ;;  %v3915_v42 = vadd.f32 %v13273_v22, %v3867_v54  ;;  %vm13386_vm2 = vcmp.lt.s32.totalorder %v4745_v21, 16 }
 0x4c0   : > { %v3660_v26 = vpop.f32.mrb[4].mxu0  ;;  %vm4587_vm3 = vcmp.ne.s32.totalorder %v13362_v57, 0  ;;  %v13394_v35 = vsub.s32 %v13172_v12, %v4255_v58  ;;  %v13404_v12 = vmul.u32.u64.low 3817748708, %v13382_v1  ;;  %v13405_v58 = vmul.u32.u64.high 3817748708, %v13382_v1, %v13404_v12 }
 0x4c1   : > { %v4044_v36 = vsel %vm3955_vm13, %v3914_v14, %v4003_v55  ;;  %vm3956_vm1 = vcmp.gt.f32.partialorder %v3915_v42, 0.0  ;;  %v4004_v54 = vmul.f32 %v13322_v38, %v3915_v42  ;;  %v10682_v43 = vadd.f32 %v3660_v26, %v12872_v45  ;;  %v10118_v47 = vpop.f32.mrb[5].mxu0 }
 0x4c2   : > { %v4906_v17 = vsel %vm13235_vm0, %v4044_v36, 0.0  ;;  %v3663_v52 = vpop.f32.mrb[6].mxu0  ;;  %v4265_v14 = vshrl.u32 %v13303_v28, 4  ;;  %v4276_v26 = vshrl.u32 %v13317_v7, 4  ;;  %vm4628_vm0 = vcmp.lt.s32.totalorder %v13362_v57, 0 }
 0x4c3   : > { %4947 = vst [vmem:[#allocation3 + $0x1] sm:$0xff] %v4906_v17  ;;  %v4045_v55 = vsel %vm3956_vm1, %v3915_v42, %v4004_v54  ;;  %v3868_v45 = vmul.f32 %v10682_v43, %v13233_v24  ;;  %v10683_v47 = vadd.f32 %v3663_v52, %v12876_v51  ;;  %v10119_v21 = vpop.f32.mrb[7].mxu0  ;;  %vm4588_vm4 = vcmp.ne.s32.totalorder %v13375_v20, 0  ;;  %vm13426_vm13 = vmand %vm4628_vm0, %vm4587_vm3 }
 0x4c4   : > { %4995 = vst [vmem:[#allocation3] sm:$0xff] %v11894_v37  ;;  %v4907_v27 = vsel %vm13275_vm7, %v4045_v55, 0.0  ;;  %vm4629_vm5 = vcmp.lt.s32.totalorder %v13375_v20, 0  ;;  %vm4589_vm6 = vcmp.ne.s32.totalorder %v13394_v35, 0  ;;  %vm4630_vm7 = vcmp.lt.s32.totalorder %v13394_v35, 0 }
 0x4c5   : > { %4948 = vst [vmem:[#allocation3 + $0x9] sm:$0xff] %v4907_v27  ;;  %v3916_v28 = vadd.f32 %v13273_v22, %v3868_v45  ;;  %v3869_v43 = vmul.f32 %v10683_v47, %v13233_v24  ;;  %v4266_v51 = vmul.u32 18, %v4265_v14  ;;  %vm13418_vm10 = vcmp.lt.s32.totalorder %v4746_v6, 16  ;;  %vm13455_vm0 = vmand %vm4629_vm5, %vm4588_vm4 }
 0x4c6   : > { %4996 = vst [vmem:[#allocation3 + $0x8] sm:$0xff] %v11894_v37  ;;  %v4277_v54 = vmul.u32 18, %v4276_v26  ;;  %v13431_v14 = vadd.s32 18, %v13362_v57  ;;  %v13434_v55 = vadd.s32 18, %v13375_v20  ;;  %v13437_v6 = vadd.s32 18, %v13394_v35 }
 0x4c7   : > { %vm3957_vm9 = vcmp.gt.f32.partialorder %v3916_v28, 0.0  ;;  %v4005_v7 = vmul.f32 %v13322_v38, %v3916_v28  ;;  %v3917_v42 = vadd.f32 %v13273_v22, %v3869_v43  ;;  %v4287_v45 = vshrl.u32 %v13379_v15, 4 }
 0x4c8   : > { %v3668_v17 = vpop.f32.mrb[8].mxu0  ;;  %v15279_v12 = vsel %vm13283_vm8, %v13225_v11, %v13188_v49  ;;  %vm13465_vm8 = vmand %vm4630_vm7, %vm4589_vm6  ;;  %v13470_v49 = vsub.s32 %v13228_v2, %v4266_v51 }
 0x4c9   : > { %v4046_v47 = vsel %vm3957_vm9, %v3916_v28, %v4005_v7  ;;  %vm3958_vm1 = vcmp.gt.f32.partialorder %v3917_v42, 0.0  ;;  %v4006_v21 = vmul.f32 %v13322_v38, %v3917_v42  ;;  %v10684_v26 = vadd.f32 %v3668_v17, %v12881_v56  ;;  %v10122_v27 = vpop.f32.mrb[9].mxu0 }
 0x4ca   : > { %vm13447_vm3 = vcmp.lt.s32.totalorder %v15279_v12, 16  ;;  %v4908_v56 = vsel %vm13366_vm15, %v4046_v47, 0.0  ;;  %v3671_v28 = vpop.f32.mrb[10].mxu0  ;;  %v13473_v11 = vmul.u32.u64.low 3817748708, %v13414_v0  ;;  %v13474_v7 = vmul.u32.u64.high 3817748708, %v13414_v0, %v13473_v11 }
 0x4cb   : > { %4949 = vst [vmem:[#allocation3 + $0x11] sm:$0xff] %v4908_v56  ;;  %v13476_v17 = vsel %vm3958_vm1, %v3917_v42, %v4006_v21  ;;  %v3870_v5 = vmul.f32 %v10684_v26, %v13233_v24  ;;  %v10685_v47 = vadd.f32 %v3671_v28, %v12889_v63  ;;  %v10123_v27 = vpop.f32.mrb[11].mxu0  ;;  %v13481_v12 = vsub.s32 %v13253_v33, %v4277_v54 }
 0x4cc   : > { %4997 = vst [vmem:[#allocation3 + $0x10] sm:$0x3] %v11894_v37  ;;  %v4909_v2 = vsel %vm13386_vm2, %v13476_v17, 0.0  ;;  %v4288_v42 = vmul.u32 18, %v4287_v45  ;;  %v4298_v21 = vshrl.u32 %v13405_v58, 4  ;;  %vm4590_vm15 = vcmp.ne.s32.totalorder %v13470_v49, 0 }
 0x4cd   : > { %4950 = vst [vmem:[#allocation3 + $0x19] sm:$0xff] %v4909_v2  ;;  %v3918_v63 = vadd.f32 %v13273_v22, %v3870_v5  ;;  %v3871_v26 = vmul.f32 %v10685_v47, %v13233_v24  ;;  %vm4631_vm4 = vcmp.lt.s32.totalorder %v13470_v49, 0  ;;  %v13504_v58 = vadd.s32 18, %v13470_v49  ;;  %v5071_v37 = vld [vmem:[#allocation3 + $0x1] sm:$0xff] }
 0x4ce   : > { %v13507_v54 = vadd.s32 136, %v13089_v30  ;;  %v15286_v28 = vsel %vm13293_vm11, %v13250_v41, %v13199_v16  ;;  %vm4591_vm7 = vcmp.ne.s32.totalorder %v13481_v12, 0  ;;  %v13523_v47 = vadd.s32 18, %v13481_v12 }
 0x4cf   : > { %vm3959_vm5 = vcmp.gt.f32.partialorder %v3918_v63, 0.0  ;;  %v4007_v45 = vmul.f32 %v13322_v38, %v3918_v63  ;;  %v3919_v56 = vadd.f32 %v13273_v22, %v3871_v26  ;;  %vm13516_vm6 = vcmp.lt.s32.totalorder %v15286_v28, 16 }
 0x4d0   : > { %v3676_v5 = vpop.f32.mrb[12].mxu0  ;;  %v13526_v27 = vsub.s32 %v13341_v8, %v4288_v42  ;;  %v4299_v2 = vmul.u32 18, %v4298_v21  ;;  %v15289_v28 = vsel %vm13311_vm12, %v13266_v61, %v13206_v19  ;;  %vm12035_vm9 = vmmov 1  }
 0x4d1   : > { %v4048_v29 = vsel %vm3959_vm5, %v3918_v63, %v4007_v45  ;;  %vm3960_vm1 = vcmp.gt.f32.partialorder %v3919_v56, 0.0  ;;  %v4008_v16 = vmul.f32 %v13322_v38, %v3919_v56  ;;  %v10686_v41 = vadd.f32 %v3676_v5, %v12895_v4  ;;  %v10126_v26 = vpop.f32.mrb[13].mxu0  ;;  %vm13566_vm5 = vmand %vm4631_vm4, %vm4590_vm15 }
 0x4d2   : > { %vm13535_vm11 = vcmp.lt.s32.totalorder %v15289_v28, 16  ;;  %v4910_v8 = vsel %vm13418_vm10, %v4048_v29, 0.0  ;;  %v3679_v42 = vpop.f32.mrb[14].mxu0  ;;  %v13542_v21 = vmul.u32.u64.low 3817748708, %v13507_v54  ;;  %v13543_v63 = vmul.u32.u64.high 3817748708, %v13507_v54, %v13542_v21  ;;  %vm11900_vm15 = vmpackc.low %vm13386_vm2, %vm12035_vm9 }
 0x4d3   : > { %v13546_v4 = vadd.s32 144, %v13089_v30  ;;  %4951 = vst [vmem:[#allocation3 + $0x21] sm:$0xff] %v4910_v8  ;;  %v4049_v3 = vsel %vm3960_vm1, %v3919_v56, %v4008_v16  ;;  %v3872_v19 = vmul.f32 %v10686_v41, %v13233_v24  ;;  %v10687_v61 = vadd.f32 %v3679_v42, %v12903_v9  ;;  %v10127_v45 = vpop.f32.mrb[15].mxu0  ;;  %v5072_v5 = vld [vmem:[#allocation3 + $0x9] sm:$0xff]  ;;  %v5073_v26 = vld [vmem:[#allocation3 + $0x11] sm:$0xff]  ;;  %vm11903_vm2 = vmpackc.low %vm13447_vm3, %vm13418_vm10 }
 0x4d4   : > { %v4309_v28 = vshrl.u32 %v13474_v7, 4  ;;  %v4911_v51 = vsel %vm13447_vm3, %v4049_v3, 0.0  ;;  %v5107_v60 = vpack.c.bf16 %v5072_v5, %v5071_v37  ;;  %v13554_v21 = vadd.s32 152, %v13089_v30  ;;  %v11821_v9 = vld [vmem:[%s15220_s5 + $0x8] sm:$0xff]  }
 0x4d5   : > { %4952 = vst [vmem:[#allocation3 + $0x29] sm:$0xff] %v4911_v51  ;;  %v3920_v8 = vadd.f32 %v13273_v22, %v3872_v19  ;;  %v3873_v56 = vmul.f32 %v10687_v61, %v13233_v24  ;;  %v13572_v51 = vadd.s32 18, %v13526_v27  ;;  %v11901_v42 = vpack.c.bf16 %v13476_v17, %v5073_v26 }
 0x4d6   : > { %10212 = vmatprep.mubr.bf16.mxu1 %v5107_v60  ;;  %v13575_v37 = vmul.u32.u64.low 3817748708, %v13546_v4  ;;  %v13576_v16 = vmul.u32.u64.high 3817748708, %v13546_v4, %v13575_v37  ;;  %v15294_v19 = vsel %vm13336_vm14, %v13298_v44, %v13213_v32  ;;  %vm15297_vm1 = vcmp.lt.s32.totalorder %v13481_v12, 0 }
 0x4d7   : > { %v4009_v60 = vmul.f32 %v13322_v38, %v3920_v8  ;;  %v3921_v41 = vadd.f32 %v13273_v22, %v3873_v56  ;;  %11902 = vmatmul.mubr.msk.bf16.vlgmr.msra.gmra.mrb[84].mxu1 %vm11900_vm15, %v11901_v42  ;;  %vm13588_vm4 = vcmp.lt.s32.totalorder %v15294_v19, 16  ;;  %vm13596_vm12 = vmand %vm15297_vm1, %vm4591_vm7  ;;  %v4310_v62 = vmul.u32 18, %v4309_v28 }
 0x4d8   : > { %v3684_v17 = vpop.f32.mrb[16].mxu0  ;;  %v11904_v32 = vpack.c.bf16 %v4049_v3, %v4048_v29  ;;  %v13605_v44 = vsub.s32 %v13382_v1, %v4299_v2  ;;  %v13608_v10 = vmul.u32.u64.low 3817748708, %v13554_v21  ;;  %v13609_v5 = vmul.u32.u64.high 3817748708, %v13554_v21, %v13608_v10  ;;  %10249 = vmatpush3.bf16.msra.mxu1 %v13105_v50 }
 0x4d9   : > { %v13612_v26 = vadd.s32 160, %v13089_v30  ;;  %vm15300_vm14 = vcmp.gt.f32.partialorder %v3920_v8, 0.0  ;;  %vm3962_vm7 = vcmp.gt.f32.partialorder %v3921_v41, 0.0  ;;  %v4010_v36 = vmul.f32 %v13322_v38, %v3921_v41  ;;  %v10130_v29 = vpop.f32.mrb[17].mxu0  ;;  %10250 = vmatprep.subr.bf16.mxu1 %v11821_v9 }
 0x4da   : > { %11905 = vmatprep.mubr.msk.bf16.mxu1 %vm11903_vm2, %v11904_v32  ;;  %v4050_v28 = vsel %vm15300_vm14, %v3920_v8, %v4009_v60  ;;  %v10688_v43 = vadd.f32 %v3684_v17, %v12909_v13  ;;  %v15301_v1 = vsel %vm13426_vm13, %v13431_v14, %v13362_v57  ;;  %vm15304_vm3 = vcmp.ne.s32.totalorder %v13526_v27, 0  ;;  %v11822_v13 = vld [vmem:[%s15220_s5 + $0x10] sm:$0xff]   ;;  %v3687_v52 = vpop.f32.mrb[18].mxu0 }
 0x4db   : > { %vm13623_vm10 = vcmp.lt.s32.totalorder %v15301_v1, 16  ;;  %vm15305_vm9 = vcmp.lt.s32.totalorder %v13526_v27, 0  ;;  %v4912_v57 = vsel %vm13516_vm6, %v4050_v28, 0.0  ;;  %v4754_v14 = vsel %vm13566_vm5, %v13504_v58, %v13470_v49  ;;  %v10131_v42 = vpop.f32.mrb[19].mxu0 }
 0x4dc   : > { %vm13631_vm1 = vmand %vm15305_vm9, %vm15304_vm3  ;;  %v4755_v3 = vsel %vm13596_vm12, %v13523_v47, %v13481_v12  ;;  %v4320_v8 = vshrl.u32 %v13543_v63, 4  ;;  %4953 = vst [vmem:[#allocation3 + $0x31] sm:$0xff] %v4912_v57  ;;  %v4051_v56 = vsel %vm3962_vm7, %v3921_v41, %v4010_v36  ;;  %v3874_v37 = vmul.f32 %v10688_v43, %v13233_v24  ;;  %10251 = vmatpush3.bf16.msra.mxu1 %v11821_v9 }
 0x4dd   : > { %v10689_v60 = vadd.f32 %v3687_v52, %v12917_v18  ;;  %v13652_v19 = vsub.s32 %v13414_v0, %v4310_v62  ;;  %v4913_v17 = vsel %vm13535_vm11, %v4051_v56, 0.0  ;;  %v4756_v32 = vsel %vm13631_vm1, %v13572_v51, %v13526_v27  ;;  %10252 = vmatprep.subr.bf16.mxu1 %v11822_v13  ;;  %v11823_v0 = vld [vmem:[%s15220_s5 + $0x18] sm:$0xff]   ;;  %vm11906_vm7 = vmpackc.low %vm13535_vm11, %vm13516_vm6 }
 0x4de   : > { %v13661_v63 = vmul.u32.u64.low 3817748708, %v13612_v26  ;;  %v13662_v10 = vmul.u32.u64.high 3817748708, %v13612_v26, %v13661_v63  ;;  %4954 = vst [vmem:[#allocation3 + $0x39] sm:$0xff] %v4913_v17  ;;  %v3922_v18 = vadd.f32 %v13273_v22, %v3874_v37  ;;  %vm4593_vm13 = vcmp.ne.s32.totalorder %v13605_v44, 0 }
 0x4df   : > { %v3875_v41 = vmul.f32 %v10689_v60, %v13233_v24  ;;  %vm4634_vm15 = vcmp.lt.s32.totalorder %v13605_v44, 0  ;;  %v13672_v62 = vadd.s32 18, %v13605_v44  ;;  %v4321_v36 = vmul.u32 18, %v4320_v8 }
 0x4e0   : > { %v13675_v9 = vadd.s32 168, %v13089_v30  ;;  %vm3963_vm2 = vcmp.gt.f32.partialorder %v3922_v18, 0.0  ;;  %v4011_v43 = vmul.f32 %v13322_v38, %v3922_v18  ;;  %v15308_v1 = vsel %vm13455_vm0, %v13434_v55, %v13375_v20  ;;  %v3692_v8 = vpop.f32.mrb[20].mxu0  ;;  %10253 = vmatpush3.bf16.msra.mxu1 %v11822_v13  ;;  %vm13719_vm11 = vmand %vm4634_vm15, %vm4593_vm13 }
 0x4e1   : > { %v3923_v29 = vadd.f32 %v13273_v22, %v3875_v41  ;;  %vm13684_vm14 = vcmp.lt.s32.totalorder %v15308_v1, 16  ;;  %v11907_v52 = vpack.c.bf16 %v4051_v56, %v4050_v28  ;;  %vm4594_vm3 = vcmp.ne.s32.totalorder %v13652_v19, 0  ;;  %v10134_v28 = vpop.f32.mrb[21].mxu0  ;;  %10254 = vmatprep.subr.bf16.mxu1 %v11823_v0 }
 0x4e2   : > { %vm4635_vm9 = vcmp.lt.s32.totalorder %v13652_v19, 0  ;;  %v13695_v15 = vadd.s32 18, %v13652_v19  ;;  %v4331_v20 = vshrl.u32 %v13576_v16, 4  ;;  %v4342_v55 = vshrl.u32 %v13609_v5, 4  ;;  %v11824_v16 = vld [vmem:[%s15220_s5 + $0x20] sm:$0xff]   ;;  %v3695_v13 = vpop.f32.mrb[22].mxu0 }
 0x4e3   : > { %11908 = vmatmul.mubr.msk.bf16.gmra.mrb[88].mxu1 %vm11906_vm7, %v11907_v52  ;;  %v4052_v37 = vsel %vm3963_vm2, %v3922_v18, %v4011_v43  ;;  %vm3964_vm0 = vcmp.gt.f32.partialorder %v3923_v29, 0.0  ;;  %v4012_v33 = vmul.f32 %v13322_v38, %v3923_v29  ;;  %v10690_v11 = vadd.f32 %v3692_v8, %v12923_v23  ;;  %v10135_v18 = vpop.f32.mrb[23].mxu0  ;;  %vm11909_vm2 = vmpackc.low %vm13623_vm10, %vm13588_vm4 }
 0x4e4   : > { %v15311_v56 = vsel %vm13465_vm8, %v13437_v6, %v13394_v35  ;;  %v4914_v5 = vsel %vm13588_vm4, %v4052_v37, 0.0  ;;  %v13724_v35 = vmul.u32.u64.low 3817748708, %v13675_v9  ;;  %v13725_v6 = vmul.u32.u64.high 3817748708, %v13675_v9, %v13724_v35  ;;  %vm13736_vm8 = vmand %vm4635_vm9, %vm4594_vm3  ;;  %10255 = vmatpush3.bf16.msra.mxu1 %v11823_v0 }
 0x4e5   : > { %vm13706_vm6 = vcmp.lt.s32.totalorder %v15311_v56, 16  ;;  %4955 = vst [vmem:[#allocation3 + $0x41] sm:$0xff] %v4914_v5  ;;  %v4053_v42 = vsel %vm3964_vm0, %v3923_v29, %v4012_v33  ;;  %v3876_v17 = vmul.f32 %v10690_v11, %v13233_v24  ;;  %v10691_v63 = vadd.f32 %v3695_v13, %v12931_v25  ;;  %10256 = vmatprep.subr.bf16.mxu1 %v11824_v16 }
 0x4e6   : > { %v13741_v43 = vsub.s32 %v13507_v54, %v4321_v36  ;;  %v4915_v1 = vsel %vm13623_vm10, %v4053_v42, 0.0  ;;  %v4332_v29 = vmul.u32 18, %v4331_v20  ;;  %v4353_v52 = vshrl.u32 %v13662_v10, 4  ;;  %v11825_v36 = vld [vmem:[%s15220_s5 + $0x28] sm:$0xff]  }
 0x4e7   : > { %v13747_v25 = vadd.s32 184, %v13089_v30  ;;  %4956 = vst [vmem:[#allocation3 + $0x49] sm:$0xff] %v4915_v1  ;;  %v3924_v8 = vadd.f32 %v13273_v22, %v3876_v17  ;;  %v3877_v33 = vmul.f32 %v10691_v63, %v13233_v24  ;;  %v4757_v54 = vsel %vm13719_vm11, %v13672_v62, %v13605_v44 }
 0x4e8   : > { %v4758_v10 = vsel %vm13736_vm8, %v13695_v15, %v13652_v19  ;;  %v4343_v0 = vmul.u32 18, %v4342_v55  ;;  %v13763_v20 = vmul.u32.u64.low 3817748708, %v13728_v40  ;;  %v13764_v11 = vmul.u32.u64.high 3817748708, %v13728_v40, %v13763_v20  ;;  %v3700_v13 = vpop.f32.mrb[24].mxu0  ;;  %10257 = vmatpush3.bf16.msra.mxu1 %v11824_v16  ;;  %v11826_v16 = vld [vmem:[%s15220_s5 + $0x30] sm:$0xff]  }
 0x4e9   : > { %vm3965_vm13 = vcmp.gt.f32.partialorder %v3924_v8, 0.0  ;;  %v4013_v28 = vmul.f32 %v13322_v38, %v3924_v8  ;;  %v3925_v56 = vadd.f32 %v13273_v22, %v3877_v33  ;;  %vm13773_vm15 = vcmp.lt.s32.totalorder %v4754_v14, 16  ;;  %10258 = vmatprep.subr.bf16.mxu1 %v11825_v36 }
 0x4ea   : > { %v11910_v55 = vpack.c.bf16 %v4053_v42, %v4052_v37  ;;  %vm4595_vm7 = vcmp.ne.s32.totalorder %v13741_v43, 0  ;;  %v13783_v35 = vsub.s32 %v13546_v4, %v4332_v29  ;;  %v4354_v7 = vmul.u32 18, %v4353_v52  ;;  %v10138_v37 = vpop.f32.mrb[25].mxu0 }
 0x4eb   : > { %v13786_v49 = vmul.u32.u64.low 3817748708, %v13747_v25  ;;  %v13787_v58 = vmul.u32.u64.high 3817748708, %v13747_v25, %v13786_v49  ;;  %v4054_v14 = vsel %vm3965_vm13, %v3924_v8, %v4013_v28  ;;  %vm3966_vm5 = vcmp.gt.f32.partialorder %v3925_v56, 0.0  ;;  %v3703_v17 = vpop.f32.mrb[26].mxu0 }
 0x4ec   : > { %11911 = vmatprep.mubr.msk.bf16.mxu1 %vm11909_vm2, %v11910_v55  ;;  %v4014_v61 = vmul.f32 %v13322_v38, %v3925_v56  ;;  %v10692_v2 = vadd.f32 %v3700_v13, %v12933_v31  ;;  %vm13796_vm4 = vcmp.lt.s32.totalorder %v4755_v3, 16  ;;  %v4916_v42 = vsel %vm13684_vm14, %v4054_v14, 0.0  ;;  %v10139_v63 = vpop.f32.mrb[27].mxu0  ;;  %10259 = vmatpush3.bf16.msra.mxu1 %v11825_v36  ;;  %v11828_v55 = vld [vmem:[%s15220_s5 + $0x80] sm:$0xff]  }
 0x4ed   : > { %vm4636_vm10 = vcmp.lt.s32.totalorder %v13741_v43, 0  ;;  %v13807_v31 = vadd.s32 18, %v13741_v43  ;;  %v13810_v12 = vsub.s32 %v13554_v21, %v4343_v0  ;;  %4957 = vst [vmem:[#allocation3 + $0x51] sm:$0xff] %v4916_v42  ;;  %v10693_v3 = vadd.f32 %v3703_v17, %v12937_v34  ;;  %10260 = vmatprep.subr.bf16.mxu1 %v11826_v16 }
 0x4ee   : > { %v4055_v47 = vsel %vm3966_vm5, %v3925_v56, %v4014_v61  ;;  %v3878_v45 = vmul.f32 %v10692_v2, %v13233_v24  ;;  %v4364_v18 = vshrl.u32 %v13725_v6, 4  ;;  %vm4596_vm12 = vcmp.ne.s32.totalorder %v13783_v35, 0  ;;  %v11827_v6 = vld [vmem:[%s15220_s5 + $0x38] sm:$0xff]   ;;  %vm11912_vm5 = vmpackc.low %vm13706_vm6, %vm13684_vm14 }
 0x4ef   : > { %v4917_v1 = vsel %vm13706_vm6, %v4055_v47, 0.0  ;;  %vm4637_vm3 = vcmp.lt.s32.totalorder %v13783_v35, 0  ;;  %v13820_v29 = vsub.s32 %v13612_v26, %v4354_v7  ;;  %v3879_v52 = vmul.f32 %v10693_v3, %v13233_v24  ;;  %vm13877_vm6 = vmand %vm4636_vm10, %vm4595_vm7 }
 0x4f0   : > { %4958 = vst [vmem:[#allocation3 + $0x59] sm:$0xff] %v4917_v1  ;;  %v3926_v21 = vadd.f32 %v13273_v22, %v3878_v45  ;;  %v13825_v34 = vadd.s32 18, %v13783_v35  ;;  %v13833_v26 = vadd.s32 18, %v13810_v12  ;;  %v4375_v8 = vshrl.u32 %v13764_v11, 4  ;;  %v3708_v28 = vpop.f32.mrb[28].mxu0  ;;  %10261 = vmatpush3.bf16.msra.mxu1 %v11826_v16  ;;  %vm13893_vm11 = vmand %vm4637_vm3, %vm4596_vm12 }
 0x4f1   : > { %v3927_v36 = vadd.f32 %v13273_v22, %v3879_v52  ;;  %vm13843_vm2 = vcmp.lt.s32.totalorder %v4756_v32, 16  ;;  %v11913_v20 = vpack.c.bf16 %v4055_v47, %v4054_v14  ;;  %v4365_v11 = vmul.u32 18, %v4364_v18  ;;  %v10142_v60 = vpop.f32.mrb[29].mxu0  ;;  %10262 = vmatprep.subr.bf16.mxu1 %v11827_v6 }
 0x4f2   : > { %vm3967_vm13 = vcmp.gt.f32.partialorder %v3926_v21, 0.0  ;;  %v4015_v33 = vmul.f32 %v13322_v38, %v3926_v21  ;;  %vm4598_vm0 = vcmp.ne.s32.totalorder %v13820_v29, 0  ;;  %vm4639_vm9 = vcmp.lt.s32.totalorder %v13820_v29, 0  ;;  %v3711_v7 = vpop.f32.mrb[30].mxu0 }
 0x4f3   : > { %11914 = vmatmul.mubr.msk.bf16.gmra.mrb[92].mxu1 %vm11912_vm5, %v11913_v20  ;;  %v4386_v50 = vshrl.u32 %v13787_v58, 4  ;;  %v13855_v27 = vadd.s32 192, %v13089_v30  ;;  %vm3968_vm1 = vcmp.gt.f32.partialorder %v3927_v36, 0.0  ;;  %v4016_v32 = vmul.f32 %v13322_v38, %v3927_v36  ;;  %v10143_v14 = vpop.f32.mrb[31].mxu0  ;;  %vm13924_vm12 = vmand %vm4639_vm9, %vm4598_vm0 }
 0x4f4   : > { %v4056_v51 = vsel %vm3967_vm13, %v3926_v21, %v4015_v33  ;;  %v10694_v57 = vadd.f32 %v3708_v28, %v12939_v39  ;;  %vm13864_vm14 = vcmp.lt.s32.totalorder %v4757_v54, 16  ;;  %v13882_v44 = vadd.s32 18, %v13820_v29  ;;  %10263 = vmatpush3.bf16.msra.mxu1 %v11827_v6  ;;  %vm11915_vm0 = vmpackc.low %vm13796_vm4, %vm13773_vm15 }
 0x4f5   : > { %v4918_v13 = vsel %vm13773_vm15, %v4056_v51, 0.0  ;;  %v4376_v62 = vmul.u32 18, %v4375_v8  ;;  %v13885_v23 = vadd.s32 200, %v13089_v30  ;;  %v4057_v54 = vsel %vm3968_vm1, %v3927_v36, %v4016_v32  ;;  %10300 = vmatprep.subr.bf16.mxu1 %v11828_v55 }
 0x4f6   : > { %4959 = vst [vmem:[#allocation3 + $0x61] sm:$0xff] %v4918_v13  ;;  %v3880_v49 = vmul.f32 %v10694_v57, %v13233_v24  ;;  %v10695_v58 = vadd.f32 %v3711_v7, %v12943_v59  ;;  %v13898_v2 = vsub.s32 %v13675_v9, %v4365_v11  ;;  %v4919_v37 = vsel %vm13796_vm4, %v4057_v54, 0.0 }
 0x4f7   : > { %vm15330_vm7 = vcmp.ne.s32.totalorder %v13810_v12, 0  ;;  %vm15331_vm10 = vcmp.lt.s32.totalorder %v13810_v12, 0  ;;  %v4387_v16 = vmul.u32 18, %v4386_v50  ;;  %4960 = vst [vmem:[#allocation3 + $0x69] sm:$0xff] %v4919_v37  ;;  %v4759_v45 = vsel %vm13877_vm6, %v13807_v31, %v13741_v43 }
 0x4f8   : > { %vm13906_vm13 = vmand %vm15331_vm10, %vm15330_vm7  ;;  %v13911_v42 = vmul.u32.u64.low 3817748708, %v13855_v27  ;;  %v13912_v17 = vmul.u32.u64.high 3817748708, %v13855_v27, %v13911_v42  ;;  %v3928_v9 = vadd.f32 %v13273_v22, %v3880_v49  ;;  %v3881_v47 = vmul.f32 %v10695_v58, %v13233_v24  ;;  %v3716_v41 = vpop.f32.mrb[32].mxu0 }
 0x4f9   : > { %v4760_v63 = vsel %vm13893_vm11, %v13825_v34, %v13783_v35  ;;  %v13933_v18 = vsub.s32 %v13728_v40, %v4376_v62  ;;  %v13936_v1 = vmul.u32.u64.low 3817748708, %v13885_v23  ;;  %v13937_v43 = vmul.u32.u64.high 3817748708, %v13885_v23, %v13936_v1  ;;  %v10146_v8 = vpop.f32.mrb[33].mxu0 }
 0x4fa   : > { %vm3969_vm3 = vcmp.gt.f32.partialorder %v3928_v9, 0.0  ;;  %v4017_v31 = vmul.f32 %v13322_v38, %v3928_v9  ;;  %v3929_v21 = vadd.f32 %v13273_v22, %v3881_v47  ;;  %vm13946_vm9 = vcmp.lt.s32.totalorder %v4758_v10, 16  ;;  %v3719_v20 = vpop.f32.mrb[34].mxu0 }
 0x4fb   : > { %v11916_v40 = vpack.c.bf16 %v4057_v54, %v4056_v51  ;;  %v4761_v6 = vsel %vm13906_vm13, %v13833_v26, %v13810_v12  ;;  %v4762_v19 = vsel %vm13924_vm12, %v13882_v44, %v13820_v29  ;;  %vm4599_vm8 = vcmp.ne.s32.totalorder %v13898_v2, 0  ;;  %v10147_v51 = vpop.f32.mrb[35].mxu0  ;;  %v14256_v12 = vld [vmem:[%s15219_s4] ss:$0 sm:$0xff] }
 0x4fc   : > { %vm4640_vm5 = vcmp.lt.s32.totalorder %v13898_v2, 0  ;;  %v13965_v15 = vsub.s32 %v13747_v25, %v4387_v16  ;;  %v4058_v10 = vsel %vm3969_vm3, %v3928_v9, %v4017_v31  ;;  %vm3970_vm15 = vcmp.gt.f32.partialorder %v3929_v21, 0.0  ;;  %vm11918_vm3 = vmpackc.low %vm13864_vm14, %vm13843_vm2 }
 0x4fd   : > { %11917 = vmatprep.mubr.msk.bf16.mxu1 %vm11915_vm0, %v11916_v40  ;;  %v4018_v5 = vmul.f32 %v13322_v38, %v3929_v21  ;;  %v10696_v4 = vadd.f32 %v3716_v41, %v12945_v46  ;;  %vm13969_vm4 = vcmp.lt.s32.totalorder %v4759_v45, 16  ;;  %v4920_v36 = vsel %vm13843_vm2, %v4058_v10, 0.0  ;;  %vm14033_vm2 = vmand %vm4640_vm5, %vm4599_vm8 }
 0x4fe   : > { %v13976_v11 = vadd.s32 18, %v13898_v2  ;;  %vm4600_vm1 = vcmp.ne.s32.totalorder %v13933_v18, 0  ;;  %v13980_v25 = vadd.s32 208, %v13089_v30  ;;  %4961 = vst [vmem:[#allocation3 + $0x71] sm:$0xff] %v4920_v36  ;;  %v10697_v50 = vadd.f32 %v3719_v20, %v12949_v48 }
 0x4ff   : > { %v4059_v28 = vsel %vm3970_vm15, %v3929_v21, %v4018_v5  ;;  %v3882_v46 = vmul.f32 %v10696_v4, %v13233_v24  ;;  %vm4641_vm6 = vcmp.lt.s32.totalorder %v13933_v18, 0  ;;  %v13988_v57 = vadd.s32 18, %v13933_v18  ;;  %v15340_v5 = vld [vmem:[#allocation11_spill] sm:$0xff] }
 0x500   : > { %v4921_v32 = vsel %vm13864_vm14, %v4059_v28, 0.0  ;;  %v4397_v60 = vshrl.u32 %v13912_v17, 4  ;;  %v13992_v55 = vadd.s32 216, %v13089_v30  ;;  %v3883_v7 = vmul.f32 %v10697_v50, %v13233_v24  ;;  %v3724_v37 = vpop.f32.mrb[36].mxu0  ;;  %vm14046_vm14 = vmand %vm4641_vm6, %vm4600_vm1 }
 0x501   : > { %4962 = vst [vmem:[#allocation3 + $0x79] sm:$0xff] %v4921_v32  ;;  %v3930_v13 = vadd.f32 %v13273_v22, %v3882_v46  ;;  %vm4601_vm7 = vcmp.ne.s32.totalorder %v13965_v15, 0  ;;  %v4408_v48 = vshrl.u32 %v13937_v43, 4  ;;  %v14003_v54 = vadd.s32 224, %v13089_v30  ;;  %v10150_v45 = vpop.f32.mrb[37].mxu0  ;;  %vm11921_vm6 = vmpackc.low %vm13969_vm4, %vm13946_vm9 }
 0x502   : > { %v13999_v39 = vmul.u32.u64.low 3817748708, %v13980_v25  ;;  %v14000_v62 = vmul.u32.u64.high 3817748708, %v13980_v25, %v13999_v39  ;;  %v3931_v58 = vadd.f32 %v13273_v22, %v3883_v7  ;;  %v11919_v14 = vpack.c.bf16 %v4059_v28, %v4058_v10  ;;  %v3727_v43 = vpop.f32.mrb[38].mxu0 }
 0x503   : > { %vm3971_vm10 = vcmp.gt.f32.partialorder %v3930_v13, 0.0  ;;  %v4019_v49 = vmul.f32 %v13322_v38, %v3930_v13  ;;  %vm4642_vm0 = vcmp.lt.s32.totalorder %v13965_v15, 0  ;;  %v4398_v16 = vmul.u32 18, %v4397_v60  ;;  %v10151_v8 = vpop.f32.mrb[39].mxu0 }
 0x504   : > { %11920 = vmatmul.mubr.msk.bf16.gmra.mrb[96].mxu1 %vm11918_vm3, %v11919_v14  ;;  %v14013_v42 = vmul.u32.u64.low 3817748708, %v13992_v55  ;;  %v14014_v17 = vmul.u32.u64.high 3817748708, %v13992_v55, %v14013_v42  ;;  %v14017_v9 = vadd.s32 232, %v13089_v30  ;;  %vm3972_vm15 = vcmp.gt.f32.partialorder %v3931_v58, 0.0  ;;  %vm14072_vm5 = vmand %vm4642_vm0, %vm4601_vm7 }
 0x505   : > { %v4060_v47 = vsel %vm3971_vm10, %v3930_v13, %v4019_v49  ;;  %v4020_v0 = vmul.f32 %v13322_v38, %v3931_v58  ;;  %v10698_v56 = vadd.f32 %v3724_v37, %v12951_v53  ;;  %v4409_v31 = vmul.u32 18, %v4408_v48  ;;  %v15356_v49 = vld [vmem:[#allocation13_spill] sm:$0xff] }
 0x506   : > { %v4922_v1 = vsel %vm13946_vm9, %v4060_v47, 0.0  ;;  %v14024_v21 = vmul.u32.u64.low 3817748708, %v14003_v54  ;;  %v14025_v40 = vmul.u32.u64.high 3817748708, %v14003_v54, %v14024_v21  ;;  %v10699_v4 = vadd.f32 %v3727_v43, %v15340_v5 }
 0x507   : > { %4963 = vst [vmem:[#allocation3 + $0x81] sm:$0xff] %v4922_v1  ;;  %v4061_v41 = vsel %vm3972_vm15, %v3931_v58, %v4020_v0  ;;  %v3884_v10 = vmul.f32 %v10698_v56, %v13233_v24  ;;  %v14038_v36 = vadd.s32 18, %v13965_v15  ;;  %v14051_v46 = vsub.s32 %v13855_v27, %v4398_v16 }
 0x508   : > { %v4923_v20 = vsel %vm13969_vm4, %v4061_v41, 0.0  ;;  %v14054_v50 = vmul.u32.u64.low 3817748708, %v14017_v9  ;;  %v14055_v51 = vmul.u32.u64.high 3817748708, %v14017_v9, %v14054_v50  ;;  %vm14063_vm8 = vcmp.lt.s32.totalorder %v4760_v63, 16 }
 0x509   : > { %4964 = vst [vmem:[#allocation3 + $0x89] sm:$0xff] %v4923_v20  ;;  %v3932_v32 = vadd.f32 %v13273_v22, %v3884_v10  ;;  %v3885_v13 = vmul.f32 %v10699_v4, %v13233_v24  ;;  %vm14081_vm11 = vcmp.lt.s32.totalorder %v4761_v6, 16  ;;  %v4763_v34 = vsel %vm14033_vm2, %v13976_v11, %v13898_v2  ;;  %v3732_v2 = vpop.f32.mrb[40].mxu0  ;;  %v15353_v6 = vld [vmem:[#allocation12_spill] sm:$0xff]  ;;  %v15383_v4 = vld [vmem:[#allocation18_spill] sm:$0xff] }
 0x50a   : > { %v14090_v61 = vsub.s32 %v13885_v23, %v4409_v31  ;;  %v4419_v63 = vshrl.u32 %v14000_v62, 4  ;;  %vm14100_vm13 = vcmp.lt.s32.totalorder %v4762_v19, 16  ;;  %v11922_v26 = vpack.c.bf16 %v4061_v41, %v4060_v47  ;;  %v10154_v33 = vpop.f32.mrb[41].mxu0 }
 0x50b   : > { %vm3973_vm1 = vcmp.gt.f32.partialorder %v3932_v32, 0.0  ;;  %v4021_v59 = vmul.f32 %v13322_v38, %v3932_v32  ;;  %v3933_v7 = vadd.f32 %v13273_v22, %v3885_v13  ;;  %v4764_v23 = vsel %vm14046_vm14, %v13988_v57, %v13933_v18  ;;  %v3735_v11 = vpop.f32.mrb[42].mxu0  ;;  %vm11924_vm14 = vmpackc.low %vm14081_vm11, %vm14063_vm8 }
 0x50c   : > { %11923 = vmatprep.mubr.msk.bf16.mxu1 %vm11921_vm6, %v11922_v26  ;;  %v4765_v29 = vsel %vm14072_vm5, %v14038_v36, %v13965_v15  ;;  %vm4602_vm12 = vcmp.ne.s32.totalorder %v14051_v46, 0  ;;  %vm4643_vm7 = vcmp.lt.s32.totalorder %v14051_v46, 0  ;;  %v4430_v44 = vshrl.u32 %v14014_v17, 4  ;;  %v10155_v14 = vpop.f32.mrb[43].mxu0 }
 0x50d   : > { %v4062_v3 = vsel %vm3973_vm1, %v3932_v32, %v4021_v59  ;;  %vm3974_vm9 = vcmp.gt.f32.partialorder %v3933_v7, 0.0  ;;  %v4022_v52 = vmul.f32 %v13322_v38, %v3933_v7  ;;  %v10700_v19 = vadd.f32 %v3732_v2, %v15353_v6  ;;  %vm14137_vm3 = vmand %vm4643_vm7, %vm4602_vm12  ;;  %v15369_v14 = vld [vmem:[#allocation16_spill] sm:$0xff] }
 0x50e   : > { %vm14121_vm4 = vcmp.lt.s32.totalorder %v4763_v34, 16  ;;  %v4924_v15 = vsel %vm14063_vm8, %v4062_v3, 0.0  ;;  %v14128_v57 = vadd.s32 18, %v14051_v46  ;;  %vm4603_vm10 = vcmp.ne.s32.totalorder %v14090_v61, 0 }
 0x50f   : > { %v4420_v48 = vmul.u32 18, %v4419_v63  ;;  %4965 = vst [vmem:[#allocation3 + $0x91] sm:$0xff] %v4924_v15  ;;  %v4063_v39 = vsel %vm3974_vm9, %v3933_v7, %v4022_v52  ;;  %v3886_v62 = vmul.f32 %v10700_v19, %v13233_v24  ;;  %v10701_v58 = vadd.f32 %v3735_v11, %v15356_v49  ;;  %v14205_v63 = vld [vmem:[%s15217_s2] ss:$0 sm:$0xff]  ;;  %v15366_v7 = vld [vmem:[#allocation15_spill] sm:$0xff] }
 0x510   : > { %v4441_v16 = vshrl.u32 %v14025_v40, 4  ;;  %v4925_v42 = vsel %vm14081_vm11, %v4063_v39, 0.0  ;;  %v4431_v17 = vmul.u32 18, %v4430_v44  ;;  %v4452_v47 = vshrl.u32 %v14055_v51, 4  ;;  %v3740_v5 = vpop.f32.mrb[44].mxu0 }
 0x511   : > { %v14146_v0 = vadd.s32 240, %v13089_v30  ;;  %4966 = vst [vmem:[#allocation3 + $0x99] sm:$0xff] %v4925_v42  ;;  %v3934_v56 = vadd.f32 %v13273_v22, %v3886_v62  ;;  %v3887_v45 = vmul.f32 %v10701_v58, %v13233_v24  ;;  %vm4644_vm0 = vcmp.lt.s32.totalorder %v14090_v61, 0  ;;  %v10158_v51 = vpop.f32.mrb[45].mxu0 }
 0x512   : > { %v4766_v1 = vsel %vm14137_vm3, %v14128_v57, %v14051_v46  ;;  %v14156_v43 = vadd.s32 18, %v14090_v61  ;;  %v14159_v31 = vsub.s32 %v13980_v25, %v4420_v48  ;;  %v14162_v21 = vadd.s32 248, %v13089_v30  ;;  %vm14176_vm5 = vmand %vm4644_vm0, %vm4603_vm10  ;;  %v15363_v46 = vld [vmem:[#allocation14_spill] sm:$0xff]  ;;  %v3743_v60 = vpop.f32.mrb[46].mxu0  ;;  %v15390_v51 = vld [vmem:[#allocation21_spill] sm:$0xff] }
 0x513   : > { %vm3975_vm15 = vcmp.gt.f32.partialorder %v3934_v56, 0.0  ;;  %v4023_v40 = vmul.f32 %v13322_v38, %v3934_v56  ;;  %v3935_v24 = vadd.f32 %v13273_v22, %v3887_v45  ;;  %vm14166_vm2 = vcmp.lt.s32.totalorder %v4764_v23, 16  ;;  %v10159_v23 = vpop.f32.mrb[47].mxu0  ;;  %vm11927_vm10 = vmpackc.low %vm14121_vm4, %vm14100_vm13 }
 0x514   : > { %v11925_v10 = vpack.c.bf16 %v4063_v39, %v4062_v3  ;;  %v4442_v25 = vmul.u32 18, %v4441_v16  ;;  %v14181_v22 = vsub.s32 %v13992_v55, %v4431_v17  ;;  %v4453_v8 = vmul.u32 18, %v4452_v47  ;;  %v14223_v3 = vld [vmem:[%s15218_s3] ss:$0 sm:$0xff] }
 0x515   : > { %v14184_v53 = vmul.u32.u64.low 3817748708, %v14146_v0  ;;  %v14185_v36 = vmul.u32.u64.high 3817748708, %v14146_v0, %v14184_v53  ;;  %v4064_v20 = vsel %vm3975_vm15, %v3934_v56, %v4023_v40  ;;  %vm3976_vm8 = vcmp.gt.f32.partialorder %v3935_v24, 0.0  ;;  %v15372_v40 = vld [vmem:[#allocation17_spill] sm:$0xff] }
 0x516   : > { %11926 = vmatmul.mubr.msk.bf16.gmra.mrb[100].mxu1 %vm11924_vm14, %v11925_v10  ;;  %v4024_v28 = vmul.f32 %v13322_v38, %v3935_v24  ;;  %v10702_v50 = vadd.f32 %v3740_v5, %v15363_v46  ;;  %vm14189_vm11 = vcmp.lt.s32.totalorder %v4765_v29, 16  ;;  %v4926_v55 = vsel %vm14100_vm13, %v4064_v20, 0.0 }
 0x517   : > { %v14196_v13 = vmul.u32.u64.low 3817748708, %v14162_v21  ;;  %v14197_v27 = vmul.u32.u64.high 3817748708, %v14162_v21, %v14196_v13  ;;  %v14200_v35 = vadd.s32 256, %v13089_v30  ;;  %4967 = vst [vmem:[#allocation3 + $0xa1] sm:$0xff] %v4926_v55  ;;  %v10703_v26 = vadd.f32 %v3743_v60, %v15366_v7 }
 0x518   : > { %v4065_v34 = vsel %vm3976_vm8, %v3935_v24, %v4024_v28  ;;  %v3888_v59 = vmul.f32 %v14205_v63, %v10702_v50  ;;  %v4767_v2 = vsel %vm14176_vm5, %v14156_v43, %v14090_v61  ;;  %vm4604_vm1 = vcmp.ne.s32.totalorder %v14159_v31, 0  ;;  %v3748_v39 = vpop.f32.mrb[48].mxu0 }
 0x519   : > { %v4927_v29 = vsel %vm14121_vm4, %v4065_v34, 0.0  ;;  %vm4645_vm6 = vcmp.lt.s32.totalorder %v14159_v31, 0  ;;  %v14218_v44 = vsub.s32 %v14003_v54, %v4442_v25  ;;  %v3889_v6 = vmul.f32 %v14205_v63, %v10703_v26  ;;  %v10162_v16 = vpop.f32.mrb[49].mxu0  ;;  %v15389_v25 = vld [vmem:[#allocation20_spill] sm:$0xff] }
 0x51a   : > { %4968 = vst [vmem:[#allocation3 + $0xa9] sm:$0xff] %v4927_v29  ;;  %v3936_v52 = vadd.f32 %v14223_v3, %v3888_v59  ;;  %v4727_v19 = vadd.s32 18, %v14159_v31  ;;  %vm4605_vm12 = vcmp.ne.s32.totalorder %v14181_v22, 0  ;;  %v14230_v33 = vsub.s32 %v14017_v9, %v4453_v8  ;;  %v3751_v17 = vpop.f32.mrb[50].mxu0  ;;  %vm14266_vm13 = vmand %vm4645_vm6, %vm4604_vm1 }
 0x51b   : > { %v14233_v54 = vmul.u32.u64.low 3817748708, %v14200_v35  ;;  %v14234_v15 = vmul.u32.u64.high 3817748708, %v14200_v35, %v14233_v54  ;;  %v3937_v57 = vadd.f32 %v14223_v3, %v3889_v6  ;;  %vm14238_vm9 = vcmp.lt.s32.totalorder %v4766_v1, 16  ;;  %v10163_v10 = vpop.f32.mrb[51].mxu0 }
 0x51c   : > { %vm3977_vm7 = vcmp.gt.f32.partialorder %v3936_v52, 0.0  ;;  %v4025_v11 = vmul.f32 %v13322_v38, %v3936_v52  ;;  %v11928_v9 = vpack.c.bf16 %v4065_v34, %v4064_v20  ;;  %vm4646_vm3 = vcmp.lt.s32.totalorder %v14181_v22, 0 }
 0x51d   : > { %v4728_v62 = vadd.s32 18, %v14181_v22  ;;  %vm4606_vm0 = vcmp.ne.s32.totalorder %v14218_v44, 0  ;;  %v4463_v38 = vshrl.u32 %v14185_v36, 4  ;;  %v14251_v49 = vadd.s32 264, %v13089_v30  ;;  %vm14279_vm8 = vmand %vm4646_vm3, %vm4605_vm12 }
 0x51e   : > { %11929 = vmatprep.mubr.msk.bf16.mxu1 %vm11927_vm10, %v11928_v9  ;;  %v4066_v58 = vsel %vm3977_vm7, %v3936_v52, %v4025_v11  ;;  %vm3978_vm15 = vcmp.gt.f32.partialorder %v3937_v57, 0.0  ;;  %v4026_v18 = vmul.f32 %v14256_v12, %v3937_v57  ;;  %v10704_v37 = vadd.f32 %v3748_v39, %v15369_v14  ;;  %vm11930_vm7 = vmpackc.low %vm14189_vm11, %vm14166_vm2 }
 0x51f   : > { %v4928_v42 = vsel %vm14166_vm2, %v4066_v58, 0.0  ;;  %vm4647_vm4 = vcmp.lt.s32.totalorder %v14218_v44, 0  ;;  %vm4607_vm14 = vcmp.ne.s32.totalorder %v14230_v33, 0  ;;  %v4474_v56 = vshrl.u32 %v14197_v27, 4 }
 0x520   : > { %4969 = vst [vmem:[#allocation3 + $0xb1] sm:$0xff] %v4928_v42  ;;  %v4067_v45 = vsel %vm3978_vm15, %v3937_v57, %v4026_v18  ;;  %v3890_v1 = vmul.f32 %v14205_v63, %v10704_v37  ;;  %v10705_v24 = vadd.f32 %v3751_v17, %v15372_v40  ;;  %vm4648_vm1 = vcmp.lt.s32.totalorder %v14230_v33, 0  ;;  %vm14302_vm6 = vmand %vm4647_vm4, %vm4606_vm0  ;;  %v3756_v32 = vpop.f32.mrb[52].mxu0  ;;  %v15386_v57 = vld [vmem:[#allocation19_spill] sm:$0xff] }
 0x521   : > { %v4929_v5 = vsel %vm14189_vm11, %v4067_v45, 0.0  ;;  %v4464_v8 = vmul.u32 18, %v4463_v38  ;;  %v14287_v53 = vmul.u32.u64.low 3817748708, %v14251_v49  ;;  %v14288_v36 = vmul.u32.u64.high 3817748708, %v14251_v49, %v14287_v53  ;;  %vm14320_vm10 = vmand %vm4648_vm1, %vm4607_vm14  ;;  %v10166_v6 = vpop.f32.mrb[53].mxu0 }
 0x522   : > { %4970 = vst [vmem:[#allocation3 + $0xb9] sm:$0xff] %v4929_v5  ;;  %v3938_v20 = vadd.f32 %v14223_v3, %v3890_v1  ;;  %v3891_v28 = vmul.f32 %v14205_v63, %v10705_v24  ;;  %v4768_v46 = vsel %vm14266_vm13, %v4727_v19, %v14159_v31  ;;  %v4769_v50 = vsel %vm14279_vm8, %v4728_v62, %v14181_v22  ;;  %v15410_v6 = vld [vmem:[#allocation25_spill] sm:$0xff] }
 0x523   : > { %v4729_v55 = vadd.s32 18, %v14218_v44  ;;  %v14308_v60 = vadd.s32 18, %v14230_v33  ;;  %v4475_v13 = vmul.u32 18, %v4474_v56  ;;  %v11931_v22 = vpack.c.bf16 %v4067_v45, %v4066_v58 }
 0x524   : > { %vm3979_vm12 = vcmp.gt.f32.partialorder %v3938_v20, 0.0  ;;  %v4027_v31 = vmul.f32 %v14256_v12, %v3938_v20  ;;  %v3939_v27 = vadd.f32 %v14223_v3, %v3891_v28  ;;  %v4485_v59 = vshrl.u32 %v14234_v15, 4 }
 0x525   : > { %11932 = vmatmul.mubr.msk.bf16.gmra.mrb[104].mxu1 %vm11930_vm7, %v11931_v22  ;;  %vm14330_vm3 = vcmp.lt.s32.totalorder %v4767_v2, 16  ;;  %vm14334_vm2 = vcmp.lt.s32.totalorder %v4768_v46, 16  ;;  %v14339_v26 = vsub.s32 %v14146_v0, %v4464_v8  ;;  %v10706_v52 = vadd.f32 %v3756_v32, %v15383_v4  ;;  %v3759_v2 = vpop.f32.mrb[54].mxu0 }
 0x526   : > { %v4068_v23 = vsel %vm3979_vm12, %v3938_v20, %v4027_v31  ;;  %vm3980_vm11 = vcmp.gt.f32.partialorder %v3939_v27, 0.0  ;;  %v4028_v29 = vmul.f32 %v14256_v12, %v3939_v27  ;;  %vm14343_vm5 = vcmp.lt.s32.totalorder %v4769_v50, 16  ;;  %v10167_v39 = vpop.f32.mrb[55].mxu0  ;;  %vm11933_vm1 = vmpackc.low %vm14330_vm3, %vm14238_vm9 }
 0x527   : > { %v4930_v43 = vsel %vm14238_vm9, %v4068_v23, 0.0  ;;  %v4770_v0 = vsel %vm14302_vm6, %v4729_v55, %v14218_v44  ;;  %v4771_v19 = vsel %vm14320_vm10, %v14308_v60, %v14230_v33  ;;  %v14357_v54 = vsub.s32 %v14162_v21, %v4475_v13 }
 0x528   : > { %4971 = vst [vmem:[#allocation3 + $0xc1] sm:$0xff] %v4930_v43  ;;  %v4069_v15 = vsel %vm3980_vm11, %v3939_v27, %v4028_v29  ;;  %v3892_v11 = vmul.f32 %v14205_v63, %v10706_v52  ;;  %v10707_v9 = vadd.f32 %v3759_v2, %v15386_v57  ;;  %v4486_v62 = vmul.u32 18, %v4485_v59  ;;  %v3764_v56 = vpop.f32.mrb[56].mxu0  ;;  %v15399_v57 = vld [vmem:[#allocation22_spill] sm:$0xff] }
 0x529   : > { %v4931_v38 = vsel %vm14330_vm3, %v4069_v15, 0.0  ;;  %vm4608_vm0 = vcmp.ne.s32.totalorder %v14339_v26, 0  ;;  %v4496_v44 = vshrl.u32 %v14288_v36, 4  ;;  %v14366_v33 = vadd.s32 272, %v13089_v30  ;;  %v10170_v8 = vpop.f32.mrb[57].mxu0 }
 0x52a   : > { %4972 = vst [vmem:[#allocation3 + $0xc9] sm:$0xff] %v4931_v38  ;;  %v3940_v21 = vadd.f32 %v14223_v3, %v3892_v11  ;;  %v3893_v58 = vmul.f32 %v14205_v63, %v10707_v9  ;;  %vm4649_vm15 = vcmp.lt.s32.totalorder %v14339_v26, 0  ;;  %v14372_v18 = vadd.s32 18, %v14339_v26  ;;  %v3767_v53 = vpop.f32.mrb[58].mxu0 }
 0x52b   : > { %vm4609_vm13 = vcmp.ne.s32.totalorder %v14357_v54, 0  ;;  %vm4650_vm4 = vcmp.lt.s32.totalorder %v14357_v54, 0  ;;  %v14377_v14 = vadd.s32 280, %v13089_v30  ;;  %vm14381_vm8 = vcmp.lt.s32.totalorder %v4770_v0, 16  ;;  %v10171_v60 = vpop.f32.mrb[59].mxu0  ;;  %vm14428_vm12 = vmand %vm4649_vm15, %vm4608_vm0 }
 0x52c   : > { %vm3981_vm14 = vcmp.gt.f32.partialorder %v3940_v21, 0.0  ;;  %v4029_v37 = vmul.f32 %v14256_v12, %v3940_v21  ;;  %v3941_v16 = vadd.f32 %v14223_v3, %v3893_v58  ;;  %v11934_v17 = vpack.c.bf16 %v4069_v15, %v4068_v23  ;;  %vm14448_vm11 = vmand %vm4650_vm4, %vm4609_vm13 }
 0x52d   : > { %v14390_v47 = vsub.s32 %v14200_v35, %v4486_v62  ;;  %v4497_v45 = vmul.u32 18, %v4496_v44  ;;  %v14393_v1 = vmul.u32.u64.low 3817748708, %v14366_v33  ;;  %v14394_v40 = vmul.u32.u64.high 3817748708, %v14366_v33, %v14393_v1  ;;  %vm11936_vm0 = vmpackc.low %vm14343_vm5, %vm14334_vm2 }
 0x52e   : > { %11935 = vmatprep.mubr.msk.bf16.mxu1 %vm11933_vm1, %v11934_v17  ;;  %v14397_v24 = vadd.s32 288, %v13089_v30  ;;  %v4070_v10 = vsel %vm3981_vm14, %v3940_v21, %v4029_v37  ;;  %vm3982_vm6 = vcmp.gt.f32.partialorder %v3941_v16, 0.0  ;;  %v4030_v48 = vmul.f32 %v14256_v12, %v3941_v16  ;;  %v15400_v37 = vld [vmem:[#allocation23_spill] sm:$0xff] }
 0x52f   : > { %v10708_v5 = vadd.f32 %v3764_v56, %v15389_v25  ;;  %v4932_v35 = vsel %vm14334_vm2, %v4070_v10, 0.0  ;;  %v14404_v36 = vmul.u32.u64.low 3817748708, %v14377_v14  ;;  %v14405_v20 = vmul.u32.u64.high 3817748708, %v14377_v14, %v14404_v36 }
 0x530   : > { %v14408_v28 = vadd.s32 296, %v13089_v30  ;;  %4973 = vst [vmem:[#allocation3 + $0xd1] sm:$0xff] %v4932_v35  ;;  %v4071_v46 = vsel %vm3982_vm6, %v3941_v16, %v4030_v48  ;;  %v10709_v55 = vadd.f32 %v3767_v53, %v15390_v51  ;;  %vm4610_vm9 = vcmp.ne.s32.totalorder %v14390_v47, 0  ;;  %v3772_v0 = vpop.f32.mrb[60].mxu0 }
 0x531   : > { %v3894_v50 = vmul.f32 %v14205_v63, %v10708_v5  ;;  %v4933_v13 = vsel %vm14343_vm5, %v4071_v46, 0.0  ;;  %v14416_v31 = vsub.s32 %v14251_v49, %v4497_v45  ;;  %vm4651_vm7 = vcmp.lt.s32.totalorder %v14390_v47, 0  ;;  %v10174_v9 = vpop.f32.mrb[61].mxu0 }
 0x532   : > { %v14419_v27 = vmul.u32.u64.low 3817748708, %v14397_v24  ;;  %v14420_v22 = vmul.u32.u64.high 3817748708, %v14397_v24, %v14419_v27  ;;  %4974 = vst [vmem:[#allocation3 + $0xd9] sm:$0xff] %v4933_v13  ;;  %v3895_v59 = vmul.f32 %v14205_v63, %v10709_v55  ;;  %vm14433_vm10 = vcmp.lt.s32.totalorder %v4771_v19, 16  ;;  %vm14465_vm15 = vmand %vm4651_vm7, %vm4610_vm9  ;;  %v3775_v62 = vpop.f32.mrb[62].mxu0 }
 0x533   : > { %v3942_v34 = vadd.f32 %v14223_v3, %v3894_v50  ;;  %v4732_v32 = vadd.s32 18, %v14357_v54  ;;  %v14439_v23 = vmul.u32.u64.low 3817748708, %v14408_v28  ;;  %v14440_v29 = vmul.u32.u64.high 3817748708, %v14408_v28, %v14439_v23  ;;  %v10175_v17 = vpop.f32.mrb[63].mxu0 }
 0x534   : > { %v3943_v52 = vadd.f32 %v14223_v3, %v3895_v59  ;;  %v11937_v43 = vpack.c.bf16 %v4071_v46, %v4070_v10  ;;  %v4733_v2 = vadd.s32 18, %v14390_v47  ;;  %v4772_v19 = vsel %vm14428_vm12, %v14372_v18, %v14339_v26  ;;  %vm11939_vm12 = vmpackc.low %vm14433_vm10, %vm14381_vm8 }
 0x535   : > { %vm3983_vm3 = vcmp.gt.f32.partialorder %v3942_v34, 0.0  ;;  %v4031_v4 = vmul.f32 %v14256_v12, %v3942_v34  ;;  %vm4611_vm2 = vcmp.ne.s32.totalorder %v14416_v31, 0  ;;  %vm4652_vm5 = vcmp.lt.s32.totalorder %v14416_v31, 0 }
 0x536   : > { %11938 = vmatmul.mubr.msk.bf16.gmra.mrb[108].mxu1 %vm11936_vm0, %v11937_v43  ;;  %v4507_v7 = vshrl.u32 %v14394_v40, 4  ;;  %vm3984_vm13 = vcmp.gt.f32.partialorder %v3943_v52, 0.0  ;;  %v4032_v11 = vmul.f32 %v14256_v12, %v3943_v52  ;;  %v10710_v26 = vadd.f32 %v3772_v0, %v15399_v57  ;;  %vm14490_vm4 = vmand %vm4652_vm5, %vm4611_vm2 }
 0x537   : > { %v4072_v61 = vsel %vm3983_vm3, %v3942_v34, %v4031_v4  ;;  %v4773_v38 = vsel %vm14448_vm11, %v4732_v32, %v14357_v54  ;;  %v4734_v44 = vadd.s32 18, %v14416_v31  ;;  %v4518_v21 = vshrl.u32 %v14405_v20, 4  ;;  %v15409_v34 = vld [vmem:[#allocation24_spill] sm:$0xff] }
 0x538   : > { %v4934_v39 = vsel %vm14381_vm8, %v4072_v61, 0.0  ;;  %v4073_v58 = vsel %vm3984_vm13, %v3943_v52, %v4032_v11  ;;  %v3896_v18 = vmul.f32 %v14205_v63, %v10710_v26  ;;  %v10711_v16 = vadd.f32 %v3775_v62, %v15400_v37  ;;  %v3780_v55 = vpop.f32.mrb[64].mxu0 }
 0x539   : > { %4975 = vst [vmem:[#allocation3 + $0xe1] sm:$0xff] %v4934_v39  ;;  %v4774_v56 = vsel %vm14465_vm15, %v4733_v2, %v14390_v47  ;;  %v4935_v45 = vsel %vm14433_vm10, %v4073_v58, 0.0  ;;  %v4508_v1 = vmul.u32 18, %v4507_v7  ;;  %v4529_v40 = vshrl.u32 %v14420_v22, 4  ;;  %v10178_v41 = vpop.f32.mrb[65].mxu0 }
 0x53a   : > { %v14498_v10 = vadd.s32 304, %v13089_v30  ;;  %4976 = vst [vmem:[#allocation3 + $0xe9] sm:$0xff] %v4935_v45  ;;  %v3944_v47 = vadd.f32 %v14223_v3, %v3896_v18  ;;  %vm14501_vm14 = vcmp.lt.s32.totalorder %v4772_v19, 16  ;;  %v3897_v25 = vmul.f32 %v14205_v63, %v10711_v16  ;;  %v3783_v32 = vpop.f32.mrb[66].mxu0  ;;  %v15415_v18 = vld [vmem:[#allocation26_spill] sm:$0xff] }
 0x53b   : > { %vm14506_vm1 = vcmp.lt.s32.totalorder %v4773_v38, 16  ;;  %v4775_v8 = vsel %vm14490_vm4, %v4734_v44, %v14416_v31  ;;  %v4519_v35 = vmul.u32 18, %v4518_v21  ;;  %v14514_v53 = vadd.s32 312, %v13089_v30  ;;  %v10179_v0 = vpop.f32.mrb[67].mxu0 }
 0x53c   : > { %vm3985_vm6 = vcmp.gt.f32.partialorder %v3944_v47, 0.0  ;;  %v4033_v36 = vmul.f32 %v14256_v12, %v3944_v47  ;;  %v3945_v20 = vadd.f32 %v14223_v3, %v3897_v25  ;;  %vm14518_vm9 = vcmp.lt.s32.totalorder %v4774_v56, 16  ;;  %vm11942_vm2 = vmpackc.low %vm14506_vm1, %vm14501_vm14  ;;  %v15418_v25 = vld [vmem:[#allocation27_spill] sm:$0xff] }
 0x53d   : > { %v11940_v50 = vpack.c.bf16 %v4073_v58, %v4072_v61  ;;  %v4540_v51 = vshrl.u32 %v14440_v29, 4  ;;  %v14528_v60 = vsub.s32 %v14366_v33, %v4508_v1  ;;  %v4530_v13 = vmul.u32 18, %v4529_v40 }
 0x53e   : > { %v14531_v31 = vmul.u32.u64.low 3817748708, %v14498_v10  ;;  %v14532_v27 = vmul.u32.u64.high 3817748708, %v14498_v10, %v14531_v31  ;;  %v4074_v22 = vsel %vm3985_vm6, %v3944_v47, %v4033_v36  ;;  %vm3986_vm7 = vcmp.gt.f32.partialorder %v3945_v20, 0.0 }
 0x53f   : > { %11941 = vmatprep.mubr.msk.bf16.mxu1 %vm11939_vm12, %v11940_v50  ;;  %v4034_v42 = vmul.f32 %v14256_v12, %v3945_v20  ;;  %v10712_v59 = vadd.f32 %v3780_v55, %v15409_v34  ;;  %v4936_v49 = vsel %vm14501_vm14, %v4074_v22, 0.0  ;;  %v14539_v23 = vsub.s32 %v14377_v14, %v4519_v35 }
 0x540   : > { %v14542_v33 = vmul.u32.u64.low 3817748708, %v14514_v53  ;;  %v14543_v29 = vmul.u32.u64.high 3817748708, %v14514_v53, %v14542_v33  ;;  %4977 = vst [vmem:[#allocation3 + $0xf1] sm:$0xff] %v4936_v49  ;;  %v10713_v43 = vadd.f32 %v3783_v32, %v15410_v6  ;;  %vm14547_vm8 = vcmp.lt.s32.totalorder %v4775_v8, 16  ;;  %v3788_v62 = vpop.f32.mrb[68].mxu0 }
 0x541   : > { %v4075_v4 = vsel %vm3986_vm7, %v3945_v20, %v4034_v42  ;;  %v3898_v52 = vmul.f32 %v14205_v63, %v10712_v59  ;;  %vm4612_vm10 = vcmp.ne.s32.totalorder %v14528_v60, 0  ;;  %v14555_v14 = vsub.s32 %v14397_v24, %v4530_v13  ;;  %v10182_v16 = vpop.f32.mrb[69].mxu0 }
 0x542   : > { %v4937_v19 = vsel %vm14506_vm1, %v4075_v4, 0.0  ;;  %v4541_v15 = vmul.u32 18, %v4540_v51  ;;  %v3899_v61 = vmul.f32 %v14205_v63, %v10713_v43  ;;  %vm4653_vm3 = vcmp.lt.s32.totalorder %v14528_v60, 0  ;;  %v3791_v56 = vpop.f32.mrb[70].mxu0 }
 0x543   : > { %4978 = vst [vmem:[#allocation3 + $0xf9] sm:$0xff] %v4937_v19  ;;  %v3946_v7 = vadd.f32 %v14223_v3, %v3898_v52  ;;  %v4735_v11 = vadd.s32 18, %v14528_v60  ;;  %vm4613_vm11 = vcmp.ne.s32.totalorder %v14539_v23, 0  ;;  %vm4654_vm0 = vcmp.lt.s32.totalorder %v14539_v23, 0  ;;  %vm14575_vm5 = vmand %vm4653_vm3, %vm4612_vm10  ;;  %v10183_v8 = vpop.f32.mrb[71].mxu0 }
 0x544   : > { %v14564_v57 = vadd.s32 320, %v13089_v30  ;;  %v3947_v26 = vadd.f32 %v14223_v3, %v3899_v61  ;;  %v4736_v9 = vadd.s32 18, %v14539_v23  ;;  %v11943_v39 = vpack.c.bf16 %v4075_v4, %v4074_v22  ;;  %vm14593_vm1 = vmand %vm4654_vm0, %vm4613_vm11 }
 0x545   : > { %vm3987_vm15 = vcmp.gt.f32.partialorder %v3946_v7, 0.0  ;;  %v4035_v24 = vmul.f32 %v14256_v12, %v3946_v7  ;;  %vm4614_vm13 = vcmp.ne.s32.totalorder %v14555_v14, 0  ;;  %vm4655_vm4 = vcmp.lt.s32.totalorder %v14555_v14, 0  ;;  %vm11945_vm11 = vmpackc.low %vm14547_vm8, %vm14518_vm9 }
 0x546   : > { %11944 = vmatmul.mubr.msk.bf16.gmra.mrb[112].mxu1 %vm11942_vm2, %v11943_v39  ;;  %v14582_v38 = vsub.s32 %v14408_v28, %v4541_v15  ;;  %v4551_v44 = vshrl.u32 %v14532_v27, 4  ;;  %vm3988_vm14 = vcmp.gt.f32.partialorder %v3947_v26, 0.0  ;;  %v4036_v58 = vmul.f32 %v14256_v12, %v3947_v26  ;;  %vm14619_vm6 = vmand %vm4655_vm4, %vm4614_vm13  ;;  %v15428_v15 = vld [vmem:[#allocation29_spill] sm:$0xff] }
 0x547   : > { %v4076_v21 = vsel %vm3987_vm15, %v3946_v7, %v4035_v24  ;;  %v10714_v37 = vadd.f32 %v3788_v62, %v15415_v18  ;;  %v4562_v54 = vshrl.u32 %v14543_v29, 4  ;;  %v4776_v48 = vsel %vm14575_vm5, %v4735_v11, %v14528_v60  ;;  %v5010_v24 = vld [vmem:[#allocation3 + $0x48] sm:$0xff] }
 0x548   : > { %v4938_v17 = vsel %vm14518_vm9, %v4076_v21, 0.0  ;;  %v14599_v45 = vmul.u32.u64.low 3817748708, %v14564_v57  ;;  %v14600_v1 = vmul.u32.u64.high 3817748708, %v14564_v57, %v14599_v45  ;;  %v4077_v40 = vsel %vm3988_vm14, %v3947_v26, %v4036_v58  ;;  %v3796_v59 = vpop.f32.mrb[72].mxu0 }
 0x549   : > { %4979 = vst [vmem:[#allocation3 + $0x101] sm:$0xff] %v4938_v17  ;;  %v3900_v47 = vmul.f32 %v14205_v63, %v10714_v37  ;;  %v10715_v5 = vadd.f32 %v3791_v56, %v15418_v25  ;;  %v4939_v35 = vsel %vm14547_vm8, %v4077_v40, 0.0  ;;  %v4737_v36 = vadd.s32 18, %v14555_v14  ;;  %v10186_v29 = vpop.f32.mrb[73].mxu0  ;;  %v15433_v56 = vld [vmem:[#allocation30_spill] sm:$0xff] }
 0x54a   : > { %4980 = vst [vmem:[#allocation3 + $0x109] sm:$0xff] %v4939_v35  ;;  %v4777_v51 = vsel %vm14593_vm1, %v4736_v9, %v14539_v23  ;;  %vm14623_vm12 = vcmp.lt.s32.totalorder %v4776_v48, 16  ;;  %vm4615_vm7 = vcmp.ne.s32.totalorder %v14582_v38, 0  ;;  %v4552_v13 = vmul.u32 18, %v4551_v44  ;;  %v15425_v23 = vld [vmem:[#allocation28_spill] sm:$0xff]  ;;  %v3799_v52 = vpop.f32.mrb[74].mxu0 }
 0x54b   : > { %v3948_v20 = vadd.f32 %v14223_v3, %v3900_v47  ;;  %v3901_v50 = vmul.f32 %v14205_v63, %v10715_v5  ;;  %v4563_v31 = vmul.u32 18, %v4562_v54  ;;  %vm4656_vm3 = vcmp.lt.s32.totalorder %v14582_v38, 0  ;;  %v10187_v61 = vpop.f32.mrb[75].mxu0  ;;  %v5003_v25 = vld [vmem:[#allocation3 + $0x10] sm:$0xff]  ;;  %v5004_v5 = vld [vmem:[#allocation3 + $0x18] sm:$0xff]  ;;  %v5017_v47 = vld [vmem:[#allocation3 + $0x80] sm:$0xff] }
 0x54c   : > { %v11946_v42 = vpack.c.bf16 %v4077_v40, %v4076_v21  ;;  %vm14635_vm0 = vcmp.lt.s32.totalorder %v4777_v51, 16  ;;  %v4778_v41 = vsel %vm14619_vm6, %v4737_v36, %v14555_v14  ;;  %v4738_v49 = vadd.s32 18, %v14582_v38  ;;  %vm14651_vm9 = vmand %vm4656_vm3, %vm4615_vm7  ;;  %v15438_v36 = vld [vmem:[#allocation31_spill] sm:$0xff]  ;;  %v5006_v51 = vld [vmem:[#allocation3 + $0x28] sm:$0xff] }
 0x54d   : > { %vm3989_vm10 = vcmp.gt.f32.partialorder %v3948_v20, 0.0  ;;  %v4037_v27 = vmul.f32 %v14256_v12, %v3948_v20  ;;  %v3949_v22 = vadd.f32 %v14223_v3, %v3901_v50  ;;  %v10716_v33 = vadd.f32 %v3796_v59, %v15425_v23  ;;  %vm11948_vm1 = vmpackc.low %vm14635_vm0, %vm14623_vm12  ;;  %v11834_v54 = vld [vmem:[%s15220_s5 + $0xb0] sm:$0xff]  }
 0x54e   : > { %11947 = vmatprep.mubr.msk.bf16.mxu1 %vm11945_vm11, %v11946_v42  ;;  %v14656_v43 = vsub.s32 %v14498_v10, %v4552_v13  ;;  %v14659_v2 = vsub.s32 %v14514_v53, %v4563_v31  ;;  %v4573_v0 = vshrl.u32 %v14600_v1, 4  ;;  %v10717_v7 = vadd.f32 %v3799_v52, %v15428_v15  ;;  %v14670_v10 = vld [vmem:[#allocation3 + $0x14c] sm:$0xff]  ;;  %v15443_v52 = vld [vmem:[#allocation32_spill] sm:$0xff]  ;;  %v5008_v15 = vld [vmem:[#allocation3 + $0x38] sm:$0xff] }
 0x54f   : > { %v4078_v32 = vsel %vm3989_vm10, %v3948_v20, %v4037_v27  ;;  %vm3990_vm15 = vcmp.gt.f32.partialorder %v3949_v22, 0.0  ;;  %v4038_v46 = vmul.f32 %v14256_v12, %v3949_v22  ;;  %v3902_v14 = vmul.f32 %v14205_v63, %v10716_v33  ;;  %v11829_v42 = vld [vmem:[%s15220_s5 + $0x88] sm:$0xff]   ;;  %v11899_v33 = vld [vmem:[%s15220_s5 + $0x80] sm:$0xff]  }
 0x550   : > { %v4940_v4 = vsel %vm14623_vm12, %v4078_v32, 0.0  ;;  %vm14666_vm8 = vcmp.lt.s32.totalorder %v4778_v41, 16  ;;  %v5037_v53 = vpack.c.bf16 %v14670_v10, %v14670_v10  ;;  %v3903_v9 = vmul.f32 %v14205_v63, %v10717_v7  ;;  %v3804_v58 = vpop.f32.mrb[76].mxu0  ;;  %v5029_v41 = vld [vmem:[#allocation3 + $0xe0] sm:$0xff] }
 0x551   : > { %4981 = vst [vmem:[#allocation3 + $0x111] sm:$0xff] %v4940_v4  ;;  %v4079_v19 = vsel %vm3990_vm15, %v3949_v22, %v4038_v46  ;;  %v3950_v26 = vadd.f32 %v14223_v3, %v3902_v14  ;;  %v4779_v39 = vsel %vm14651_vm9, %v4738_v49, %v14582_v38  ;;  %vm4616_vm2 = vcmp.ne.s32.totalorder %v14656_v43, 0  ;;  %v10190_v45 = vpop.f32.mrb[77].mxu0  ;;  %v5005_v22 = vld [vmem:[#allocation3 + $0x20] sm:$0xff] }
 0x552   : > { %v4941_v11 = vsel %vm14635_vm0, %v4079_v19, 0.0  ;;  %vm4657_vm5 = vcmp.lt.s32.totalorder %v14656_v43, 0  ;;  %vm4617_vm13 = vcmp.ne.s32.totalorder %v14659_v2, 0  ;;  %v4574_v62 = vmul.u32 18, %v4573_v0  ;;  %v3807_v40 = vpop.f32.mrb[78].mxu0  ;;  %v11830_v0 = vld [vmem:[%s15220_s5 + $0x90] sm:$0xff]  }
 0x553   : > { %4982 = vst [vmem:[#allocation3 + $0x119] sm:$0xff] %v4941_v11  ;;  %vm3991_vm4 = vcmp.gt.f32.partialorder %v3950_v26, 0.0  ;;  %v4039_v30 = vmul.f32 %v14256_v12, %v3950_v26  ;;  %v3951_v44 = vadd.f32 %v14223_v3, %v3903_v9  ;;  %vm4658_vm14 = vcmp.lt.s32.totalorder %v14659_v2, 0  ;;  %vm14701_vm12 = vmand %vm4657_vm5, %vm4616_vm2  ;;  %v10191_v50 = vpop.f32.mrb[79].mxu0  ;;  %v5007_v9 = vld [vmem:[#allocation3 + $0x30] sm:$0xff]  ;;  %v5016_v45 = vld [vmem:[#allocation3 + $0x78] sm:$0xff] }
 0x554   : > { %v11949_v38 = vpack.c.bf16 %v4079_v19, %v4078_v32  ;;  %vm14689_vm6 = vcmp.lt.s32.totalorder %v4779_v39, 16  ;;  %v4739_v18 = vadd.s32 18, %v14656_v43  ;;  %v4740_v37 = vadd.s32 18, %v14659_v2  ;;  %vm14711_vm10 = vmand %vm4658_vm14, %vm4617_vm13  ;;  %v5021_v50 = vld [vmem:[#allocation3 + $0xa0] sm:$0xff]  ;;  %v5032_v32 = vld [vmem:[#allocation3 + $0xf8] sm:$0xff] }
 0x555   : > { %v4080_v16 = vsel %vm3991_vm4, %v3950_v26, %v4039_v30  ;;  %vm3992_vm7 = vcmp.gt.f32.partialorder %v3951_v44, 0.0  ;;  %v4040_v17 = vmul.f32 %v14256_v12, %v3951_v44  ;;  %v10718_v28 = vadd.f32 %v3804_v58, %v15433_v56  ;;  %v5009_v30 = vld [vmem:[#allocation3 + $0x40] sm:$0xff]  ;;  %v11833_v56 = vld [vmem:[%s15220_s5 + $0xa8] sm:$0xff]  }
 0x556   : > { %11950 = vmatmul.mubr.msk.bf16.gmra.mrb[116].mxu1 %vm11948_vm1, %v11949_v38  ;;  %v4942_v1 = vsel %vm14666_vm8, %v4080_v16, 0.0  ;;  %v4575_v48 = vsub.s32 %v14564_v57, %v4574_v62  ;;  %v10719_v20 = vadd.f32 %v3807_v40, %v15438_v36  ;;  %v4780_v60 = vsel %vm14701_vm12, %v4739_v18, %v14656_v43  ;;  %v5012_v18 = vld [vmem:[#allocation3 + $0x58] sm:$0xff]  ;;  %v5019_v36 = vld [vmem:[#allocation3 + $0x90] sm:$0xff] }
 0x557   : > { %10264 = vmatprep.mubr.bf16.mxu1 %v5037_v53  ;;  %4983 = vst [vmem:[#allocation3 + $0x121] sm:$0xff] %v4942_v1  ;;  %v4081_v8 = vsel %vm3992_vm7, %v3951_v44, %v4040_v17  ;;  %v3904_v35 = vmul.f32 %v14205_v63, %v10718_v28  ;;  %v4781_v31 = vsel %vm14711_vm10, %v4740_v37, %v14659_v2  ;;  %vm14732_vm15 = vcmp.lt.s32.totalorder %v4780_v60, 16  ;;  %v5014_v37 = vld [vmem:[#allocation3 + $0x68] sm:$0xff]  ;;  %v5013_v17 = vld [vmem:[#allocation3 + $0x60] sm:$0xff]  ;;  %v5015_v1 = vld [vmem:[#allocation3 + $0x70] sm:$0xff] }
 0x558   : > { %v4943_v55 = vsel %vm14689_vm6, %v4081_v8, 0.0  ;;  %v3905_v13 = vmul.f32 %v14205_v63, %v10719_v20  ;;  %v5038_v27 = vpack.c.bf16 %v5004_v5, %v5003_v25  ;;  %vm4618_vm3 = vcmp.ne.s32.totalorder %v4575_v48, 0  ;;  %v3812_v46 = vpop.f32.mrb[80].mxu0  ;;  %v11836_v5 = vld [vmem:[%s15220_s5 + $0xc0] sm:$0xff]   ;;  %v5020_v8 = vld [vmem:[#allocation3 + $0x98] sm:$0xff]  ;;  %v5026_v60 = vld [vmem:[#allocation3 + $0xc8] sm:$0xff] }
 0x559   : > { %4984 = vst [vmem:[#allocation3 + $0x129] sm:$0xff] %v4943_v55  ;;  %v3952_v57 = vadd.f32 %v14223_v3, %v3904_v35  ;;  %vm4659_vm11 = vcmp.lt.s32.totalorder %v4575_v48, 0  ;;  %v5039_v34 = vpack.c.bf16 %v5006_v51, %v5005_v22  ;;  %vm14737_vm9 = vcmp.lt.s32.totalorder %v4781_v31, 16  ;;  %v10194_v2 = vpop.f32.mrb[81].mxu0  ;;  %v5022_v35 = vld [vmem:[#allocation3 + $0xa8] sm:$0xff]  ;;  %v5024_v55 = vld [vmem:[#allocation3 + $0xb8] sm:$0xff] }
 0x55a   : > { %v3953_v49 = vadd.f32 %v14223_v3, %v3905_v13  ;;  %v4741_v23 = vadd.s32 18, %v4575_v48  ;;  %v10720_v6 = vadd.f32 %v3812_v46, %v15443_v52  ;;  %vm14748_vm2 = vmand %vm4659_vm11, %vm4618_vm3  ;;  %v3815_v14 = vpop.f32.mrb[82].mxu0  ;;  %v5040_v62 = vpack.c.bf16 %v5008_v15, %v5007_v9  ;;  %v5025_v31 = vld [vmem:[#allocation3 + $0xc0] sm:$0xff]  ;;  %v5028_v22 = vld [vmem:[#allocation3 + $0xd8] sm:$0xff] }
 0x55b   : > { %vm3993_vm0 = vcmp.gt.f32.partialorder %v3952_v57, 0.0  ;;  %v4041_v59 = vmul.f32 %v14256_v12, %v3952_v57  ;;  %v10195_v11 = vpop.f32.mrb[83].mxu0  ;;  %v5041_v44 = vpack.c.bf16 %v5010_v24, %v5009_v30  ;;  %v5043_v28 = vpack.c.bf16 %v5014_v37, %v5013_v17  ;;  %v5034_v46 = vld [vmem:[#allocation3 + $0x108] sm:$0xff]  ;;  %v5036_v43 = vld [vmem:[#allocation3 + $0x118] sm:$0xff]  ;;  %v5035_v2 = vld [vmem:[#allocation3 + $0x110] sm:$0xff] }
 0x55c   : > { %vm3994_vm8 = vcmp.gt.f32.partialorder %v3953_v49, 0.0  ;;  %v4042_v4 = vmul.f32 %v14256_v12, %v3953_v49  ;;  %v3906_v61 = vmul.f32 %v14205_v63, %v10720_v6  ;;  %v4782_v26 = vsel %vm14748_vm2, %v4741_v23, %v4575_v48  ;;  %v11831_v63 = vld [vmem:[%s15220_s5 + $0x98] sm:$0xff]   ;;  %v5031_v23 = vld [vmem:[#allocation3 + $0xf0] sm:$0xff]  ;;  %v5592_v52 = vld [vmem:[#allocation3 + $0x2] sm:$0xff] }
 0x55d   : > { %v4082_v29 = vsel %vm3993_vm0, %v3952_v57, %v4041_v59  ;;  %vm4823_vm13 = vcmp.lt.s32.totalorder %v4782_v26, 16  ;;  %v5044_v40 = vpack.c.bf16 %v5016_v45, %v5015_v1  ;;  %v11835_v48 = vld [vmem:[%s15220_s5 + $0xb8] sm:$0xff]   ;;  %v5046_v20 = vpack.c.bf16 %v5020_v8, %v5019_v36  ;;  %v5023_v57 = vld [vmem:[#allocation3 + $0xb0] sm:$0xff]  ;;  %v5596_v11 = vld [vmem:[#allocation3 + $0x22] sm:$0xff] }
 0x55e   : > { %10265 = vmatmul.mubr.bf16.vlgmr.msra.gmra.mrb[84].mxu1 %v5038_v27  ;;  %v4944_v19 = vsel %vm14732_vm15, %v4082_v29, 0.0  ;;  %v4083_v7 = vsel %vm3994_vm8, %v3953_v49, %v4042_v4  ;;  %v3954_v39 = vadd.f32 %v14223_v3, %v3906_v61  ;;  %v11832_v3 = vld [vmem:[%s15220_s5 + $0xa0] sm:$0xff]   ;;  %v5047_v51 = vpack.c.bf16 %v5022_v35, %v5021_v50  ;;  %v5593_v6 = vld [vmem:[#allocation3 + $0xa] sm:$0xff]  ;;  %v5606_v45 = vld [vmem:[#allocation3 + $0x72] sm:$0xff] }
 0x55f   : > { %10268 = vmatprep.mubr.bf16.mxu1 %v5039_v34  ;;  %10301 = vmatpush3.bf16.msra.mxu1 %v11899_v33  ;;  %4985 = vst [vmem:[#allocation3 + $0x131] sm:$0xff] %v4944_v19  ;;  %v4945_v53 = vsel %vm14737_vm9, %v4083_v7, 0.0  ;;  %v5048_v13 = vpack.c.bf16 %v5024_v55, %v5023_v57  ;;  %v5049_v27 = vpack.c.bf16 %v5026_v60, %v5025_v31  ;;  %v5027_v34 = vld [vmem:[#allocation3 + $0xd0] sm:$0xff]  ;;  %v5033_v29 = vld [vmem:[#allocation3 + $0x100] sm:$0xff]  ;;  %v11837_v24 = vld [vmem:[%s15220_s5 + $0xc8] sm:$0xff]  }
 0x560   : > { %10302 = vmatprep.subr.bf16.mxu1 %v11829_v42  ;;  %4986 = vst [vmem:[#allocation3 + $0x139] sm:$0xff] %v4945_v53  ;;  %vm3995_vm5 = vcmp.gt.f32.partialorder %v3954_v39, 0.0  ;;  %v4043_v38 = vmul.f32 %v14256_v12, %v3954_v39  ;;  %v5011_v12 = vld [vmem:[#allocation3 + $0x50] sm:$0xff]  ;;  %v5050_v59 = vpack.c.bf16 %v5028_v22, %v5027_v34  ;;  %v5052_v33 = vpack.c.bf16 %v5032_v32, %v5031_v23  ;;  %v5595_v14 = vld [vmem:[#allocation3 + $0x1a] sm:$0xff]  ;;  %v5608_v1 = vld [vmem:[#allocation3 + $0x82] sm:$0xff] }
 0x561   : > { %4998 = vst [vmem:[#allocation3 + $0x132] sm:$0xff] %v14670_v10  ;;  %v5042_v16 = vpack.c.bf16 %v5012_v18, %v5011_v12  ;;  %v5053_v4 = vpack.c.bf16 %v5034_v46, %v5033_v29  ;;  %v5054_v19 = vpack.c.bf16 %v5036_v43, %v5035_v2  ;;  %v5597_v15 = vld [vmem:[#allocation3 + $0x2a] sm:$0xff]  ;;  %v5594_v7 = vld [vmem:[#allocation3 + $0x12] sm:$0xff]  ;;  %v5599_v9 = vld [vmem:[#allocation3 + $0x3a] sm:$0xff] }
 0x562   : > { %v4084_v21 = vsel %vm3995_vm5, %v3954_v39, %v4043_v38  ;;  %v14786_v61 = vpack.c.bf16 %v5595_v14, %v5594_v7  ;;  %v14791_v53 = vpack.c.bf16 %v5597_v15, %v5596_v11  ;;  %v11838_v26 = vld [vmem:[%s15220_s5 + $0xd0] sm:$0xff]   ;;  %v5604_v12 = vld [vmem:[#allocation3 + $0x62] sm:$0xff]  ;;  %v5615_v50 = vld [vmem:[#allocation3 + $0xba] sm:$0xff] }
 0x563   : > { %10303 = vmatpush3.bf16.msra.mxu1 %v11829_v42  ;;  %v4946_v58 = vsel %vm4823_vm13, %v4084_v21, 0.0  ;;  %v5030_v42 = vld [vmem:[#allocation3 + $0xe8] sm:$0xff]  ;;  %v11840_v21 = vld [vmem:[%s15220_s5 + $0xe0] sm:$0xff]   ;;  %v5602_v18 = vld [vmem:[#allocation3 + $0x52] sm:$0xff] }
 0x564   : > { %10304 = vmatprep.subr.bf16.mxu1 %v11830_v0  ;;  %4987 = vst [vmem:[#allocation3 + $0x141] sm:$0xf] %v4946_v58  ;;  %v5051_v49 = vpack.c.bf16 %v5030_v42, %v5029_v41  ;;  %v5601_v39 = vld [vmem:[#allocation3 + $0x4a] sm:$0xff]  ;;  %v5610_v8 = vld [vmem:[#allocation3 + $0x92] sm:$0xff]  ;;  %v5612_v36 = vld [vmem:[#allocation3 + $0xa2] sm:$0xff] }
 0x565   : > { %4989 = vst [vmem:[#allocation3 + $0x144] sm:$0xff] %v14670_v10  ;;  %4999 = vst [vmem:[#allocation3 + $0x13a] sm:$0xff] %v14670_v10  ;;  %v5605_v58 = vld [vmem:[#allocation3 + $0x6a] sm:$0xff]  ;;  %v5614_v55 = vld [vmem:[#allocation3 + $0xb2] sm:$0xff] }
 0x566   : > { %10269 = vmatmul.mubr.bf16.gmra.mrb[88].mxu1 %v5040_v62  ;;  %5000 = vst [vmem:[#allocation3 + $0x142] sm:$0x3] %v14670_v10  ;;  %v5018_v10 = vld [vmem:[#allocation3 + $0x88] sm:$0xff]  ;;  %v5598_v62 = vld [vmem:[#allocation3 + $0x32] sm:$0xff]  ;;  %v14815_v17 = vpack.c.bf16 %v5605_v58, %v5604_v12  ;;  %v5639_v60 = vpack.c.bf16 %v5615_v50, %v5614_v55  ;;  %v5619_v31 = vld [vmem:[#allocation3 + $0xda] sm:$0xff] }
 0x567   : > { %10272 = vmatprep.mubr.bf16.mxu1 %v5041_v44  ;;  %10305 = vmatpush3.bf16.msra.mxu1 %v11830_v0  ;;  %v5045_v25 = vpack.c.bf16 %v5018_v10, %v5017_v47  ;;  %v5628_v0 = vpack.c.bf16 %v5593_v6, %v5592_v52  ;;  %v14798_v30 = vpack.c.bf16 %v5599_v9, %v5598_v62  ;;  %v11839_v44 = vld [vmem:[%s15220_s5 + $0xd8] sm:$0xff]   ;;  %v5616_v57 = vld [vmem:[#allocation3 + $0xc2] sm:$0xff]  ;;  %v11846_v43 = vld [vmem:[%s15220_s5 + $0x110] sm:$0xff]  }
 0x568   : > { %10306 = vmatprep.subr.bf16.mxu1 %v11831_v63  ;;  %v5618_v22 = vld [vmem:[#allocation3 + $0xd2] sm:$0xff]  ;;  %v5620_v34 = vld [vmem:[#allocation3 + $0xe2] sm:$0xff]  ;;  %v5623_v41 = vld [vmem:[#allocation3 + $0xfa] sm:$0xff] }
 0x569   : > { %v5641_v42 = vpack.c.bf16 %v5619_v31, %v5618_v22  ;;  %v5622_v32 = vld [vmem:[#allocation3 + $0xf2] sm:$0xff]  ;;  %v5624_v23 = vld [vmem:[#allocation3 + $0x102] sm:$0xff]  ;;  %v5627_v29 = vld [vmem:[#allocation3 + $0x11a] sm:$0xff] }
 0x56a   : > { %v5643_v46 = vpack.c.bf16 %v5623_v41, %v5622_v32  ;;  %v11845_v6 = vld [vmem:[%s15220_s5 + $0x108] sm:$0xff]   ;;  %v11847_v2 = vld [vmem:[%s15220_s5 + $0x118] sm:$0xff]   ;;  %v11850_v14 = vld [vmem:[%s15220_s5 + $0x130] sm:$0xff]  }
 0x56b   : > { %10307 = vmatpush3.bf16.msra.mxu1 %v11831_v63  ;;  %v5600_v63 = vld [vmem:[#allocation3 + $0x42] sm:$0xff]  ;;  %v11851_v15 = vld [vmem:[%s15220_s5 + $0x138] sm:$0xff]   ;;  %v6263_v58 = vld [vmem:[#allocation3 + $0x4b] sm:$0xff] }
 0x56c   : > { %10308 = vmatprep.subr.bf16.mxu1 %v11832_v3  ;;  %v14803_v38 = vpack.c.bf16 %v5601_v39, %v5600_v63  ;;  %v11852_v7 = vld [vmem:[%s15220_s5 + $0x140] sm:$0xff]   ;;  %v6259_v39 = vld [vmem:[#allocation3 + $0x2b] sm:$0xff]  ;;  %v11859_v50 = vld [vmem:[%s15220_s5 + $0x178] sm:$0xff]  }
 0x56d   : > { %v6257_v11 = vld [vmem:[#allocation3 + $0x1b] sm:$0xff] }
 0x56e   : > { %10273 = vmatmul.mubr.bf16.gmra.mrb[92].mxu1 %v5042_v16  ;;  %v11841_v16 = vld [vmem:[%s15220_s5 + $0xe8] sm:$0xff]   ;;  %v6261_v62 = vld [vmem:[#allocation3 + $0x3b] sm:$0xff] }
 0x56f   : > { %10276 = vmatprep.mubr.bf16.mxu1 %v5043_v28  ;;  %10309 = vmatpush3.bf16.msra.mxu1 %v11832_v3  ;;  %v5603_v3 = vld [vmem:[#allocation3 + $0x5a] sm:$0xff] }
 0x570   : > { %10310 = vmatprep.subr.bf16.mxu1 %v11833_v56  ;;  %v14810_v37 = vpack.c.bf16 %v5603_v3, %v5602_v18  ;;  %v5607_v28 = vld [vmem:[#allocation3 + $0x7a] sm:$0xff]  ;;  %v11854_v3 = vld [vmem:[%s15220_s5 + $0x150] sm:$0xff]  }
 0x571   : > { %v14822_v10 = vpack.c.bf16 %v5607_v28, %v5606_v45  ;;  %v6265_v18 = vld [vmem:[#allocation3 + $0x5b] sm:$0xff] }
 0x572   : > { %v11856_v28 = vld [vmem:[%s15220_s5 + $0x160] sm:$0xff]  }
 0x573   : > { %10311 = vmatpush3.bf16.msra.mxu1 %v11833_v56  ;;  %v11842_v56 = vld [vmem:[%s15220_s5 + $0xf0] sm:$0xff]   ;;  %v6269_v45 = vld [vmem:[#allocation3 + $0x7b] sm:$0xff] }
 0x574   : > { %10312 = vmatprep.subr.bf16.mxu1 %v11834_v54  ;;  %v11860_v55 = vld [vmem:[%s15220_s5 + $0x180] sm:$0xff]  }
 0x576   : > { %10277 = vmatmul.mubr.bf16.gmra.mrb[96].mxu1 %v5044_v40  ;;  %v11843_v40 = vld [vmem:[%s15220_s5 + $0xf8] sm:$0xff]  }
 0x577   : > { %10280 = vmatprep.mubr.bf16.mxu1 %v5045_v25  ;;  %10313 = vmatpush3.bf16.msra.mxu1 %v11834_v54  ;;  %v5609_v54 = vld [vmem:[#allocation3 + $0x8a] sm:$0xff]  ;;  %v5611_v25 = vld [vmem:[#allocation3 + $0x9a] sm:$0xff] }
 0x578   : > { %10314 = vmatprep.subr.bf16.mxu1 %v11835_v48  ;;  %v14827_v47 = vpack.c.bf16 %v5609_v54, %v5608_v1  ;;  %v5637_v35 = vpack.c.bf16 %v5611_v25, %v5610_v8  ;;  %v6267_v54 = vld [vmem:[#allocation3 + $0x6b] sm:$0xff]  ;;  %v6273_v8 = vld [vmem:[#allocation3 + $0x9b] sm:$0xff] }
 0x579   : > { %v11858_v25 = vld [vmem:[%s15220_s5 + $0x170] sm:$0xff]  }
 0x57b   : > { %10315 = vmatpush3.bf16.msra.mxu1 %v11835_v48  ;;  %v11844_v48 = vld [vmem:[%s15220_s5 + $0x100] sm:$0xff]  }
 0x57c   : > { %10352 = vmatprep.subr.bf16.mxu1 %v11836_v5 }
 0x57e   : > { %10281 = vmatmul.mubr.bf16.gmra.mrb[100].mxu1 %v5046_v20 }
 0x57f   : > { %10284 = vmatprep.mubr.bf16.mxu1 %v5047_v51  ;;  %v5617_v51 = vld [vmem:[#allocation3 + $0xca] sm:$0xff] }
 0x586   : > { %10285 = vmatmul.mubr.bf16.gmra.mrb[104].mxu1 %v5048_v13  ;;  %v5640_v13 = vpack.c.bf16 %v5617_v51, %v5616_v57  ;;  %v6277_v57 = vld [vmem:[#allocation3 + $0xbb] sm:$0xff] }
 0x587   : > { %10288 = vmatprep.mubr.bf16.mxu1 %v5049_v27  ;;  %v5621_v27 = vld [vmem:[#allocation3 + $0xea] sm:$0xff] }
 0x58e   : > { %10289 = vmatmul.mubr.bf16.gmra.mrb[108].mxu1 %v5050_v59  ;;  %v5642_v59 = vpack.c.bf16 %v5621_v27, %v5620_v34  ;;  %v6276_v27 = vld [vmem:[#allocation3 + $0xb3] sm:$0xff]  ;;  %v6281_v34 = vld [vmem:[#allocation3 + $0xdb] sm:$0xff] }
 0x58f   : > { %10292 = vmatprep.mubr.bf16.mxu1 %v5051_v49  ;;  %v5625_v49 = vld [vmem:[#allocation3 + $0x10a] sm:$0xff]  ;;  %v6302_v22 = vpack.c.bf16 %v6277_v57, %v6276_v27 }
 0x590   : > { %v6611_v27 = vld [vmem:[#allocation3 + $0xcc] sm:$0xff] }
 0x596   : > { %10293 = vmatmul.mubr.bf16.gmra.mrb[112].mxu1 %v5052_v33  ;;  %v5644_v33 = vpack.c.bf16 %v5625_v49, %v5624_v23  ;;  %v6280_v49 = vld [vmem:[#allocation3 + $0xd3] sm:$0xff]  ;;  %v6285_v23 = vld [vmem:[#allocation3 + $0xfb] sm:$0xff] }
 0x597   : > { %10296 = vmatprep.mubr.bf16.mxu1 %v5053_v4  ;;  %v5626_v4 = vld [vmem:[#allocation3 + $0x112] sm:$0xff]  ;;  %v6304_v32 = vpack.c.bf16 %v6281_v34, %v6280_v49 }
 0x598   : > { %v5645_v52 = vpack.c.bf16 %v5627_v29, %v5626_v4  ;;  %v6284_v4 = vld [vmem:[#allocation3 + $0xf3] sm:$0xff] }
 0x599   : > { %v6615_v49 = vld [vmem:[#allocation3 + $0xec] sm:$0xff] }
 0x59e   : > { %10297 = vmatmul.mubr.bf16.gmra.mrb[116].mxu1 %v5054_v19  ;;  %v11849_v19 = vld [vmem:[%s15220_s5 + $0x128] sm:$0xff]  }
 0x59f   : > { %10316 = vmatprep.mubr.bf16.mxu1 %v5628_v0  ;;  %v11848_v0 = vld [vmem:[%s15220_s5 + $0x120] sm:$0xff]  }
 0x5a6   : > { %10317 = vmatmul.mubr.bf16.vlgmr.msra.gmra.mrb[84].mxu1 %v14786_v61 }
 0x5a7   : > { %10320 = vmatprep.mubr.bf16.mxu1 %v14791_v53  ;;  %10353 = vmatpush3.bf16.msra.mxu1 %v11836_v5  ;;  %v5613_v5 = vld [vmem:[#allocation3 + $0xaa] sm:$0xff] }
 0x5a8   : > { %10354 = vmatprep.subr.bf16.mxu1 %v11837_v24  ;;  %v14834_v20 = vpack.c.bf16 %v5613_v5, %v5612_v36  ;;  %v6271_v5 = vld [vmem:[#allocation3 + $0x8b] sm:$0xff] }
 0x5ab   : > { %10355 = vmatpush3.bf16.msra.mxu1 %v11837_v24  ;;  %v5958_v24 = vld [vmem:[#allocation3 + $0x122] sm:$0xff] }
 0x5ac   : > { %10356 = vmatprep.subr.bf16.mxu1 %v11838_v26 }
 0x5ae   : > { %10321 = vmatmul.mubr.bf16.gmra.mrb[88].mxu1 %v14798_v30 }
 0x5af   : > { %10324 = vmatprep.mubr.bf16.mxu1 %v14803_v38  ;;  %10357 = vmatpush3.bf16.msra.mxu1 %v11838_v26  ;;  %v6256_v26 = vld [vmem:[#allocation3 + $0x13] sm:$0xff] }
 0x5b0   : > { %10358 = vmatprep.subr.bf16.mxu1 %v11839_v44  ;;  %v6292_v9 = vpack.c.bf16 %v6257_v11, %v6256_v26  ;;  %v6591_v26 = vld [vmem:[#allocation3 + $0x2c] sm:$0xff] }
 0x5b3   : > { %10359 = vmatpush3.bf16.msra.mxu1 %v11839_v44  ;;  %v6260_v44 = vld [vmem:[#allocation3 + $0x33] sm:$0xff] }
 0x5b4   : > { %10360 = vmatprep.subr.bf16.mxu1 %v11840_v21 }
 0x5b6   : > { %10325 = vmatmul.mubr.bf16.gmra.mrb[92].mxu1 %v14810_v37 }
 0x5b7   : > { %10328 = vmatprep.mubr.bf16.mxu1 %v14815_v17  ;;  %10361 = vmatpush3.bf16.msra.mxu1 %v11840_v21  ;;  %v6294_v21 = vpack.c.bf16 %v6261_v62, %v6260_v44 }
 0x5b8   : > { %10362 = vmatprep.subr.bf16.mxu1 %v11841_v16 }
 0x5bb   : > { %10363 = vmatpush3.bf16.msra.mxu1 %v11841_v16  ;;  %v6264_v16 = vld [vmem:[#allocation3 + $0x53] sm:$0xff] }
 0x5bc   : > { %10364 = vmatprep.subr.bf16.mxu1 %v11842_v56 }
 0x5be   : > { %10329 = vmatmul.mubr.bf16.gmra.mrb[96].mxu1 %v14822_v10 }
 0x5bf   : > { %10332 = vmatprep.mubr.bf16.mxu1 %v14827_v47  ;;  %10365 = vmatpush3.bf16.msra.mxu1 %v11842_v56  ;;  %v6296_v56 = vpack.c.bf16 %v6265_v18, %v6264_v16 }
 0x5c0   : > { %10366 = vmatprep.subr.bf16.mxu1 %v11843_v40 }
 0x5c3   : > { %10367 = vmatpush3.bf16.msra.mxu1 %v11843_v40  ;;  %v6268_v40 = vld [vmem:[#allocation3 + $0x73] sm:$0xff] }
 0x5c4   : > { %10404 = vmatprep.subr.bf16.mxu1 %v11844_v48 }
 0x5c6   : > { %10333 = vmatmul.mubr.bf16.gmra.mrb[100].mxu1 %v5637_v35 }
 0x5c7   : > { %10336 = vmatprep.mubr.bf16.mxu1 %v14834_v20 }
 0x5ce   : > { %10337 = vmatmul.mubr.bf16.gmra.mrb[104].mxu1 %v5639_v60 }
 0x5cf   : > { %10340 = vmatprep.mubr.bf16.mxu1 %v5640_v13 }
 0x5d6   : > { %10341 = vmatmul.mubr.bf16.gmra.mrb[108].mxu1 %v5641_v42 }
 0x5d7   : > { %10344 = vmatprep.mubr.bf16.mxu1 %v5642_v59 }
 0x5de   : > { %10345 = vmatmul.mubr.bf16.gmra.mrb[112].mxu1 %v5643_v46 }
 0x5df   : > { %10348 = vmatprep.mubr.bf16.mxu1 %v5644_v33 }
 0x5e6   : > { %10349 = vmatmul.mubr.bf16.gmra.mrb[116].mxu1 %v5645_v52 }
 0x5e7   : > { %10368 = vmatprep.mubr.bf16.mxu1 %v14786_v61  ;;  %v5959_v61 = vld [vmem:[#allocation3 + $0x12a] sm:$0xff] }
 0x5ee   : > { %10369 = vmatmul.mubr.bf16.vlgmr.msra.gmra.mrb[84].mxu1 %v14791_v53  ;;  %v5977_v53 = vpack.c.bf16 %v5959_v61, %v5958_v24  ;;  %v6290_v61 = vld [vmem:[#allocation3 + $0x123] sm:$0xff]  ;;  %v6588_v24 = vld [vmem:[#allocation3 + $0x14] sm:$0xff] }
 0x5ef   : > { %10372 = vmatprep.mubr.bf16.mxu1 %v14798_v30  ;;  %10405 = vmatpush3.bf16.msra.mxu1 %v11844_v48  ;;  %v6258_v30 = vld [vmem:[#allocation3 + $0x23] sm:$0xff]  ;;  %v6298_v48 = vpack.c.bf16 %v6269_v45, %v6268_v40 }
 0x5f0   : > { %10406 = vmatprep.subr.bf16.mxu1 %v11845_v6  ;;  %v6293_v63 = vpack.c.bf16 %v6259_v39, %v6258_v30  ;;  %v6590_v39 = vld [vmem:[#allocation3 + $0x24] sm:$0xff]  ;;  %v6592_v30 = vld [vmem:[#allocation3 + $0x34] sm:$0xff] }
 0x5f1   : > { %v14894_v62 = vpack.c.bf16 %v6591_v26, %v6590_v39  ;;  %v11874_v26 = vld [vmem:[%s15220_s5 + $0x1f0] sm:$0xff]   ;;  %v11876_v39 = vld [vmem:[%s15220_s5 + $0x200] sm:$0xff]  }
 0x5f3   : > { %10407 = vmatpush3.bf16.msra.mxu1 %v11845_v6  ;;  %v6287_v6 = vld [vmem:[#allocation3 + $0x10b] sm:$0xff] }
 0x5f4   : > { %10408 = vmatprep.subr.bf16.mxu1 %v11846_v43 }
 0x5f6   : > { %10373 = vmatmul.mubr.bf16.gmra.mrb[88].mxu1 %v14803_v38  ;;  %v11853_v38 = vld [vmem:[%s15220_s5 + $0x148] sm:$0xff]  }
 0x5f7   : > { %10376 = vmatprep.mubr.bf16.mxu1 %v14810_v37  ;;  %10409 = vmatpush3.bf16.msra.mxu1 %v11846_v43  ;;  %v6262_v37 = vld [vmem:[#allocation3 + $0x43] sm:$0xff]  ;;  %v6289_v43 = vld [vmem:[#allocation3 + $0x11b] sm:$0xff] }
 0x5f8   : > { %10410 = vmatprep.subr.bf16.mxu1 %v11847_v2  ;;  %v6295_v12 = vpack.c.bf16 %v6263_v58, %v6262_v37  ;;  %v6594_v58 = vld [vmem:[#allocation3 + $0x44] sm:$0xff]  ;;  %v6596_v37 = vld [vmem:[#allocation3 + $0x54] sm:$0xff] }
 0x5fb   : > { %10411 = vmatpush3.bf16.msra.mxu1 %v11847_v2  ;;  %v6286_v2 = vld [vmem:[#allocation3 + $0x103] sm:$0xff] }
 0x5fc   : > { %10412 = vmatprep.subr.bf16.mxu1 %v11848_v0 }
 0x5fe   : > { %10377 = vmatmul.mubr.bf16.gmra.mrb[92].mxu1 %v14815_v17  ;;  %v11855_v17 = vld [vmem:[%s15220_s5 + $0x158] sm:$0xff]  }
 0x5ff   : > { %10380 = vmatprep.mubr.bf16.mxu1 %v14822_v10  ;;  %10413 = vmatpush3.bf16.msra.mxu1 %v11848_v0  ;;  %v6266_v10 = vld [vmem:[#allocation3 + $0x63] sm:$0xff]  ;;  %v6307_v0 = vpack.c.bf16 %v6287_v6, %v6286_v2  ;;  %v6620_v2 = vld [vmem:[#allocation3 + $0x114] sm:$0xff] }
 0x600   : > { %10414 = vmatprep.subr.bf16.mxu1 %v11849_v19  ;;  %v6297_v1 = vpack.c.bf16 %v6267_v54, %v6266_v10  ;;  %v6598_v54 = vld [vmem:[#allocation3 + $0x64] sm:$0xff]  ;;  %v6600_v10 = vld [vmem:[#allocation3 + $0x74] sm:$0xff] }
 0x601   : > { %v6618_v6 = vld [vmem:[#allocation3 + $0x104] sm:$0xff] }
 0x603   : > { %10415 = vmatpush3.bf16.msra.mxu1 %v11849_v19  ;;  %v6288_v19 = vld [vmem:[#allocation3 + $0x113] sm:$0xff] }
 0x604   : > { %10416 = vmatprep.subr.bf16.mxu1 %v11850_v14 }
 0x606   : > { %10381 = vmatmul.mubr.bf16.gmra.mrb[96].mxu1 %v14827_v47  ;;  %v11857_v47 = vld [vmem:[%s15220_s5 + $0x168] sm:$0xff]  }
 0x607   : > { %10384 = vmatprep.mubr.bf16.mxu1 %v5637_v35  ;;  %10417 = vmatpush3.bf16.msra.mxu1 %v11850_v14  ;;  %v6270_v35 = vld [vmem:[#allocation3 + $0x83] sm:$0xff]  ;;  %v6308_v14 = vpack.c.bf16 %v6289_v43, %v6288_v19  ;;  %v6623_v19 = vld [vmem:[#allocation3 + $0x12c] sm:$0xff] }
 0x608   : > { %10418 = vmatprep.subr.bf16.mxu1 %v11851_v15  ;;  %v6299_v36 = vpack.c.bf16 %v6271_v5, %v6270_v35  ;;  %v6602_v5 = vld [vmem:[#allocation3 + $0x84] sm:$0xff]  ;;  %v6604_v35 = vld [vmem:[#allocation3 + $0x94] sm:$0xff] }
 0x60b   : > { %10419 = vmatpush3.bf16.msra.mxu1 %v11851_v15  ;;  %v6291_v15 = vld [vmem:[#allocation3 + $0x12b] sm:$0xff] }
 0x60c   : > { %10456 = vmatprep.subr.bf16.mxu1 %v11852_v7  ;;  %v6309_v11 = vpack.c.bf16 %v6291_v15, %v6290_v61  ;;  %v11870_v61 = vld [vmem:[%s15220_s5 + $0x1d0] sm:$0xff]  }
 0x60e   : > { %10385 = vmatmul.mubr.bf16.gmra.mrb[100].mxu1 %v14834_v20  ;;  %v6272_v20 = vld [vmem:[#allocation3 + $0x93] sm:$0xff] }
 0x60f   : > { %10388 = vmatprep.mubr.bf16.mxu1 %v5639_v60  ;;  %v6300_v51 = vpack.c.bf16 %v6273_v8, %v6272_v20  ;;  %v6275_v60 = vld [vmem:[#allocation3 + $0xab] sm:$0xff] }
 0x616   : > { %10389 = vmatmul.mubr.bf16.gmra.mrb[104].mxu1 %v5640_v13  ;;  %v6274_v13 = vld [vmem:[#allocation3 + $0xa3] sm:$0xff] }
 0x617   : > { %10392 = vmatprep.mubr.bf16.mxu1 %v5641_v42  ;;  %v6301_v31 = vpack.c.bf16 %v6275_v60, %v6274_v13  ;;  %v6279_v42 = vld [vmem:[#allocation3 + $0xcb] sm:$0xff]  ;;  %v6608_v13 = vld [vmem:[#allocation3 + $0xb4] sm:$0xff] }
 0x618   : > { %v6606_v60 = vld [vmem:[#allocation3 + $0xa4] sm:$0xff] }
 0x61e   : > { %10393 = vmatmul.mubr.bf16.gmra.mrb[108].mxu1 %v5642_v59  ;;  %v6278_v59 = vld [vmem:[#allocation3 + $0xc3] sm:$0xff] }
 0x61f   : > { %10396 = vmatprep.mubr.bf16.mxu1 %v5643_v46  ;;  %v6303_v41 = vpack.c.bf16 %v6279_v42, %v6278_v59  ;;  %v6283_v46 = vld [vmem:[#allocation3 + $0xeb] sm:$0xff]  ;;  %v6612_v59 = vld [vmem:[#allocation3 + $0xd4] sm:$0xff] }
 0x620   : > { %v6610_v42 = vld [vmem:[#allocation3 + $0xc4] sm:$0xff] }
 0x621   : > { %v6635_v34 = vpack.c.bf16 %v6611_v27, %v6610_v42  ;;  %v11883_v27 = vld [vmem:[%s15220_s5 + $0x238] sm:$0xff]  }
 0x622   : > { %v7271_v42 = vld [vmem:[#allocation3 + $0xbd] sm:$0xff] }
 0x626   : > { %10397 = vmatmul.mubr.bf16.gmra.mrb[112].mxu1 %v5644_v33  ;;  %v6282_v33 = vld [vmem:[#allocation3 + $0xe3] sm:$0xff] }
 0x627   : > { %10400 = vmatprep.mubr.bf16.mxu1 %v5645_v52  ;;  %v6305_v29 = vpack.c.bf16 %v6283_v46, %v6282_v33  ;;  %v6306_v52 = vpack.c.bf16 %v6285_v23, %v6284_v4  ;;  %v6614_v46 = vld [vmem:[#allocation3 + $0xe4] sm:$0xff]  ;;  %v6616_v33 = vld [vmem:[#allocation3 + $0xf4] sm:$0xff]  ;;  %v6619_v4 = vld [vmem:[#allocation3 + $0x10c] sm:$0xff] }
 0x628   : > { %v6637_v23 = vpack.c.bf16 %v6615_v49, %v6614_v46  ;;  %v6639_v43 = vpack.c.bf16 %v6619_v4, %v6618_v6  ;;  %v7272_v49 = vld [vmem:[#allocation3 + $0xc5] sm:$0xff]  ;;  %v7275_v46 = vld [vmem:[#allocation3 + $0xdd] sm:$0xff] }
 0x629   : > { %v7276_v4 = vld [vmem:[#allocation3 + $0xe5] sm:$0xff]  ;;  %v7279_v6 = vld [vmem:[#allocation3 + $0xfd] sm:$0xff] }
 0x62e   : > { %10401 = vmatmul.mubr.bf16.gmra.mrb[116].mxu1 %v5977_v53 }
 0x62f   : > { %10420 = vmatprep.mubr.bf16.mxu1 %v6292_v9  ;;  %v6593_v9 = vld [vmem:[#allocation3 + $0x3c] sm:$0xff] }
 0x630   : > { %v14899_v44 = vpack.c.bf16 %v6593_v9, %v6592_v30  ;;  %v11875_v9 = vld [vmem:[%s15220_s5 + $0x1f8] sm:$0xff]  }
 0x631   : > { %v6955_v30 = vld [vmem:[#allocation3 + $0x13c] sm:$0xff] }
 0x636   : > { %10421 = vmatmul.mubr.bf16.vlgmr.msra.gmra.mrb[84].mxu1 %v6293_v63  ;;  %v11861_v63 = vld [vmem:[%s15220_s5 + $0x188] sm:$0xff]  }
 0x637   : > { %10424 = vmatprep.mubr.bf16.mxu1 %v6294_v21  ;;  %10457 = vmatpush3.bf16.msra.mxu1 %v11852_v7  ;;  %v6589_v7 = vld [vmem:[#allocation3 + $0x1c] sm:$0xff]  ;;  %v6595_v21 = vld [vmem:[#allocation3 + $0x4c] sm:$0xff] }
 0x638   : > { %10458 = vmatprep.subr.bf16.mxu1 %v11853_v38  ;;  %v6624_v53 = vpack.c.bf16 %v6589_v7, %v6588_v24  ;;  %v14906_v18 = vpack.c.bf16 %v6595_v21, %v6594_v58  ;;  %v11869_v7 = vld [vmem:[%s15220_s5 + $0x1c8] sm:$0xff]   ;;  %v11872_v24 = vld [vmem:[%s15220_s5 + $0x1e0] sm:$0xff]  }
 0x639   : > { %v7257_v58 = vld [vmem:[#allocation3 + $0x4d] sm:$0xff] }
 0x63b   : > { %10459 = vmatpush3.bf16.msra.mxu1 %v11853_v38  ;;  %v11862_v38 = vld [vmem:[%s15220_s5 + $0x190] sm:$0xff]  }
 0x63c   : > { %10460 = vmatprep.subr.bf16.mxu1 %v11854_v3 }
 0x63e   : > { %10425 = vmatmul.mubr.bf16.gmra.mrb[88].mxu1 %v6295_v12  ;;  %v11863_v12 = vld [vmem:[%s15220_s5 + $0x198] sm:$0xff]  }
 0x63f   : > { %10428 = vmatprep.mubr.bf16.mxu1 %v6296_v56  ;;  %10461 = vmatpush3.bf16.msra.mxu1 %v11854_v3  ;;  %v6597_v3 = vld [vmem:[#allocation3 + $0x5c] sm:$0xff]  ;;  %v6599_v56 = vld [vmem:[#allocation3 + $0x6c] sm:$0xff] }
 0x640   : > { %10462 = vmatprep.subr.bf16.mxu1 %v11855_v17  ;;  %v14911_v16 = vpack.c.bf16 %v6597_v3, %v6596_v37  ;;  %v14918_v45 = vpack.c.bf16 %v6599_v56, %v6598_v54  ;;  %v7255_v3 = vld [vmem:[#allocation3 + $0x3d] sm:$0xff]  ;;  %v11878_v56 = vld [vmem:[%s15220_s5 + $0x210] sm:$0xff]  }
 0x641   : > { %v7261_v54 = vld [vmem:[#allocation3 + $0x6d] sm:$0xff] }
 0x643   : > { %10463 = vmatpush3.bf16.msra.mxu1 %v11855_v17  ;;  %v11864_v17 = vld [vmem:[%s15220_s5 + $0x1a0] sm:$0xff]  }
 0x644   : > { %10464 = vmatprep.subr.bf16.mxu1 %v11856_v28 }
 0x646   : > { %10429 = vmatmul.mubr.bf16.gmra.mrb[92].mxu1 %v6297_v1  ;;  %v11865_v1 = vld [vmem:[%s15220_s5 + $0x1a8] sm:$0xff]  }
 0x647   : > { %10432 = vmatprep.mubr.bf16.mxu1 %v6298_v48  ;;  %10465 = vmatpush3.bf16.msra.mxu1 %v11856_v28  ;;  %v6601_v28 = vld [vmem:[#allocation3 + $0x7c] sm:$0xff]  ;;  %v6603_v48 = vld [vmem:[#allocation3 + $0x8c] sm:$0xff] }
 0x648   : > { %10466 = vmatprep.subr.bf16.mxu1 %v11857_v47  ;;  %v14923_v40 = vpack.c.bf16 %v6601_v28, %v6600_v10  ;;  %v14930_v8 = vpack.c.bf16 %v6603_v48, %v6602_v5  ;;  %v7259_v28 = vld [vmem:[#allocation3 + $0x5d] sm:$0xff]  ;;  %v7265_v5 = vld [vmem:[#allocation3 + $0x8d] sm:$0xff] }
 0x649   : > { %v11880_v48 = vld [vmem:[%s15220_s5 + $0x220] sm:$0xff]  }
 0x64b   : > { %10467 = vmatpush3.bf16.msra.mxu1 %v11857_v47  ;;  %v11866_v47 = vld [vmem:[%s15220_s5 + $0x1b0] sm:$0xff]  }
 0x64c   : > { %10468 = vmatprep.subr.bf16.mxu1 %v11858_v25 }
 0x64e   : > { %10433 = vmatmul.mubr.bf16.gmra.mrb[96].mxu1 %v6299_v36  ;;  %v11867_v36 = vld [vmem:[%s15220_s5 + $0x1b8] sm:$0xff]  }
 0x64f   : > { %10436 = vmatprep.mubr.bf16.mxu1 %v6300_v51  ;;  %10469 = vmatpush3.bf16.msra.mxu1 %v11858_v25  ;;  %v6605_v25 = vld [vmem:[#allocation3 + $0x9c] sm:$0xff]  ;;  %v6607_v51 = vld [vmem:[#allocation3 + $0xac] sm:$0xff] }
 0x650   : > { %10470 = vmatprep.subr.bf16.mxu1 %v11859_v50  ;;  %v14935_v20 = vpack.c.bf16 %v6605_v25, %v6604_v35  ;;  %v6633_v57 = vpack.c.bf16 %v6607_v51, %v6606_v60  ;;  %v7263_v25 = vld [vmem:[#allocation3 + $0x7d] sm:$0xff]  ;;  %v11882_v51 = vld [vmem:[%s15220_s5 + $0x230] sm:$0xff]  }
 0x651   : > { %v7269_v60 = vld [vmem:[#allocation3 + $0xad] sm:$0xff] }
 0x653   : > { %10471 = vmatpush3.bf16.msra.mxu1 %v11859_v50  ;;  %v11868_v50 = vld [vmem:[%s15220_s5 + $0x1c0] sm:$0xff]  }
 0x654   : > { %10508 = vmatprep.subr.bf16.mxu1 %v11860_v55 }
 0x656   : > { %10437 = vmatmul.mubr.bf16.gmra.mrb[100].mxu1 %v6301_v31 }
 0x657   : > { %10440 = vmatprep.mubr.bf16.mxu1 %v6302_v22  ;;  %v6613_v22 = vld [vmem:[#allocation3 + $0xdc] sm:$0xff] }
 0x65e   : > { %10441 = vmatmul.mubr.bf16.gmra.mrb[104].mxu1 %v6303_v41  ;;  %v6636_v41 = vpack.c.bf16 %v6613_v22, %v6612_v59  ;;  %v7270_v59 = vld [vmem:[#allocation3 + $0xb5] sm:$0xff] }
 0x65f   : > { %10444 = vmatprep.mubr.bf16.mxu1 %v6304_v32  ;;  %v6617_v32 = vld [vmem:[#allocation3 + $0xfc] sm:$0xff] }
 0x666   : > { %10445 = vmatmul.mubr.bf16.gmra.mrb[108].mxu1 %v6305_v29  ;;  %v6638_v29 = vpack.c.bf16 %v6617_v32, %v6616_v33  ;;  %v7274_v33 = vld [vmem:[#allocation3 + $0xd5] sm:$0xff] }
 0x667   : > { %10448 = vmatprep.mubr.bf16.mxu1 %v6306_v52  ;;  %v6621_v52 = vld [vmem:[#allocation3 + $0x11c] sm:$0xff] }
 0x66e   : > { %10449 = vmatmul.mubr.bf16.gmra.mrb[112].mxu1 %v6307_v0  ;;  %v6640_v0 = vpack.c.bf16 %v6621_v52, %v6620_v2  ;;  %v7278_v2 = vld [vmem:[#allocation3 + $0xf5] sm:$0xff] }
 0x66f   : > { %10452 = vmatprep.mubr.bf16.mxu1 %v6308_v14  ;;  %v6622_v14 = vld [vmem:[#allocation3 + $0x124] sm:$0xff] }
 0x670   : > { %v6641_v15 = vpack.c.bf16 %v6623_v19, %v6622_v14  ;;  %v7280_v19 = vld [vmem:[#allocation3 + $0x105] sm:$0xff] }
 0x676   : > { %10453 = vmatmul.mubr.bf16.gmra.mrb[116].mxu1 %v6309_v11  ;;  %v11871_v11 = vld [vmem:[%s15220_s5 + $0x1d8] sm:$0xff]  }
 0x677   : > { %10472 = vmatprep.mubr.bf16.mxu1 %v6624_v53  ;;  %v11873_v53 = vld [vmem:[%s15220_s5 + $0x1e8] sm:$0xff]  }
 0x67e   : > { %10473 = vmatmul.mubr.bf16.vlgmr.msra.gmra.mrb[84].mxu1 %v14894_v62 }
 0x67f   : > { %10476 = vmatprep.mubr.bf16.mxu1 %v14899_v44  ;;  %10509 = vmatpush3.bf16.msra.mxu1 %v11860_v55  ;;  %v6609_v55 = vld [vmem:[#allocation3 + $0xbc] sm:$0xff] }
 0x680   : > { %10510 = vmatprep.subr.bf16.mxu1 %v11861_v63  ;;  %v14942_v31 = vpack.c.bf16 %v6609_v55, %v6608_v13  ;;  %v7267_v55 = vld [vmem:[#allocation3 + $0x9d] sm:$0xff] }
 0x683   : > { %10511 = vmatpush3.bf16.msra.mxu1 %v11861_v63 }
 0x684   : > { %10512 = vmatprep.subr.bf16.mxu1 %v11862_v38 }
 0x686   : > { %10477 = vmatmul.mubr.bf16.gmra.mrb[88].mxu1 %v14906_v18 }
 0x687   : > { %10480 = vmatprep.mubr.bf16.mxu1 %v14911_v16  ;;  %10513 = vmatpush3.bf16.msra.mxu1 %v11862_v38  ;;  %v7252_v38 = vld [vmem:[#allocation3 + $0x25] sm:$0xff] }
 0x688   : > { %10514 = vmatprep.subr.bf16.mxu1 %v11863_v12 }
 0x68b   : > { %10515 = vmatpush3.bf16.msra.mxu1 %v11863_v12  ;;  %v7256_v12 = vld [vmem:[#allocation3 + $0x45] sm:$0xff] }
 0x68c   : > { %10516 = vmatprep.subr.bf16.mxu1 %v11864_v17 }
 0x68e   : > { %10481 = vmatmul.mubr.bf16.gmra.mrb[92].mxu1 %v14918_v45 }
 0x68f   : > { %10484 = vmatprep.mubr.bf16.mxu1 %v14923_v40  ;;  %10517 = vmatpush3.bf16.msra.mxu1 %v11864_v17  ;;  %v7290_v17 = vpack.c.bf16 %v7257_v58, %v7256_v12  ;;  %v7588_v58 = vld [vmem:[#allocation3 + $0x46] sm:$0xff]  ;;  %v7593_v12 = vld [vmem:[#allocation3 + $0x6e] sm:$0xff] }
 0x690   : > { %10518 = vmatprep.subr.bf16.mxu1 %v11865_v1 }
 0x693   : > { %10519 = vmatpush3.bf16.msra.mxu1 %v11865_v1  ;;  %v7260_v1 = vld [vmem:[#allocation3 + $0x65] sm:$0xff] }
 0x694   : > { %10520 = vmatprep.subr.bf16.mxu1 %v11866_v47 }
 0x696   : > { %10485 = vmatmul.mubr.bf16.gmra.mrb[96].mxu1 %v14930_v8 }
 0x697   : > { %10488 = vmatprep.mubr.bf16.mxu1 %v14935_v20  ;;  %10521 = vmatpush3.bf16.msra.mxu1 %v11866_v47  ;;  %v7292_v47 = vpack.c.bf16 %v7261_v54, %v7260_v1  ;;  %v7595_v54 = vld [vmem:[#allocation3 + $0x7e] sm:$0xff] }
 0x698   : > { %10522 = vmatprep.subr.bf16.mxu1 %v11867_v36 }
 0x69b   : > { %10523 = vmatpush3.bf16.msra.mxu1 %v11867_v36  ;;  %v7264_v36 = vld [vmem:[#allocation3 + $0x85] sm:$0xff] }
 0x69c   : > { %10560 = vmatprep.subr.bf16.mxu1 %v11868_v50 }
 0x69e   : > { %10489 = vmatmul.mubr.bf16.gmra.mrb[100].mxu1 %v6633_v57 }
 0x69f   : > { %10492 = vmatprep.mubr.bf16.mxu1 %v14942_v31 }
 0x6a6   : > { %10493 = vmatmul.mubr.bf16.gmra.mrb[104].mxu1 %v6635_v34 }
 0x6a7   : > { %10496 = vmatprep.mubr.bf16.mxu1 %v6636_v41 }
 0x6ae   : > { %10497 = vmatmul.mubr.bf16.gmra.mrb[108].mxu1 %v6637_v23 }
 0x6af   : > { %10500 = vmatprep.mubr.bf16.mxu1 %v6638_v29 }
 0x6b6   : > { %10501 = vmatmul.mubr.bf16.gmra.mrb[112].mxu1 %v6639_v43 }
 0x6b7   : > { %10504 = vmatprep.mubr.bf16.mxu1 %v6640_v0 }
 0x6be   : > { %10505 = vmatmul.mubr.bf16.gmra.mrb[116].mxu1 %v6641_v15 }
 0x6bf   : > { %10524 = vmatprep.mubr.bf16.mxu1 %v14894_v62  ;;  %v6954_v62 = vld [vmem:[#allocation3 + $0x134] sm:$0xff] }
 0x6c0   : > { %v6973_v63 = vpack.c.bf16 %v6955_v30, %v6954_v62  ;;  %v7585_v62 = vld [vmem:[#allocation3 + $0x2e] sm:$0xff]  ;;  %v7584_v30 = vld [vmem:[#allocation3 + $0x26] sm:$0xff] }
 0x6c6   : > { %10525 = vmatmul.mubr.bf16.vlgmr.msra.gmra.mrb[84].mxu1 %v14899_v44  ;;  %v7253_v44 = vld [vmem:[#allocation3 + $0x2d] sm:$0xff] }
 0x6c7   : > { %10528 = vmatprep.mubr.bf16.mxu1 %v14906_v18  ;;  %10561 = vmatpush3.bf16.msra.mxu1 %v11868_v50  ;;  %v7288_v21 = vpack.c.bf16 %v7253_v44, %v7252_v38  ;;  %v7254_v18 = vld [vmem:[#allocation3 + $0x35] sm:$0xff]  ;;  %v7294_v50 = vpack.c.bf16 %v7265_v5, %v7264_v36  ;;  %v7587_v44 = vld [vmem:[#allocation3 + $0x3e] sm:$0xff] }
 0x6c8   : > { %10562 = vmatprep.subr.bf16.mxu1 %v11869_v7  ;;  %v7289_v37 = vpack.c.bf16 %v7255_v3, %v7254_v18  ;;  %v7589_v38 = vld [vmem:[#allocation3 + $0x4e] sm:$0xff]  ;;  %v7598_v5 = vld [vmem:[#allocation3 + $0x96] sm:$0xff] }
 0x6c9   : > { %v7622_v18 = vpack.c.bf16 %v7589_v38, %v7588_v58 }
 0x6cb   : > { %10563 = vmatpush3.bf16.msra.mxu1 %v11869_v7  ;;  %v7285_v7 = vld [vmem:[#allocation3 + $0x12d] sm:$0xff] }
 0x6cc   : > { %10564 = vmatprep.subr.bf16.mxu1 %v11870_v61 }
 0x6ce   : > { %10529 = vmatmul.mubr.bf16.gmra.mrb[88].mxu1 %v14911_v16  ;;  %v11877_v16 = vld [vmem:[%s15220_s5 + $0x208] sm:$0xff]  }
 0x6cf   : > { %10532 = vmatprep.mubr.bf16.mxu1 %v14918_v45  ;;  %10565 = vmatpush3.bf16.msra.mxu1 %v11870_v61  ;;  %v7258_v45 = vld [vmem:[#allocation3 + $0x55] sm:$0xff] }
 0x6d0   : > { %10566 = vmatprep.subr.bf16.mxu1 %v11871_v11  ;;  %v7291_v10 = vpack.c.bf16 %v7259_v28, %v7258_v45  ;;  %v7282_v61 = vld [vmem:[#allocation3 + $0x115] sm:$0xff] }
 0x6d1   : > { %v7597_v45 = vld [vmem:[#allocation3 + $0x8e] sm:$0xff] }
 0x6d3   : > { %10567 = vmatpush3.bf16.msra.mxu1 %v11871_v11 }
 0x6d4   : > { %10568 = vmatprep.subr.bf16.mxu1 %v11872_v24 }
 0x6d6   : > { %10533 = vmatmul.mubr.bf16.gmra.mrb[92].mxu1 %v14923_v40  ;;  %v11879_v40 = vld [vmem:[%s15220_s5 + $0x218] sm:$0xff]  }
 0x6d7   : > { %10536 = vmatprep.mubr.bf16.mxu1 %v14930_v8  ;;  %10569 = vmatpush3.bf16.msra.mxu1 %v11872_v24  ;;  %v7262_v8 = vld [vmem:[#allocation3 + $0x75] sm:$0xff]  ;;  %v7284_v24 = vld [vmem:[#allocation3 + $0x125] sm:$0xff] }
 0x6d8   : > { %10570 = vmatprep.subr.bf16.mxu1 %v11873_v53  ;;  %v7293_v35 = vpack.c.bf16 %v7263_v25, %v7262_v8  ;;  %v7601_v25 = vld [vmem:[#allocation3 + $0xae] sm:$0xff] }
 0x6db   : > { %10571 = vmatpush3.bf16.msra.mxu1 %v11873_v53  ;;  %v7304_v53 = vpack.c.bf16 %v7285_v7, %v7284_v24  ;;  %v15007_v7 = vld [vmem:[%s15222_s7] ss:$0 sm:$0xff] }
 0x6dc   : > { %10572 = vmatprep.subr.bf16.mxu1 %v11874_v26  ;;  %v15013_v24 = vld [vmem:[%s15223_s8] ss:$0 sm:$0xff] }
 0x6de   : > { %10537 = vmatmul.mubr.bf16.gmra.mrb[96].mxu1 %v14935_v20  ;;  %v11881_v20 = vld [vmem:[%s15220_s5 + $0x228] sm:$0xff]  }
 0x6df   : > { %10540 = vmatprep.mubr.bf16.mxu1 %v6633_v57  ;;  %10573 = vmatpush3.bf16.msra.mxu1 %v11874_v26  ;;  %v7266_v57 = vld [vmem:[#allocation3 + $0x95] sm:$0xff] }
 0x6e0   : > { %10574 = vmatprep.subr.bf16.mxu1 %v11875_v9  ;;  %v7295_v13 = vpack.c.bf16 %v7267_v55, %v7266_v57  ;;  %v7286_v26 = vld [vmem:[#allocation3 + $0x135] sm:$0xff] }
 0x6e3   : > { %10575 = vmatpush3.bf16.msra.mxu1 %v11875_v9  ;;  %v7287_v9 = vld [vmem:[#allocation3 + $0x13d] sm:$0xff] }
 0x6e4   : > { %10612 = vmatprep.subr.bf16.mxu1 %v11876_v39 }
 0x6e6   : > { %10541 = vmatmul.mubr.bf16.gmra.mrb[100].mxu1 %v14942_v31  ;;  %v7268_v31 = vld [vmem:[#allocation3 + $0xa5] sm:$0xff] }
 0x6e7   : > { %10544 = vmatprep.mubr.bf16.mxu1 %v6635_v34  ;;  %v7296_v22 = vpack.c.bf16 %v7269_v60, %v7268_v31  ;;  %v7273_v34 = vld [vmem:[#allocation3 + $0xcd] sm:$0xff] }
 0x6e8   : > { %v7298_v32 = vpack.c.bf16 %v7273_v34, %v7272_v49  ;;  %v7604_v60 = vld [vmem:[#allocation3 + $0xc6] sm:$0xff]  ;;  %v7609_v31 = vld [vmem:[#allocation3 + $0xee] sm:$0xff]  ;;  %v7610_v49 = vld [vmem:[#allocation3 + $0xf6] sm:$0xff] }
 0x6ee   : > { %10545 = vmatmul.mubr.bf16.gmra.mrb[104].mxu1 %v6636_v41  ;;  %v7297_v41 = vpack.c.bf16 %v7271_v42, %v7270_v59  ;;  %v7608_v42 = vld [vmem:[#allocation3 + $0xe6] sm:$0xff]  ;;  %v7611_v59 = vld [vmem:[#allocation3 + $0xfe] sm:$0xff] }
 0x6ef   : > { %10548 = vmatprep.mubr.bf16.mxu1 %v6637_v23  ;;  %v7277_v23 = vld [vmem:[#allocation3 + $0xed] sm:$0xff]  ;;  %v7632_v34 = vpack.c.bf16 %v7609_v31, %v7608_v42 }
 0x6f0   : > { %v7300_v52 = vpack.c.bf16 %v7277_v23, %v7276_v4  ;;  %v7614_v4 = vld [vmem:[#allocation3 + $0x116] sm:$0xff] }
 0x6f6   : > { %10549 = vmatmul.mubr.bf16.gmra.mrb[108].mxu1 %v6638_v29  ;;  %v7299_v29 = vpack.c.bf16 %v7275_v46, %v7274_v33  ;;  %v7612_v46 = vld [vmem:[#allocation3 + $0x106] sm:$0xff]  ;;  %v7615_v33 = vld [vmem:[#allocation3 + $0x11e] sm:$0xff] }
 0x6f7   : > { %10552 = vmatprep.mubr.bf16.mxu1 %v6639_v43  ;;  %v7281_v43 = vld [vmem:[#allocation3 + $0x10d] sm:$0xff] }
 0x6f8   : > { %v7302_v14 = vpack.c.bf16 %v7281_v43, %v7280_v19 }
 0x6fe   : > { %10553 = vmatmul.mubr.bf16.gmra.mrb[112].mxu1 %v6640_v0  ;;  %v7301_v0 = vpack.c.bf16 %v7279_v6, %v7278_v2  ;;  %v7616_v6 = vld [vmem:[#allocation3 + $0x126] sm:$0xff]  ;;  %v7618_v2 = vld [vmem:[#allocation3 + $0x136] sm:$0xff] }
 0x6ff   : > { %10556 = vmatprep.mubr.bf16.mxu1 %v6641_v15  ;;  %v7283_v15 = vld [vmem:[#allocation3 + $0x11d] sm:$0xff] }
 0x700   : > { %v7303_v11 = vpack.c.bf16 %v7283_v15, %v7282_v61 }
 0x706   : > { %10557 = vmatmul.mubr.bf16.gmra.mrb[116].mxu1 %v6973_v63  ;;  %v7620_v63 = vpack.c.bf16 %v7585_v62, %v7584_v30 }
 0x707   : > { %10576 = vmatprep.mubr.bf16.mxu1 %v7288_v21  ;;  %v7586_v21 = vld [vmem:[#allocation3 + $0x36] sm:$0xff] }
 0x708   : > { %v7621_v3 = vpack.c.bf16 %v7587_v44, %v7586_v21 }
 0x70e   : > { %10577 = vmatmul.mubr.bf16.vlgmr.msra.gmra.mrb[84].mxu1 %v7289_v37  ;;  %v7591_v37 = vld [vmem:[#allocation3 + $0x5e] sm:$0xff] }
 0x70f   : > { %10580 = vmatprep.mubr.bf16.mxu1 %v7290_v17  ;;  %10613 = vmatpush3.bf16.msra.mxu1 %v11876_v39  ;;  %v7305_v39 = vpack.c.bf16 %v7287_v9, %v7286_v26 }
 0x710   : > { %10614 = vmatprep.subr.bf16.mxu1 %v11877_v16 }
 0x713   : > { %10615 = vmatpush3.bf16.msra.mxu1 %v11877_v16  ;;  %v7590_v16 = vld [vmem:[#allocation3 + $0x56] sm:$0xff] }
 0x714   : > { %10616 = vmatprep.subr.bf16.mxu1 %v11878_v56  ;;  %v7623_v17 = vpack.c.bf16 %v7591_v37, %v7590_v16 }
 0x716   : > { %10581 = vmatmul.mubr.bf16.gmra.mrb[88].mxu1 %v7291_v10  ;;  %v7594_v10 = vld [vmem:[#allocation3 + $0x76] sm:$0xff] }
 0x717   : > { %10584 = vmatprep.mubr.bf16.mxu1 %v7292_v47  ;;  %10617 = vmatpush3.bf16.msra.mxu1 %v11878_v56  ;;  %v7592_v56 = vld [vmem:[#allocation3 + $0x66] sm:$0xff]  ;;  %v7625_v1 = vpack.c.bf16 %v7595_v54, %v7594_v10 }
 0x718   : > { %10618 = vmatprep.subr.bf16.mxu1 %v11879_v40  ;;  %v7624_v28 = vpack.c.bf16 %v7593_v12, %v7592_v56 }
 0x71b   : > { %10619 = vmatpush3.bf16.msra.mxu1 %v11879_v40  ;;  %v7596_v40 = vld [vmem:[#allocation3 + $0x86] sm:$0xff] }
 0x71c   : > { %10620 = vmatprep.subr.bf16.mxu1 %v11880_v48  ;;  %v7626_v47 = vpack.c.bf16 %v7597_v45, %v7596_v40 }
 0x71e   : > { %10585 = vmatmul.mubr.bf16.gmra.mrb[92].mxu1 %v7293_v35  ;;  %v7600_v35 = vld [vmem:[#allocation3 + $0xa6] sm:$0xff] }
 0x71f   : > { %10588 = vmatprep.mubr.bf16.mxu1 %v7294_v50  ;;  %10621 = vmatpush3.bf16.msra.mxu1 %v11880_v48  ;;  %v7599_v48 = vld [vmem:[#allocation3 + $0x9e] sm:$0xff]  ;;  %v7628_v36 = vpack.c.bf16 %v7601_v25, %v7600_v35  ;;  %v7605_v50 = vld [vmem:[#allocation3 + $0xce] sm:$0xff] }
 0x720   : > { %10622 = vmatprep.subr.bf16.mxu1 %v11881_v20  ;;  %v7627_v8 = vpack.c.bf16 %v7599_v48, %v7598_v5  ;;  %v7630_v57 = vpack.c.bf16 %v7605_v50, %v7604_v60 }
 0x723   : > { %10623 = vmatpush3.bf16.msra.mxu1 %v11881_v20  ;;  %v7603_v20 = vld [vmem:[#allocation3 + $0xbe] sm:$0xff] }
 0x724   : > { %10624 = vmatprep.subr.bf16.mxu1 %v11882_v51 }
 0x726   : > { %10589 = vmatmul.mubr.bf16.gmra.mrb[96].mxu1 %v7295_v13  ;;  %v7607_v13 = vld [vmem:[#allocation3 + $0xde] sm:$0xff] }
 0x727   : > { %10592 = vmatprep.mubr.bf16.mxu1 %v7296_v22  ;;  %10625 = vmatpush3.bf16.msra.mxu1 %v11882_v51  ;;  %v7602_v51 = vld [vmem:[#allocation3 + $0xb6] sm:$0xff] }
 0x728   : > { %10626 = vmatprep.subr.bf16.mxu1 %v11883_v27  ;;  %v7629_v55 = vpack.c.bf16 %v7603_v20, %v7602_v51 }
 0x72b   : > { %10627 = vmatpush3.bf16.msra.mxu1 %v11883_v27  ;;  %v7606_v27 = vld [vmem:[#allocation3 + $0xd6] sm:$0xff] }
 0x72c   : > { %v7631_v22 = vpack.c.bf16 %v7607_v13, %v7606_v27 }
 0x72e   : > { %10593 = vmatmul.mubr.bf16.gmra.mrb[100].mxu1 %v7297_v41  ;;  %v7613_v41 = vld [vmem:[#allocation3 + $0x10e] sm:$0xff] }
 0x72f   : > { %10596 = vmatprep.mubr.bf16.mxu1 %v7298_v32  ;;  %v7633_v32 = vpack.c.bf16 %v7611_v59, %v7610_v49  ;;  %v7634_v23 = vpack.c.bf16 %v7613_v41, %v7612_v46 }
 0x736   : > { %10597 = vmatmul.mubr.bf16.gmra.mrb[104].mxu1 %v7299_v29  ;;  %v7617_v29 = vld [vmem:[#allocation3 + $0x12e] sm:$0xff] }
 0x737   : > { %10600 = vmatprep.mubr.bf16.mxu1 %v7300_v52  ;;  %v7635_v52 = vpack.c.bf16 %v7615_v33, %v7614_v4  ;;  %v7636_v43 = vpack.c.bf16 %v7617_v29, %v7616_v6 }
 0x73e   : > { %10601 = vmatmul.mubr.bf16.gmra.mrb[108].mxu1 %v7301_v0  ;;  %v7619_v0 = vld [vmem:[#allocation3 + $0x13e] sm:$0xff] }
 0x73f   : > { %10604 = vmatprep.mubr.bf16.mxu1 %v7302_v14  ;;  %v7637_v19 = vpack.c.bf16 %v7619_v0, %v7618_v2  ;;  %v15002_v14 = vld [vmem:[%s15221_s6] ss:$0 sm:$0xff] }
 0x746   : > { %10605 = vmatmul.mubr.bf16.gmra.mrb[112].mxu1 %v7303_v11 }
 0x747   : > { %10608 = vmatprep.mubr.bf16.mxu1 %v7304_v53 }
 0x74e   : > { %10609 = vmatmul.mubr.bf16.gmra.mrb[116].mxu1 %v7305_v39 }
 0x74f   : > { %10628 = vmatprep.mubr.bf16.mxu1 %v7620_v63 }
 0x756   : > { %10629 = vmatmul.mubr.bf16.vlgmr.msra.gmra.mrb[84].mxu1 %v7621_v3 }
 0x757   : > { %10632 = vmatprep.mubr.bf16.mxu1 %v7622_v18 }
 0x75e   : > { %10633 = vmatmul.mubr.bf16.gmra.mrb[88].mxu1 %v7623_v17 }
 0x75f   : > { %10636 = vmatprep.mubr.bf16.mxu1 %v7624_v28 }
 0x766   : > { %10637 = vmatmul.mubr.bf16.gmra.mrb[92].mxu1 %v7625_v1 }
 0x767   : > { %10640 = vmatprep.mubr.bf16.mxu1 %v7626_v47 }
 0x76e   : > { %10641 = vmatmul.mubr.bf16.gmra.mrb[96].mxu1 %v7627_v8 }
 0x76f   : > { %10644 = vmatprep.mubr.bf16.mxu1 %v7628_v36 }
 0x776   : > { %10645 = vmatmul.mubr.bf16.gmra.mrb[100].mxu1 %v7629_v55 }
 0x777   : > { %10648 = vmatprep.mubr.bf16.mxu1 %v7630_v57 }
 0x77e   : > { %10649 = vmatmul.mubr.bf16.gmra.mrb[104].mxu1 %v7631_v22 }
 0x77f   : > { %10652 = vmatprep.mubr.bf16.mxu1 %v7632_v34 }
 0x786   : > { %10653 = vmatmul.mubr.bf16.gmra.mrb[108].mxu1 %v7633_v32 }
 0x787   : > { %10656 = vmatprep.mubr.bf16.mxu1 %v7634_v23 }
 0x78e   : > { %10657 = vmatmul.mubr.bf16.gmra.mrb[112].mxu1 %v7635_v52 }
 0x78f   : > { %10660 = vmatprep.mubr.bf16.mxu1 %v7636_v43 }
 0x796   : > { %10661 = vmatmul.mubr.bf16.gmra.mrb[116].mxu1 %v7637_v19 }
 0x829   : > { %v10630_v15 = vpop.f32.mrb[84].mxu1 }
 0x82a   : > { %v7925_v61 = vmul.f32 %v10630_v15, %v15002_v14  ;;  %v7737_v11 = vpop.f32.mrb[85].mxu1 }
 0x82b   : > { %v7923_v53 = vmul.f32 %v15002_v14, %v7737_v11  ;;  %v10631_v26 = vpop.f32.mrb[86].mxu1 }
 0x82c   : > { %v7968_v9 = vadd.f32 %v15007_v7, %v7925_v61  ;;  %v7926_v39 = vmul.f32 %v10631_v26, %v15002_v14  ;;  %v7740_v62 = vpop.f32.mrb[87].mxu1 }
 0x82d   : > { %v7966_v30 = vadd.f32 %v15007_v7, %v7923_v53  ;;  %v7924_v63 = vmul.f32 %v15002_v14, %v7740_v62 }
 0x82e   : > { %vm8004_vm4 = vcmp.gt.f32.partialorder %v7968_v9, 0.0  ;;  %v8047_v44 = vmul.f32 %v15013_v24, %v7968_v9  ;;  %v7969_v38 = vadd.f32 %v15007_v7, %v7926_v39 }
 0x82f   : > { %vm8002_vm14 = vcmp.gt.f32.partialorder %v7966_v30, 0.0  ;;  %v8045_v21 = vmul.f32 %v15013_v24, %v7966_v30  ;;  %v7967_v3 = vadd.f32 %v15007_v7, %v7924_v63 }
 0x830   : > { %v8083_v58 = vsel %vm8004_vm4, %v7968_v9, %v8047_v44  ;;  %vm8005_vm1 = vcmp.gt.f32.partialorder %v7969_v38, 0.0  ;;  %v8048_v18 = vmul.f32 %v15013_v24, %v7969_v38 }
 0x831   : > { %8119 = vst [vmem:[%s12202_s29 + $0x10] sm:$0xff] %v8083_v58  ;;  %v8081_v37 = vsel %vm8002_vm14, %v7966_v30, %v8045_v21  ;;  %vm8003_vm6 = vcmp.gt.f32.partialorder %v7967_v3, 0.0  ;;  %v8046_v12 = vmul.f32 %v15013_v24, %v7967_v3  ;;  %v10634_v16 = vpop.f32.mrb[88].mxu1 }
 0x832   : > { %8117 = vst [vmem:[%s12202_s29] sm:$0xff] %v8081_v37  ;;  %v8084_v17 = vsel %vm8005_vm1, %v7969_v38, %v8048_v18  ;;  %v7929_v56 = vmul.f32 %v10634_v16, %v15002_v14  ;;  %v7753_v28 = vpop.f32.mrb[89].mxu1 }
 0x833   : > { %8120 = vst [vmem:[%s12202_s29 + $0x18] sm:$0xff] %v8084_v17  ;;  %v8082_v54 = vsel %vm8003_vm6, %v7967_v3, %v8046_v12  ;;  %v7927_v45 = vmul.f32 %v15002_v14, %v7753_v28  ;;  %v10635_v10 = vpop.f32.mrb[90].mxu1 }
 0x834   : > { %8118 = vst [vmem:[%s12202_s29 + $0x8] sm:$0xff] %v8082_v54  ;;  %v7972_v1 = vadd.f32 %v15007_v7, %v7929_v56  ;;  %v7930_v40 = vmul.f32 %v10635_v10, %v15002_v14  ;;  %v7756_v47 = vpop.f32.mrb[91].mxu1 }
 0x835   : > { %v7970_v48 = vadd.f32 %v15007_v7, %v7927_v45  ;;  %v7928_v25 = vmul.f32 %v15002_v14, %v7756_v47 }
 0x836   : > { %vm8008_vm7 = vcmp.gt.f32.partialorder %v7972_v1, 0.0  ;;  %v8051_v5 = vmul.f32 %v15013_v24, %v7972_v1  ;;  %v7973_v8 = vadd.f32 %v15007_v7, %v7930_v40 }
 0x837   : > { %vm8006_vm12 = vcmp.gt.f32.partialorder %v7970_v48, 0.0  ;;  %v8049_v35 = vmul.f32 %v15013_v24, %v7970_v48  ;;  %v7971_v36 = vadd.f32 %v15007_v7, %v7928_v25 }
 0x838   : > { %v8087_v20 = vsel %vm8008_vm7, %v7972_v1, %v8051_v5  ;;  %vm8009_vm10 = vcmp.gt.f32.partialorder %v7973_v8, 0.0  ;;  %v8052_v50 = vmul.f32 %v15013_v24, %v7973_v8 }
 0x839   : > { %8123 = vst [vmem:[%s12202_s29 + $0x30] sm:$0xff] %v8087_v20  ;;  %v8085_v51 = vsel %vm8006_vm12, %v7970_v48, %v8049_v35  ;;  %vm8007_vm3 = vcmp.gt.f32.partialorder %v7971_v36, 0.0  ;;  %v8050_v55 = vmul.f32 %v15013_v24, %v7971_v36  ;;  %v10638_v60 = vpop.f32.mrb[92].mxu1 }
 0x83a   : > { %8121 = vst [vmem:[%s12202_s29 + $0x20] sm:$0xff] %v8085_v51  ;;  %v8088_v57 = vsel %vm8009_vm10, %v7973_v8, %v8052_v50  ;;  %v7933_v13 = vmul.f32 %v10638_v60, %v15002_v14  ;;  %v7769_v31 = vpop.f32.mrb[93].mxu1 }
 0x83b   : > { %8124 = vst [vmem:[%s12202_s29 + $0x38] sm:$0xff] %v8088_v57  ;;  %v8086_v27 = vsel %vm8007_vm3, %v7971_v36, %v8050_v55  ;;  %v7931_v22 = vmul.f32 %v15002_v14, %v7769_v31  ;;  %v10639_v42 = vpop.f32.mrb[94].mxu1 }
 0x83c   : > { %8122 = vst [vmem:[%s12202_s29 + $0x28] sm:$0xff] %v8086_v27  ;;  %v7976_v34 = vadd.f32 %v15007_v7, %v7933_v13  ;;  %v7934_v59 = vmul.f32 %v10639_v42, %v15002_v14  ;;  %v7772_v41 = vpop.f32.mrb[95].mxu1 }
 0x83d   : > { %v7974_v49 = vadd.f32 %v15007_v7, %v7931_v22  ;;  %v7932_v32 = vmul.f32 %v15002_v14, %v7772_v41 }
 0x83e   : > { %vm8012_vm11 = vcmp.gt.f32.partialorder %v7976_v34, 0.0  ;;  %v8055_v46 = vmul.f32 %v15013_v24, %v7976_v34  ;;  %v7977_v23 = vadd.f32 %v15007_v7, %v7934_v59 }
 0x83f   : > { %vm8010_vm0 = vcmp.gt.f32.partialorder %v7974_v49, 0.0  ;;  %v8053_v33 = vmul.f32 %v15013_v24, %v7974_v49  ;;  %v7975_v29 = vadd.f32 %v15007_v7, %v7932_v32 }
 0x840   : > { %v8091_v4 = vsel %vm8012_vm11, %v7976_v34, %v8055_v46  ;;  %vm8013_vm15 = vcmp.gt.f32.partialorder %v7977_v23, 0.0  ;;  %v8056_v52 = vmul.f32 %v15013_v24, %v7977_v23 }
 0x841   : > { %8127 = vst [vmem:[%s12202_s29 + $0x50] sm:$0xff] %v8091_v4  ;;  %v8089_v6 = vsel %vm8010_vm0, %v7974_v49, %v8053_v33  ;;  %vm8011_vm9 = vcmp.gt.f32.partialorder %v7975_v29, 0.0  ;;  %v8054_v43 = vmul.f32 %v15013_v24, %v7975_v29  ;;  %v10642_v2 = vpop.f32.mrb[96].mxu1 }
 0x842   : > { %8125 = vst [vmem:[%s12202_s29 + $0x40] sm:$0xff] %v8089_v6  ;;  %v8092_v0 = vsel %vm8013_vm15, %v7977_v23, %v8056_v52  ;;  %v7937_v19 = vmul.f32 %v10642_v2, %v15002_v14  ;;  %v7785_v15 = vpop.f32.mrb[97].mxu1 }
 0x843   : > { %8128 = vst [vmem:[%s12202_s29 + $0x58] sm:$0xff] %v8092_v0  ;;  %v8090_v61 = vsel %vm8011_vm9, %v7975_v29, %v8054_v43  ;;  %v7935_v11 = vmul.f32 %v15002_v14, %v7785_v15  ;;  %v10643_v53 = vpop.f32.mrb[98].mxu1 }
 0x844   : > { %8126 = vst [vmem:[%s12202_s29 + $0x48] sm:$0xff] %v8090_v61  ;;  %v7980_v26 = vadd.f32 %v15007_v7, %v7937_v19  ;;  %v7938_v9 = vmul.f32 %v10643_v53, %v15002_v14  ;;  %v7788_v39 = vpop.f32.mrb[99].mxu1 }
 0x845   : > { %v7978_v62 = vadd.f32 %v15007_v7, %v7935_v11  ;;  %v7936_v30 = vmul.f32 %v15002_v14, %v7788_v39 }
 0x846   : > { %vm8016_vm8 = vcmp.gt.f32.partialorder %v7980_v26, 0.0  ;;  %v8059_v63 = vmul.f32 %v15013_v24, %v7980_v26  ;;  %v7981_v44 = vadd.f32 %v15007_v7, %v7938_v9 }
 0x847   : > { %vm8014_vm2 = vcmp.gt.f32.partialorder %v7978_v62, 0.0  ;;  %v8057_v38 = vmul.f32 %v15013_v24, %v7978_v62  ;;  %v7979_v21 = vadd.f32 %v15007_v7, %v7936_v30 }
 0x848   : > { %v8095_v3 = vsel %vm8016_vm8, %v7980_v26, %v8059_v63  ;;  %vm8017_vm5 = vcmp.gt.f32.partialorder %v7981_v44, 0.0  ;;  %v8060_v58 = vmul.f32 %v15013_v24, %v7981_v44 }
 0x849   : > { %8131 = vst [vmem:[%s12202_s29 + $0x70] sm:$0xff] %v8095_v3  ;;  %v8093_v18 = vsel %vm8014_vm2, %v7978_v62, %v8057_v38  ;;  %vm8015_vm13 = vcmp.gt.f32.partialorder %v7979_v21, 0.0  ;;  %v8058_v37 = vmul.f32 %v15013_v24, %v7979_v21  ;;  %v10646_v12 = vpop.f32.mrb[100].mxu1 }
 0x84a   : > { %8129 = vst [vmem:[%s12202_s29 + $0x60] sm:$0xff] %v8093_v18  ;;  %v8096_v16 = vsel %vm8017_vm5, %v7981_v44, %v8060_v58  ;;  %v7941_v17 = vmul.f32 %v10646_v12, %v15002_v14  ;;  %v7801_v56 = vpop.f32.mrb[101].mxu1 }
 0x84b   : > { %8132 = vst [vmem:[%s12202_s29 + $0x78] sm:$0xff] %v8096_v16  ;;  %v8094_v28 = vsel %vm8015_vm13, %v7979_v21, %v8058_v37  ;;  %v7939_v54 = vmul.f32 %v15002_v14, %v7801_v56  ;;  %v10647_v45 = vpop.f32.mrb[102].mxu1 }
 0x84c   : > { %8130 = vst [vmem:[%s12202_s29 + $0x68] sm:$0xff] %v8094_v28  ;;  %v7984_v10 = vadd.f32 %v15007_v7, %v7941_v17  ;;  %v7942_v1 = vmul.f32 %v10647_v45, %v15002_v14  ;;  %v7804_v40 = vpop.f32.mrb[103].mxu1 }
 0x84d   : > { %v7982_v47 = vadd.f32 %v15007_v7, %v7939_v54  ;;  %v7940_v48 = vmul.f32 %v15002_v14, %v7804_v40 }
 0x84e   : > { %vm8020_vm4 = vcmp.gt.f32.partialorder %v7984_v10, 0.0  ;;  %v8063_v25 = vmul.f32 %v15013_v24, %v7984_v10  ;;  %v7985_v5 = vadd.f32 %v15007_v7, %v7942_v1 }
 0x84f   : > { %vm8018_vm14 = vcmp.gt.f32.partialorder %v7982_v47, 0.0  ;;  %v8061_v8 = vmul.f32 %v15013_v24, %v7982_v47  ;;  %v7983_v35 = vadd.f32 %v15007_v7, %v7940_v48 }
 0x850   : > { %v8099_v36 = vsel %vm8020_vm4, %v7984_v10, %v8063_v25  ;;  %vm8021_vm1 = vcmp.gt.f32.partialorder %v7985_v5, 0.0  ;;  %v8064_v20 = vmul.f32 %v15013_v24, %v7985_v5 }
 0x851   : > { %8135 = vst [vmem:[%s12202_s29 + $0x90] sm:$0xff] %v8099_v36  ;;  %v8097_v50 = vsel %vm8018_vm14, %v7982_v47, %v8061_v8  ;;  %vm8019_vm6 = vcmp.gt.f32.partialorder %v7983_v35, 0.0  ;;  %v8062_v51 = vmul.f32 %v15013_v24, %v7983_v35  ;;  %v10650_v55 = vpop.f32.mrb[104].mxu1 }
 0x852   : > { %8133 = vst [vmem:[%s12202_s29 + $0x80] sm:$0xff] %v8097_v50  ;;  %v8100_v60 = vsel %vm8021_vm1, %v7985_v5, %v8064_v20  ;;  %v7945_v57 = vmul.f32 %v10650_v55, %v15002_v14  ;;  %v7817_v13 = vpop.f32.mrb[105].mxu1 }
 0x853   : > { %8136 = vst [vmem:[%s12202_s29 + $0x98] sm:$0xff] %v8100_v60  ;;  %v8098_v31 = vsel %vm8019_vm6, %v7983_v35, %v8062_v51  ;;  %v7943_v27 = vmul.f32 %v15002_v14, %v7817_v13  ;;  %v10651_v22 = vpop.f32.mrb[106].mxu1 }
 0x854   : > { %8134 = vst [vmem:[%s12202_s29 + $0x88] sm:$0xff] %v8098_v31  ;;  %v7988_v42 = vadd.f32 %v15007_v7, %v7945_v57  ;;  %v7946_v34 = vmul.f32 %v10651_v22, %v15002_v14  ;;  %v7820_v59 = vpop.f32.mrb[107].mxu1 }
 0x855   : > { %v7986_v41 = vadd.f32 %v15007_v7, %v7943_v27  ;;  %v7944_v49 = vmul.f32 %v15002_v14, %v7820_v59 }
 0x856   : > { %vm8024_vm7 = vcmp.gt.f32.partialorder %v7988_v42, 0.0  ;;  %v8067_v32 = vmul.f32 %v15013_v24, %v7988_v42  ;;  %v7989_v46 = vadd.f32 %v15007_v7, %v7946_v34 }
 0x857   : > { %vm8022_vm12 = vcmp.gt.f32.partialorder %v7986_v41, 0.0  ;;  %v8065_v23 = vmul.f32 %v15013_v24, %v7986_v41  ;;  %v7987_v33 = vadd.f32 %v15007_v7, %v7944_v49 }
 0x858   : > { %v8103_v29 = vsel %vm8024_vm7, %v7988_v42, %v8067_v32  ;;  %vm8025_vm10 = vcmp.gt.f32.partialorder %v7989_v46, 0.0  ;;  %v8068_v4 = vmul.f32 %v15013_v24, %v7989_v46 }
 0x859   : > { %8139 = vst [vmem:[%s12202_s29 + $0xb0] sm:$0xff] %v8103_v29  ;;  %v8101_v52 = vsel %vm8022_vm12, %v7986_v41, %v8065_v23  ;;  %vm8023_vm3 = vcmp.gt.f32.partialorder %v7987_v33, 0.0  ;;  %v8066_v6 = vmul.f32 %v15013_v24, %v7987_v33  ;;  %v10654_v43 = vpop.f32.mrb[108].mxu1 }
 0x85a   : > { %8137 = vst [vmem:[%s12202_s29 + $0xa0] sm:$0xff] %v8101_v52  ;;  %v8104_v2 = vsel %vm8025_vm10, %v7989_v46, %v8068_v4  ;;  %v7949_v0 = vmul.f32 %v10654_v43, %v15002_v14  ;;  %v7833_v19 = vpop.f32.mrb[109].mxu1 }
 0x85b   : > { %8140 = vst [vmem:[%s12202_s29 + $0xb8] sm:$0xff] %v8104_v2  ;;  %v8102_v15 = vsel %vm8023_vm3, %v7987_v33, %v8066_v6  ;;  %v7947_v61 = vmul.f32 %v15002_v14, %v7833_v19  ;;  %v10655_v11 = vpop.f32.mrb[110].mxu1 }
 0x85c   : > { %8138 = vst [vmem:[%s12202_s29 + $0xa8] sm:$0xff] %v8102_v15  ;;  %v7992_v53 = vadd.f32 %v15007_v7, %v7949_v0  ;;  %v7950_v26 = vmul.f32 %v10655_v11, %v15002_v14  ;;  %v7836_v9 = vpop.f32.mrb[111].mxu1 }
 0x85d   : > { %v7990_v39 = vadd.f32 %v15007_v7, %v7947_v61  ;;  %v7948_v62 = vmul.f32 %v15002_v14, %v7836_v9 }
 0x85e   : > { %vm8028_vm11 = vcmp.gt.f32.partialorder %v7992_v53, 0.0  ;;  %v8071_v30 = vmul.f32 %v15013_v24, %v7992_v53  ;;  %v7993_v63 = vadd.f32 %v15007_v7, %v7950_v26 }
 0x85f   : > { %vm8026_vm0 = vcmp.gt.f32.partialorder %v7990_v39, 0.0  ;;  %v8069_v44 = vmul.f32 %v15013_v24, %v7990_v39  ;;  %v7991_v38 = vadd.f32 %v15007_v7, %v7948_v62 }
 0x860   : > { %v8107_v21 = vsel %vm8028_vm11, %v7992_v53, %v8071_v30  ;;  %vm8029_vm15 = vcmp.gt.f32.partialorder %v7993_v63, 0.0  ;;  %v8072_v3 = vmul.f32 %v15013_v24, %v7993_v63 }
 0x861   : > { %8143 = vst [vmem:[%s12202_s29 + $0xd0] sm:$0xff] %v8107_v21  ;;  %v8105_v58 = vsel %vm8026_vm0, %v7990_v39, %v8069_v44  ;;  %vm8027_vm9 = vcmp.gt.f32.partialorder %v7991_v38, 0.0  ;;  %v8070_v18 = vmul.f32 %v15013_v24, %v7991_v38  ;;  %v10658_v37 = vpop.f32.mrb[112].mxu1 }
 0x862   : > { %8141 = vst [vmem:[%s12202_s29 + $0xc0] sm:$0xff] %v8105_v58  ;;  %v8108_v12 = vsel %vm8029_vm15, %v7993_v63, %v8072_v3  ;;  %v7953_v16 = vmul.f32 %v10658_v37, %v15002_v14  ;;  %v7849_v17 = vpop.f32.mrb[113].mxu1 }
 0x863   : > { %8144 = vst [vmem:[%s12202_s29 + $0xd8] sm:$0xff] %v8108_v12  ;;  %v8106_v56 = vsel %vm8027_vm9, %v7991_v38, %v8070_v18  ;;  %v7951_v28 = vmul.f32 %v15002_v14, %v7849_v17  ;;  %v10659_v54 = vpop.f32.mrb[114].mxu1 }
 0x864   : > { %8142 = vst [vmem:[%s12202_s29 + $0xc8] sm:$0xff] %v8106_v56  ;;  %v7996_v45 = vadd.f32 %v15007_v7, %v7953_v16  ;;  %v7954_v10 = vmul.f32 %v10659_v54, %v15002_v14  ;;  %v7852_v1 = vpop.f32.mrb[115].mxu1 }
 0x865   : > { %v7994_v40 = vadd.f32 %v15007_v7, %v7951_v28  ;;  %v7952_v47 = vmul.f32 %v15002_v14, %v7852_v1 }
 0x866   : > { %vm8032_vm8 = vcmp.gt.f32.partialorder %v7996_v45, 0.0  ;;  %v8075_v48 = vmul.f32 %v15013_v24, %v7996_v45  ;;  %v7997_v25 = vadd.f32 %v15007_v7, %v7954_v10 }
 0x867   : > { %vm8030_vm2 = vcmp.gt.f32.partialorder %v7994_v40, 0.0  ;;  %v8073_v5 = vmul.f32 %v15013_v24, %v7994_v40  ;;  %v7995_v8 = vadd.f32 %v15007_v7, %v7952_v47 }
 0x868   : > { %v8111_v35 = vsel %vm8032_vm8, %v7996_v45, %v8075_v48  ;;  %vm8033_vm5 = vcmp.gt.f32.partialorder %v7997_v25, 0.0  ;;  %v8076_v36 = vmul.f32 %v15013_v24, %v7997_v25 }
 0x869   : > { %8147 = vst [vmem:[%s12202_s29 + $0xf0] sm:$0xff] %v8111_v35  ;;  %v8109_v20 = vsel %vm8030_vm2, %v7994_v40, %v8073_v5  ;;  %vm8031_vm13 = vcmp.gt.f32.partialorder %v7995_v8, 0.0  ;;  %v8074_v50 = vmul.f32 %v15013_v24, %v7995_v8  ;;  %v10662_v51 = vpop.f32.mrb[116].mxu1 }
 0x86a   : > { %8145 = vst [vmem:[%s12202_s29 + $0xe0] sm:$0xff] %v8109_v20  ;;  %v8112_v55 = vsel %vm8033_vm5, %v7997_v25, %v8076_v36  ;;  %v7957_v60 = vmul.f32 %v10662_v51, %v15002_v14  ;;  %v7865_v57 = vpop.f32.mrb[117].mxu1 }
 0x86b   : > { %8148 = vst [vmem:[%s12202_s29 + $0xf8] sm:$0xff] %v8112_v55  ;;  %v8110_v13 = vsel %vm8031_vm13, %v7995_v8, %v8074_v50  ;;  %v7955_v31 = vmul.f32 %v15002_v14, %v7865_v57  ;;  %v10663_v27 = vpop.f32.mrb[118].mxu1 }
 0x86c   : > { %8146 = vst [vmem:[%s12202_s29 + $0xe8] sm:$0xff] %v8110_v13  ;;  %v8000_v22 = vadd.f32 %v15007_v7, %v7957_v60  ;;  %v7958_v42 = vmul.f32 %v10663_v27, %v15002_v14  ;;  %v7868_v34 = vpop.f32.mrb[119].mxu1 }
 0x86d   : > { %v7998_v59 = vadd.f32 %v15007_v7, %v7955_v31  ;;  %v7956_v41 = vmul.f32 %v15002_v14, %v7868_v34 }
 0x86e   : > { %vm8036_vm4 = vcmp.gt.f32.partialorder %v8000_v22, 0.0  ;;  %v8079_v49 = vmul.f32 %v15013_v24, %v8000_v22  ;;  %v8001_v32 = vadd.f32 %v15007_v7, %v7958_v42 }
 0x86f   : > { %vm8034_vm14 = vcmp.gt.f32.partialorder %v7998_v59, 0.0  ;;  %v8077_v46 = vmul.f32 %v15013_v24, %v7998_v59  ;;  %v7999_v23 = vadd.f32 %v15007_v7, %v7956_v41 }
 0x870   : > { %v8115_v33 = vsel %vm8036_vm4, %v8000_v22, %v8079_v49  ;;  %vm8037_vm1 = vcmp.gt.f32.partialorder %v8001_v32, 0.0  ;;  %v8080_v14 = vmul.f32 %v15013_v24, %v8001_v32 }
 0x871   : > { %8151 = vst [vmem:[%s12202_s29 + $0x110] sm:$0xff] %v8115_v33  ;;  %v8113_v29 = vsel %vm8034_vm14, %v7998_v59, %v8077_v46  ;;  %vm8035_vm6 = vcmp.gt.f32.partialorder %v7999_v23, 0.0  ;;  %v8078_v4 = vmul.f32 %v15013_v24, %v7999_v23 }
 0x872   : > { %8149 = vst [vmem:[%s12202_s29 + $0x100] sm:$0xff] %v8113_v29  ;;  %v8116_v52 = vsel %vm8037_vm1, %v8001_v32, %v8080_v14 }
 0x873   : > { %8152 = vst [vmem:[%s12202_s29 + $0x118] sm:$0xff] %v8116_v52  ;;  %v8114_v7 = vsel %vm8035_vm6, %v7999_v23, %v8078_v4 }
 0x874   : > { %8150 = vst [vmem:[%s12202_s29 + $0x108] sm:$0xff] %v8114_v7 }
 0x875   : > { %11964 = shalt.err (!%p11961_p3)
}
 0x876   : > { %s11965_s23 = scalar_lea.hbm %s15160_s20, 4608  ;;  %s11969_s12 = scalar_lea.hbm %s15224_s9, 9216 }
 0x877   : > { %p11966_p5 = scmp.ne.s32.totalorder %s15160_s20, %s11965_s23  ;;  %p11970_p9 = scmp.lt.u32.totalorder %s15160_s20, %s15224_s9 }
 0x878   : > { %p11971_p10 = scmp.lt.u32.totalorder %s11969_s12, %s11965_s23  ;;  %p11973_p12 = scmp.lt.u32.totalorder %s11965_s23, %s15160_s20 }
 0x879   : > { %p11967_p6 = pnand %p11966_p5, %p12129_p4 }
 0x87a   : > { %p11972_p11 = por %p11971_p10, %p11970_p9 }
 0x87b   : > { %p11968_p7 = pneg %p11967_p6 }
 0x87c   : > { %p11974_p13 = por %p11973_p12, %p11972_p11 }
 0x87e   : > { %p11975_p0 = pnand %p11974_p13, %p11968_p7 }
 0x880   : > { %11978 = shalt.err (!%p11975_p0)
}
 0x881   : > { %s12037_s25 = smov 128   ;;  %s12038_s27 = smov 8  }
 0x882   : > { %11681 = dma.vmem_to_hbm [thread:$0]  (%p12129_p4), %s15163_s16, 4608, %s15160_s20, %s15169_s24, %s12037_s25, %s12037_s25, %s12038_s27  }
 0x883 PF: > { %p11687_p1 = scmp.ge.s32.totalorder %s12031_s14, 2  ;;  %s8184_s28 = sand.u32 1, %s12011_s30  }
 0x884   : > { %s8185_s23 = scalar_lea.sflag [#allocation6], %s8184_s28 }
 0x885   : > { %p11684_p2 = pnand %p11687_p1, %p12136_p8 }
 0x887   : > { %12006 = dma.done.wait (!%p11684_p2), %s8185_s23, 4608  }
 0x888   : > { %12008 = vsyncadd (!%p11684_p2), %s8185_s23, 4294962688  ;;  %s22_s14 = sadd.s32 1, %s12031_s14   ;;  %s15446_s30 = smov %s12015_s10 }
 0x889   : > { %p19_p3 = scmp.ge.s32.totalorder %s22_s14, 4   ;;  %s15447_s10 = smov %s12019_s11 }
 0x88a   : > { %s15448_s11 = smov %s12142_s22  ;;  %s15449_s12 = smov %s12027_s13 }
 0x88b   : > { %s15450_s13 = smov %s15452_s17  ;;  %21 = sbr.rel (!%p19_p3) target bundleno = 4 (0x4), region = 221 }
 0x892   :  { %8190 = vsyncpa [#allocation6], 1 }
 0x893   :  { %8192 = vsyncpa [#allocation6 + $0x1], 1 }
 0x894   :  { %8193 = vsyncmov [#allocation4] }
 0x897   :  { %s8194_s19 = vpop.sfrf %8193 }
 0x898   :  { %p8799_p4 = scmp.ne.s32.totalorder %s8194_s19, 0 }
 0x89a   :  { %8198 = shalt.err (%p8799_p4)  }
 0x89b   :  { %8200 = vsyncmov [#allocation4 + $0x1] }
 0x89e   :  { %s8201_s21 = vpop.sfrf %8200 }
 0x89f   :  { %p8800_p8 = scmp.ne.s32.totalorder %s8201_s21, 0 }
 0x8a1   :  { %8205 = shalt.err (%p8800_p8)  }

</bundles_post_ra>
